<compile_context>
chip_gen: v7x
topology: tpu7x:2x2x1
jax: 0.10.0
libtpu: 0.0.40
codegen_flags: <defaults>
</compile_context>

<pallas_src>
import functools

import numpy as np
import jax
import jax.numpy as jnp
from jax.experimental import pallas as pl
from jax.experimental.pallas import tpu as pltpu

EPS = 1e-5


def _round_up(v, m):
    return ((v + m - 1) // m) * m


def _bn_train(x, mask, inv_count, gamma, beta):
    """Training-mode BatchNorm on (rows, C) data, one-pass masked statistics.

    Stats use only valid rows (mask == 1, biased variance); normalization is
    applied to every row (halo rows hold garbage that the caller discards)."""
    xm = x * mask
    s1 = jnp.sum(xm, axis=0, keepdims=True)
    s2 = jnp.sum(xm * x, axis=0, keepdims=True)      # == sum(x^2) over valid rows
    mean = s1 * inv_count
    var = jnp.maximum(s2 * inv_count - mean * mean, 0.0)
    return (x - mean) * (gamma * jax.lax.rsqrt(var + EPS)) + beta


def _residual_kernel(
    xcat_ref, wcat_ref, w2_ref, gcat_ref, becat_ref, g2_ref, be2_ref,
    out_ref,
    pad_buf,
    *, s, wpe, cin, cout, rows_p, pad_rows, inv_count, has_shortcut_bn):
    nplanes = s * s

    # ---- conv1 taps built in-kernel from the compact phase-plane input ----
    # Tap (dy,dx) = plane ((dy-1)%s, (dx-1)%s) read at row shift
    # ((dy-1)//s)*WpE + (dx-1)//s.  Distinct shifts are loaded once and lane-sliced.
    shift_of, plane_of = {}, {}
    for dy in range(3):
        for dx in range(3):
            d_y, d_x = dy - 1, dx - 1
            shift_of[(dy, dx)] = (d_y // s) * wpe + (d_x // s)
            plane_of[(dy, dx)] = (d_y % s) * s + (d_x % s)
    windows = {sh: xcat_ref[pad_rows + sh:pad_rows + sh + rows_p, :]
               for sh in sorted(set(shift_of.values()))}
    taps1 = jnp.concatenate(
        [windows[shift_of[(dy, dx)]][:, plane_of[(dy, dx)] * cin:
                                        (plane_of[(dy, dx)] + 1) * cin]
         for dy in range(3) for dx in range(3)], axis=1)       # (rows_p, 9*cin) bf16
    # Validity mask rides in the last packed lane (1.0 valid / 0.0 halo+pad rows).
    mask = windows[0][:, nplanes * cin:nplanes * cin + 1].astype(jnp.float32)

    # ---- conv1 (3x3) + shortcut 1x1: ONE block-structured matmul (no biases:
    #      training-mode BN mean subtraction absorbs them exactly) ----
    hpre = jnp.dot(taps1, wcat_ref[...], preferred_element_type=jnp.float32)
    # One fused BN pass covers bn1 (cols :cout) and the shortcut BN (cols cout:).
    hbn = _bn_train(hpre, mask, inv_count, gcat_ref[...], becat_ref[...])
    a1 = jnp.maximum(hbn[:, :cout], 0.0) * mask     # mask realizes conv2 zero pad
    if has_shortcut_bn:
        sc = hbn[:, cout:]                          # ShortcutBlock: conv + BN
    else:
        sc = hpre[:, cout:]                         # Identity shortcut (no BN)

    # ---- stage a1 (bf16, cast once) into row-padded scratch; zero only pads ----
    zpad = jnp.zeros((pad_rows, cout), jnp.bfloat16)
    pad_buf[0:pad_rows, :] = zpad
    pad_buf[pad_rows + rows_p:pad_rows + rows_p + pad_rows, :] = zpad
    pad_buf[pad_rows:pad_rows + rows_p, :] = a1.astype(jnp.bfloat16)

    # ---- conv2 (3x3, stride 1, pad 1): (rows, 9*Cout) bf16 tap matrix, ONE matmul ----
    taps2 = jnp.concatenate(
        [pad_buf[pad_rows + (dy - 1) * wpe + (dx - 1):
                 pad_rows + (dy - 1) * wpe + (dx - 1) + rows_p, :]
         for dy in range(3) for dx in range(3)], axis=1)
    h2 = jnp.dot(taps2, w2_ref[...], preferred_element_type=jnp.float32)
    h2 = _bn_train(h2, mask, inv_count, g2_ref[...], be2_ref[...])

    # ---- residual add + final ReLU: ONE dense halo'd store (wrapper strips halo) ----
    out_ref[...] = jnp.maximum(h2 + sc, 0.0)


def residual_block_forward(x, params, stride):
    (w1, b1, g1, be1, w2, b2, g2, be2, shortcut) = params
    # b1 / b2 / bs are intentionally unused: train-mode BN absorbs conv biases.
    del b1, b2
    N, Cin, H, W = x.shape
    Cout = w1.shape[0]
    s = int(stride)
    assert s in (1, 2), "ResNet residual blocks use stride 1 or 2"

    H1 = (H - 1) // s + 1             # conv1 / 1x1-shortcut output spatial dims
    W1 = (W - 1) // s + 1
    HpB = H1 + 2                                       # +1-pixel halo top/bottom
    WpE = _round_up(W1 + 2, 16)        # halo + pad to bf16 pack tile for alignment
    rows_p = N * HpB * WpE
    pad_rows = _round_up(WpE + 1, 16)  # zero guard rows so +/-(WpE+1) shifts stay in-bounds
    has_sc = shortcut is not None
    if not has_sc:
        assert Cin == Cout and s == 1, "Identity shortcut requires same shape"

    # ---- glue: compact phase-plane input (NO 9x im2col duplication) ----
    # Plane (py,px) holds input pixel (s*a+py, s*b+px) at block position (a+1, b+1);
    # out-of-range / halo / alignment positions are zero.  Mask lane marks validity.
    x_nhwc = jnp.transpose(x, (0, 2, 3, 1)).astype(jnp.float32)
    planes = []
    for py in range(s):
        for px in range(s):
            sub = x_nhwc[:, py::s, px::s, :]
            ha, wb = sub.shape[1], sub.shape[2]
            planes.append(jnp.pad(
                sub, ((0, 0), (1, HpB - 1 - ha), (1, WpE - 1 - wb), (0, 0))))
    maskv = jnp.pad(jnp.ones((N, H1, W1, 1), jnp.float32),
                    ((0, 0), (1, HpB - 1 - H1), (1, WpE - 1 - W1), (0, 0)))
    xcat = jnp.concatenate(planes + [maskv], axis=-1)
    xcat = xcat.reshape(rows_p, s * s * Cin + 1)
    xcat = jnp.pad(xcat, ((pad_rows, pad_rows), (0, 0))).astype(jnp.bfloat16)

    # ---- glue: weights for the 2-D kernel layout (bf16 matmul operands) ----
    w1f = jnp.transpose(w1, (2, 3, 1, 0)).reshape(9 * Cin, Cout)     # (9*Cin, Cout)
    if has_sc:
        ws, _bs, gs, bes = shortcut
        ws_mat = jnp.transpose(ws.reshape(Cout, Cin))                # (Cin, Cout)
    else:
        ws_mat = jnp.eye(Cin, dtype=jnp.float32)                     # identity skip
        gs = jnp.ones((Cout,), jnp.float32)
        bes = jnp.zeros((Cout,), jnp.float32)
    # Block-structured fused weight: cols :Cout = conv1; cols Cout: = 1x1 shortcut
    # applied to conv1's centre tap (rows 4*Cin:5*Cin).
    wcat = jnp.zeros((9 * Cin, 2 * Cout), jnp.float32)
    wcat = wcat.at[:, :Cout].set(w1f)
    wcat = wcat.at[4 * Cin:5 * Cin, Cout:].set(ws_mat)
    wcat = wcat.astype(jnp.bfloat16)
    w2f = jnp.transpose(w2, (2, 3, 1, 0)).reshape(9 * Cout, Cout).astype(jnp.bfloat16)

    row = lambda v: v.reshape(1, -1).astype(jnp.float32)
    gcat = row(jnp.concatenate([g1, gs]))
    becat = row(jnp.concatenate([be1, bes]))

    kernel = functools.partial(
        _residual_kernel, s=s, wpe=WpE, cin=Cin, cout=Cout,
        rows_p=rows_p, pad_rows=pad_rows,
        inv_count=1.0 / float(N * H1 * W1), has_shortcut_bn=has_sc)

    out_flat = pl.pallas_call(
        kernel,
        out_shape=jax.ShapeDtypeStruct((rows_p, Cout), jnp.float32),
        in_specs=[pl.BlockSpec(memory_space=pltpu.MemorySpace.VMEM)] * 7,
        out_specs=pl.BlockSpec(memory_space=pltpu.MemorySpace.VMEM),
        scratch_shapes=[pltpu.VMEM((rows_p + 2 * pad_rows, Cout), jnp.bfloat16)],
    )(xcat, wcat, w2f, gcat, becat, row(g2), row(be2))

    # Strip the halo / alignment columns with a cheap reshape + slice.
    out = out_flat.reshape(N, HpB, WpE, Cout)[:, 1:1 + H1, 1:1 + W1, :]
    return jnp.transpose(out, (0, 3, 1, 2))           # back to NCHW


# ---------------- pure-JAX reference (mirrors the PyTorch forward) -------------
def _conv2d_ref(x, w, b, stride, padding):
    out = jax.lax.conv_general_dilated(
        x, w, window_strides=(stride, stride),
        padding=[(padding, padding), (padding, padding)],
        dimension_numbers=('NCHW', 'OIHW', 'NCHW'))
    return out + b[None, :, None, None]


def _bn_ref(x, gamma, beta):
    mean = jnp.mean(x, axis=(0, 2, 3), keepdims=True)
    var = jnp.mean((x - mean) ** 2, axis=(0, 2, 3), keepdims=True)
    return (x - mean) / jnp.sqrt(var + EPS) * gamma[None, :, None, None] \
        + beta[None, :, None, None]


def residual_reference(x, params, stride):
    (w1, b1, g1, be1, w2, b2, g2, be2, shortcut) = params
    if shortcut is None:
        sc = x
    else:
        ws, bs, gs, bes = shortcut
        Cout, Cin = ws.reshape(ws.shape[0], -1).shape
        sc = _bn_ref(_conv2d_ref(x, ws.reshape(Cout, Cin, 1, 1), bs, stride, 0), gs, bes)
    h = jax.nn.relu(_bn_ref(_conv2d_ref(x, w1, b1, stride, 1), g1, be1))
    h = _bn_ref(_conv2d_ref(h, w2, b2, 1, 1), g2, be2)
    return jax.nn.relu(h + sc)


if __name__ == "__main__":
    N, Cin, H, W = 2, 4, 16, 16
    Cout, stride = 16, 2          # in != out -> ShortcutBlock active

    keys = jax.random.split(jax.random.PRNGKey(0), 14)
    x = jax.random.normal(keys[0], (N, Cin, H, W), jnp.float32)

    w1 = 0.2 * jax.random.normal(keys[1], (Cout, Cin, 3, 3), jnp.float32)
    b1 = 0.1 * jax.random.normal(keys[2], (Cout,), jnp.float32)
    g1 = 1.0 + 0.1 * jax.random.normal(keys[3], (Cout,), jnp.float32)
    be1 = 0.1 * jax.random.normal(keys[4], (Cout,), jnp.float32)
    w2 = 0.2 * jax.random.normal(keys[5], (Cout, Cout, 3, 3), jnp.float32)
    b2 = 0.1 * jax.random.normal(keys[6], (Cout,), jnp.float32)
    g2 = 1.0 + 0.1 * jax.random.normal(keys[7], (Cout,), jnp.float32)
    be2 = 0.1 * jax.random.normal(keys[8], (Cout,), jnp.float32)
    ws = 0.2 * jax.random.normal(keys[9], (Cout, Cin), jnp.float32)
    bs = 0.1 * jax.random.normal(keys[10], (Cout,), jnp.float32)
    gs = 1.0 + 0.1 * jax.random.normal(keys[11], (Cout,), jnp.float32)
    bes = 0.1 * jax.random.normal(keys[12], (Cout,), jnp.float32)

    params = (w1, b1, g1, be1, w2, b2, g2, be2, (ws, bs, gs, bes))

    out = jax.block_until_ready(residual_block_forward(x, params, stride))
    ref = jax.block_until_ready(residual_reference(x, params, stride))
    np.testing.assert_allclose(np.asarray(out), np.asarray(ref),
                               rtol=3e-2, atol=3e-2)
    print("KERNEL_OK")
</pallas_src>

<mosaic_0001>
module attributes {stable_mosaic.version = 11 : i64} {
  func.func @_residual_kernel(%arg0: memref<384x17xbf16, #tpu.memory_space<vmem>>, %arg1: memref<36x32xbf16, #tpu.memory_space<vmem>>, %arg2: memref<144x16xbf16, #tpu.memory_space<vmem>>, %arg3: memref<1x32xf32, #tpu.memory_space<vmem>>, %arg4: memref<1x32xf32, #tpu.memory_space<vmem>>, %arg5: memref<1x16xf32, #tpu.memory_space<vmem>>, %arg6: memref<1x16xf32, #tpu.memory_space<vmem>>, %arg7: memref<320x16xf32, #tpu.memory_space<vmem>>, %arg8: memref<384x16xbf16, #tpu.memory_space<vmem>>) attributes {dimension_semantics = [], scalar_prefetch = 0 : i64, scratch_operands = 1 : i64, tpu.core_type = #tpu.core_type<tc>} {
    %c15 = arith.constant 15 : index
    %c0 = arith.constant 0 : index
    %0 = vector.load %arg0[%c15, %c0] : memref<384x17xbf16, #tpu.memory_space<vmem>>, vector<320x17xbf16>
    %c16 = arith.constant 16 : index
    %c0_0 = arith.constant 0 : index
    %1 = vector.load %arg0[%c16, %c0_0] : memref<384x17xbf16, #tpu.memory_space<vmem>>, vector<320x17xbf16>
    %c31 = arith.constant 31 : index
    %c0_1 = arith.constant 0 : index
    %2 = vector.load %arg0[%c31, %c0_1] : memref<384x17xbf16, #tpu.memory_space<vmem>>, vector<320x17xbf16>
    %c32 = arith.constant 32 : index
    %c0_2 = arith.constant 0 : index
    %3 = vector.load %arg0[%c32, %c0_2] : memref<384x17xbf16, #tpu.memory_space<vmem>>, vector<320x17xbf16>
    %4 = vector.extract_strided_slice %0 {offsets = [0, 12], sizes = [320, 4], strides = [1, 1]} : vector<320x17xbf16> to vector<320x4xbf16>
    %5 = vector.extract_strided_slice %1 {offsets = [0, 8], sizes = [320, 4], strides = [1, 1]} : vector<320x17xbf16> to vector<320x4xbf16>
    %6 = vector.extract_strided_slice %1 {offsets = [0, 12], sizes = [320, 4], strides = [1, 1]} : vector<320x17xbf16> to vector<320x4xbf16>
    %7 = vector.extract_strided_slice %2 {offsets = [0, 4], sizes = [320, 4], strides = [1, 1]} : vector<320x17xbf16> to vector<320x4xbf16>
    %8 = vector.extract_strided_slice %3 {offsets = [0, 0], sizes = [320, 4], strides = [1, 1]} : vector<320x17xbf16> to vector<320x4xbf16>
    %9 = vector.extract_strided_slice %3 {offsets = [0, 4], sizes = [320, 4], strides = [1, 1]} : vector<320x17xbf16> to vector<320x4xbf16>
    %10 = vector.extract_strided_slice %2 {offsets = [0, 12], sizes = [320, 4], strides = [1, 1]} : vector<320x17xbf16> to vector<320x4xbf16>
    %11 = vector.extract_strided_slice %3 {offsets = [0, 8], sizes = [320, 4], strides = [1, 1]} : vector<320x17xbf16> to vector<320x4xbf16>
    %12 = vector.extract_strided_slice %3 {offsets = [0, 12], sizes = [320, 4], strides = [1, 1]} : vector<320x17xbf16> to vector<320x4xbf16>
    %13 = tpu.concatenate %4, %5, %6, %7, %8, %9, %10, %11, %12 in 1 : vector<320x4xbf16>, vector<320x4xbf16>, vector<320x4xbf16>, vector<320x4xbf16>, vector<320x4xbf16>, vector<320x4xbf16>, vector<320x4xbf16>, vector<320x4xbf16>, vector<320x4xbf16> -> vector<320x36xbf16>
    %14 = vector.extract_strided_slice %3 {offsets = [0, 16], sizes = [320, 1], strides = [1, 1]} : vector<320x17xbf16> to vector<320x1xbf16>
    %15 = arith.extf %14 : vector<320x1xbf16> to vector<320x1xf32>
    %c0_3 = arith.constant 0 : index
    %c0_4 = arith.constant 0 : index
    %16 = vector.load %arg1[%c0_3, %c0_4] : memref<36x32xbf16, #tpu.memory_space<vmem>>, vector<36x32xbf16>
    %cst = arith.constant dense<0.000000e+00> : vector<320x32xf32>
    %17 = tpu.matmul %13, %16, %cst {dimension_numbers = #tpu.dot_dimension_numbers<[1], [0], [0], [1], [0, 0, 1, 1], [], []>} : vector<320x36xbf16>, vector<36x32xbf16>, vector<320x32xf32> -> vector<320x32xf32>
    %c0_5 = arith.constant 0 : index
    %c0_6 = arith.constant 0 : index
    %18 = vector.load %arg3[%c0_5, %c0_6] : memref<1x32xf32, #tpu.memory_space<vmem>>, vector<1x32xf32>
    %c0_7 = arith.constant 0 : index
    %c0_8 = arith.constant 0 : index
    %19 = vector.load %arg4[%c0_7, %c0_8] : memref<1x32xf32, #tpu.memory_space<vmem>>, vector<1x32xf32>
    %20 = vector.broadcast %15 : vector<320x1xf32> to vector<320x32xf32>
    %21 = arith.mulf %17, %20 : vector<320x32xf32>
    %cst_9 = arith.constant dense<0.000000e+00> : vector<32xf32>
    %22 = vector.multi_reduction <add>, %21, %cst_9 [0] : vector<320x32xf32> to vector<32xf32>
    %23 = vector.shape_cast %22 : vector<32xf32> to vector<1x32xf32>
    %24 = arith.mulf %21, %17 : vector<320x32xf32>
    %cst_10 = arith.constant dense<0.000000e+00> : vector<32xf32>
    %25 = vector.multi_reduction <add>, %24, %cst_10 [0] : vector<320x32xf32> to vector<32xf32>
    %26 = vector.shape_cast %25 : vector<32xf32> to vector<1x32xf32>
    %cst_11 = arith.constant 7.812500e-03 : f32
    %27 = vector.broadcast %cst_11 : f32 to vector<1x32xf32>
    %28 = arith.mulf %23, %27 : vector<1x32xf32>
    %cst_12 = arith.constant 7.812500e-03 : f32
    %29 = vector.broadcast %cst_12 : f32 to vector<1x32xf32>
    %30 = arith.mulf %26, %29 : vector<1x32xf32>
    %31 = arith.mulf %28, %28 : vector<1x32xf32>
    %32 = arith.subf %30, %31 : vector<1x32xf32>
    %cst_13 = arith.constant 0.000000e+00 : f32
    %33 = vector.broadcast %cst_13 : f32 to vector<1x32xf32>
    %34 = arith.maximumf %32, %33 : vector<1x32xf32>
    %35 = vector.broadcast %28 : vector<1x32xf32> to vector<320x32xf32>
    %36 = arith.subf %17, %35 : vector<320x32xf32>
    %cst_14 = arith.constant 9.99999974E-6 : f32
    %37 = vector.broadcast %cst_14 : f32 to vector<1x32xf32>
    %38 = arith.addf %34, %37 : vector<1x32xf32>
    %39 = math.rsqrt %38 : vector<1x32xf32>
    %40 = arith.mulf %18, %39 : vector<1x32xf32>
    %41 = vector.broadcast %40 : vector<1x32xf32> to vector<320x32xf32>
    %42 = arith.mulf %36, %41 : vector<320x32xf32>
    %43 = vector.broadcast %19 : vector<1x32xf32> to vector<320x32xf32>
    %44 = arith.addf %42, %43 : vector<320x32xf32>
    %45 = vector.extract_strided_slice %44 {offsets = [0, 0], sizes = [320, 16], strides = [1, 1]} : vector<320x32xf32> to vector<320x16xf32>
    %cst_15 = arith.constant 0.000000e+00 : f32
    %46 = vector.broadcast %cst_15 : f32 to vector<320x16xf32>
    %47 = arith.maximumf %45, %46 : vector<320x16xf32>
    %48 = vector.broadcast %15 : vector<320x1xf32> to vector<320x16xf32>
    %49 = arith.mulf %47, %48 : vector<320x16xf32>
    %50 = vector.extract_strided_slice %44 {offsets = [0, 16], sizes = [320, 16], strides = [1, 1]} : vector<320x32xf32> to vector<320x16xf32>
    %cst_16 = arith.constant 0.000000e+00 : bf16
    %51 = vector.broadcast %cst_16 : bf16 to vector<32x16xbf16>
    %c0_17 = arith.constant 0 : index
    %c0_18 = arith.constant 0 : index
    %52 = vector.load %arg8[%c0_17, %c0_18] : memref<384x16xbf16, #tpu.memory_space<vmem>>, vector<32x16xbf16>
    tpu.vector_store %arg8[%c0_17, %c0_18], %51 {strides = array<i32>} : memref<384x16xbf16, #tpu.memory_space<vmem>>, vector<32x16xbf16>,
    %c352 = arith.constant 352 : index
    %c0_19 = arith.constant 0 : index
    %53 = vector.load %arg8[%c352, %c0_19] : memref<384x16xbf16, #tpu.memory_space<vmem>>, vector<32x16xbf16>
    tpu.vector_store %arg8[%c352, %c0_19], %51 {strides = array<i32>} : memref<384x16xbf16, #tpu.memory_space<vmem>>, vector<32x16xbf16>,
    %54 = arith.truncf %49 : vector<320x16xf32> to vector<320x16xbf16>
    %c32_20 = arith.constant 32 : index
    %c0_21 = arith.constant 0 : index
    %55 = vector.load %arg8[%c32_20, %c0_21] : memref<384x16xbf16, #tpu.memory_space<vmem>>, vector<320x16xbf16>
    tpu.vector_store %arg8[%c32_20, %c0_21], %54 {strides = array<i32>} : memref<384x16xbf16, #tpu.memory_space<vmem>>, vector<320x16xbf16>,
    %c15_22 = arith.constant 15 : index
    %c0_23 = arith.constant 0 : index
    %56 = vector.load %arg8[%c15_22, %c0_23] : memref<384x16xbf16, #tpu.memory_space<vmem>>, vector<320x16xbf16>
    %c16_24 = arith.constant 16 : index
    %c0_25 = arith.constant 0 : index
    %57 = vector.load %arg8[%c16_24, %c0_25] : memref<384x16xbf16, #tpu.memory_space<vmem>>, vector<320x16xbf16>
    %c17 = arith.constant 17 : index
    %c0_26 = arith.constant 0 : index
    %58 = vector.load %arg8[%c17, %c0_26] : memref<384x16xbf16, #tpu.memory_space<vmem>>, vector<320x16xbf16>
    %c31_27 = arith.constant 31 : index
    %c0_28 = arith.constant 0 : index
    %59 = vector.load %arg8[%c31_27, %c0_28] : memref<384x16xbf16, #tpu.memory_space<vmem>>, vector<320x16xbf16>
    %c32_29 = arith.constant 32 : index
    %c0_30 = arith.constant 0 : index
    %60 = vector.load %arg8[%c32_29, %c0_30] : memref<384x16xbf16, #tpu.memory_space<vmem>>, vector<320x16xbf16>
    %c33 = arith.constant 33 : index
    %c0_31 = arith.constant 0 : index
    %61 = vector.load %arg8[%c33, %c0_31] : memref<384x16xbf16, #tpu.memory_space<vmem>>, vector<320x16xbf16>
    %c47 = arith.constant 47 : index
    %c0_32 = arith.constant 0 : index
    %62 = vector.load %arg8[%c47, %c0_32] : memref<384x16xbf16, #tpu.memory_space<vmem>>, vector<320x16xbf16>
    %c48 = arith.constant 48 : index
    %c0_33 = arith.constant 0 : index
    %63 = vector.load %arg8[%c48, %c0_33] : memref<384x16xbf16, #tpu.memory_space<vmem>>, vector<320x16xbf16>
    %c49 = arith.constant 49 : index
    %c0_34 = arith.constant 0 : index
    %64 = vector.load %arg8[%c49, %c0_34] : memref<384x16xbf16, #tpu.memory_space<vmem>>, vector<320x16xbf16>
    %65 = tpu.concatenate %56, %57, %58, %59, %60, %61, %62, %63, %64 in 1 : vector<320x16xbf16>, vector<320x16xbf16>, vector<320x16xbf16>, vector<320x16xbf16>, vector<320x16xbf16>, vector<320x16xbf16>, vector<320x16xbf16>, vector<320x16xbf16>, vector<320x16xbf16> -> vector<320x144xbf16>
    %c0_35 = arith.constant 0 : index
    %c0_36 = arith.constant 0 : index
    %66 = vector.load %arg2[%c0_35, %c0_36] : memref<144x16xbf16, #tpu.memory_space<vmem>>, vector<144x16xbf16>
    %cst_37 = arith.constant dense<0.000000e+00> : vector<320x16xf32>
    %67 = tpu.matmul %65, %66, %cst_37 {dimension_numbers = #tpu.dot_dimension_numbers<[1], [0], [0], [1], [0, 0, 1, 1], [], []>} : vector<320x144xbf16>, vector<144x16xbf16>, vector<320x16xf32> -> vector<320x16xf32>
    %c0_38 = arith.constant 0 : index
    %c0_39 = arith.constant 0 : index
    %68 = vector.load %arg5[%c0_38, %c0_39] : memref<1x16xf32, #tpu.memory_space<vmem>>, vector<1x16xf32>
    %c0_40 = arith.constant 0 : index
    %c0_41 = arith.constant 0 : index
    %69 = vector.load %arg6[%c0_40, %c0_41] : memref<1x16xf32, #tpu.memory_space<vmem>>, vector<1x16xf32>
    %70 = vector.broadcast %15 : vector<320x1xf32> to vector<320x16xf32>
    %71 = arith.mulf %67, %70 : vector<320x16xf32>
    %cst_42 = arith.constant dense<0.000000e+00> : vector<16xf32>
    %72 = vector.multi_reduction <add>, %71, %cst_42 [0] : vector<320x16xf32> to vector<16xf32>
    %73 = vector.shape_cast %72 : vector<16xf32> to vector<1x16xf32>
    %74 = arith.mulf %71, %67 : vector<320x16xf32>
    %cst_43 = arith.constant dense<0.000000e+00> : vector<16xf32>
    %75 = vector.multi_reduction <add>, %74, %cst_43 [0] : vector<320x16xf32> to vector<16xf32>
    %76 = vector.shape_cast %75 : vector<16xf32> to vector<1x16xf32>
    %cst_44 = arith.constant 7.812500e-03 : f32
    %77 = vector.broadcast %cst_44 : f32 to vector<1x16xf32>
    %78 = arith.mulf %73, %77 : vector<1x16xf32>
    %cst_45 = arith.constant 7.812500e-03 : f32
    %79 = vector.broadcast %cst_45 : f32 to vector<1x16xf32>
    %80 = arith.mulf %76, %79 : vector<1x16xf32>
    %81 = arith.mulf %78, %78 : vector<1x16xf32>
    %82 = arith.subf %80, %81 : vector<1x16xf32>
    %cst_46 = arith.constant 0.000000e+00 : f32
    %83 = vector.broadcast %cst_46 : f32 to vector<1x16xf32>
    %84 = arith.maximumf %82, %83 : vector<1x16xf32>
    %85 = vector.broadcast %78 : vector<1x16xf32> to vector<320x16xf32>
    %86 = arith.subf %67, %85 : vector<320x16xf32>
    %cst_47 = arith.constant 9.99999974E-6 : f32
    %87 = vector.broadcast %cst_47 : f32 to vector<1x16xf32>
    %88 = arith.addf %84, %87 : vector<1x16xf32>
    %89 = math.rsqrt %88 : vector<1x16xf32>
    %90 = arith.mulf %68, %89 : vector<1x16xf32>
    %91 = vector.broadcast %90 : vector<1x16xf32> to vector<320x16xf32>
    %92 = arith.mulf %86, %91 : vector<320x16xf32>
    %93 = vector.broadcast %69 : vector<1x16xf32> to vector<320x16xf32>
    %94 = arith.addf %92, %93 : vector<320x16xf32>
    %95 = arith.addf %94, %50 : vector<320x16xf32>
    %cst_48 = arith.constant 0.000000e+00 : f32
    %96 = vector.broadcast %cst_48 : f32 to vector<320x16xf32>
    %97 = arith.maximumf %95, %96 : vector<320x16xf32>
    %c0_49 = arith.constant 0 : index
    %c0_50 = arith.constant 0 : index
    %98 = vector.load %arg7[%c0_49, %c0_50] : memref<320x16xf32, #tpu.memory_space<vmem>>, vector<320x16xf32>
    tpu.vector_store %arg7[%c0_49, %c0_50], %97 {strides = array<i32>} : memref<320x16xf32, #tpu.memory_space<vmem>>, vector<320x16xf32>,
    return
  }
}

</mosaic_0001>

<bundles_post_ra>
// kernel: tpu_custom_call.1
= control target key start
LH: loop header
LB: loop body
LE: loop exit
PB: predicated region body
PF: predicated region fallthrough
CT: control target
= control target key end

     0   :  { %s4745_s15 = smov 116   ;;  %vm236_vm0 = vsmask.f32 3328  ;;  %s4746_s20 = smov 124   ;;  %vm1236_vm1 = vcmask 1041408   ;;  %vm645_vm2 = vcmask 31744   ;;  %s8058_s0 = inlined_call_operand.vmem [shape: bf16[384,17], index: 0, kind: input, shape index: {}]   ;;  %s8059_s1 = inlined_call_operand.vmem [shape: bf16[36,32], index: 1, kind: input, shape index: {}]   ;;  %s8060_s3 = inlined_call_operand.vmem [shape: f32[1,32], index: 3, kind: input, shape index: {}]   ;;  %s8061_s4 = inlined_call_operand.vmem [shape: f32[1,32], index: 4, kind: input, shape index: {}]   ;;  %s8062_s2 = inlined_call_operand.vmem [shape: bf16[144,16], index: 2, kind: input, shape index: {}]   ;;  %s8063_s5 = inlined_call_operand.vmem [shape: f32[1,16], index: 5, kind: input, shape index: {}]   ;;  %s8064_s6 = inlined_call_operand.vmem [shape: f32[1,16], index: 6, kind: input, shape index: {}]   ;;  %s8065_s7 = inlined_call_operand.vmem [shape: f32[320,16], index: 7, kind: output, shape index: {}]  }
   0x1   :  { %v27_v0 = vld [vmem:[%s8058_s0 + $0x4] sm:$0x8]  ;;  %v28_v1 = vld [vmem:[%s8058_s0 + $0x8] sm:$0xf]  ;;  %v29_v2 = vld [vmem:[%s8058_s0 + $0xc] sm:$0xf] }
   0x2   :  { %v4353_v3 = vcombine.low %v27_v0, %v28_v1  ;;  %v4374_v4 = vcombine.low %v28_v1, %v29_v2  ;;  %v30_v5 = vld [vmem:[%s8058_s0 + $0x10] sm:$0xf]  ;;  %v31_v6 = vld [vmem:[%s8058_s0 + $0x14] sm:$0xf]  ;;  %v32_v7 = vld [vmem:[%s8058_s0 + $0x18] sm:$0xf] }
   0x3   :  { %v33_v8 = vld [vmem:[%s8058_s0 + $0x1c] sm:$0xf]  ;;  %v4375_v9 = vcombine.low %v30_v5, %v31_v6  ;;  %v4354_v10 = vcombine.low %v29_v2, %v30_v5  ;;  %v4355_v23 = vcombine.low %v31_v6, %v32_v7  ;;  %v35_v26 = vld [vmem:[%s8058_s0 + $0x24] sm:$0xf]  ;;  %v68_v28 = vld [vmem:[%s8058_s0 + $0xc] sm:$0x8] }
   0x4   :  { %174 = vrot.lane.b32.xlu0 %v4353_v3, %s4745_s15  ;;  %v238_v11 = vshrl.u32 %v4374_v4, 16  ;;  %v241_v12 = vshll.u32 %v4374_v4, 16  ;;  %v4376_v13 = vcombine.low %v32_v7, %v33_v8  ;;  %v34_v29 = vld [vmem:[%s8058_s0 + $0x20] sm:$0xf]  ;;  %v4394_v33 = vcombine.low %v68_v28, %v30_v5  ;;  %s4747_s23 = smov 8   ;;  %s4748_s24 = smov 16  }
   0x5   :  { %v246_v14 = vshrl.u32 %v4375_v9, 16  ;;  %v249_v15 = vshll.u32 %v4375_v9, 16  ;;  %v4377_v32 = vcombine.low %v34_v29, %v35_v26  ;;  %v4356_v37 = vcombine.low %v33_v8, %v34_v29  ;;  %v4685_v41 = vld [vmem:[%s8059_s1] sm:$0xff]   ;;  %s4749_s27 = smov 12   ;;  %v36_v43 = vld [vmem:[%s8058_s0 + $0x28] sm:$0xf] }
   0x6   :  { %v240_v16 = vrot.slane %v238_v11, 4  ;;  %v243_v17 = vrot.slane %v241_v12, 5  ;;  %v255_v18 = vshrl.u32 %v4376_v13, 16  ;;  %v258_v19 = vshll.u32 %v4376_v13, 16  ;;  %4475 = vmatprep.subr.bf16.mxu0 %v4685_v41  ;;  %v37_v44 = vld [vmem:[%s8058_s0 + $0x2c] sm:$0xf] }
   0x7   :  { %v248_v20 = vrot.slane %v246_v14, 4  ;;  %v251_v21 = vrot.slane %v249_v15, 5  ;;  %v264_v35 = vshrl.u32 %v4377_v32, 16  ;;  %v267_v36 = vshll.u32 %v4377_v32, 16  ;;  %4476 = vmatpush3.bf16.msra.mxu0 %v4685_v41  ;;  %v4686_v45 = vld [vmem:[%s8059_s1 + $0x8] sm:$0xff]   ;;  %s4750_s13 = smov 20  }
   0x8   :  { %176 = vrot.lane.b32.xlu0 %v4354_v10, %s4745_s15  ;;  %v244_v22 = vor.u32 %v243_v17, %v240_v16  ;;  %v257_v24 = vrot.slane %v255_v18, 4  ;;  %v260_v25 = vrot.slane %v258_v19, 5  ;;  %4477 = vmatprep.subr.bf16.mxu0 %v4686_v45  ;;  %v4378_v46 = vcombine.low %v36_v43, %v37_v44  ;;  %v4687_v47 = vld [vmem:[%s8059_s1 + $0x10] ss:$0 sps:$4 sm:$0x33]   ;;  %s4757_s22 = smov 64  }
   0x9   :  { %v252_v27 = vor.u32 %v251_v21, %v248_v20  ;;  %v266_v38 = vrot.slane %v264_v35, 4  ;;  %v269_v39 = vrot.slane %v267_v36, 5  ;;  %v1238_v50 = vsel %vm1236_vm1, %v4687_v47, 0  ;;  %v38_v51 = vld [vmem:[%s8058_s0 + $0x30] sm:$0xf]  ;;  %s4758_s25 = smov 112  }
   0xa   :  { %416 = vrot.lane.b32.xlu1 %v244_v22, %s4746_s20  ;;  %v261_v31 = vor.u32 %v260_v25, %v257_v24  ;;  %v273_v48 = vshrl.u32 %v4378_v46, 16  ;;  %v276_v49 = vshll.u32 %v4378_v46, 16  ;;  %v39_v52 = vld [vmem:[%s8058_s0 + $0x34] sm:$0xf]  ;;  %v4357_v56 = vcombine.low %v35_v26, %v36_v43  ;;  %v4881_v1 = vld [vmem:[%s8058_s0 + $0x38] sm:$0xf] }
   0xb   :  { %v253_v30 = vsel %vm236_vm0, %v244_v22, %v252_v27  ;;  %v270_v40 = vor.u32 %v269_v39, %v266_v38  ;;  %4478 = vmatpush3.bf16.msra.mxu0 %v4686_v45  ;;  %v4379_v55 = vcombine.low %v38_v51, %v39_v52  ;;  %v4358_v63 = vcombine.low %v37_v44, %v38_v51  ;;  %v4886_v2 = vld [vmem:[%s8058_s0 + $0x3c] sm:$0xf]  ;;  %v42_v7 = vld [vmem:[%s8058_s0 + $0x40] sm:$0xf]  ;;  %v43_v8 = vld [vmem:[%s8058_s0 + $0x44] sm:$0xf] }
   0xc   :  { %178 = vrot.lane.b32.xlu0 %v4355_v23, %s4745_s15  ;;  %v262_v34 = vsel %vm236_vm0, %v252_v27, %v261_v31  ;;  %4539 = vmatprep.subr.msk.bf16.mxu0 %vm1236_vm1, %v4687_v47  ;;  %v275_v53 = vrot.slane %v273_v48, 4  ;;  %v278_v54 = vrot.slane %v276_v49, 5  ;;  %v4380_v4 = vcombine.low %v4881_v1, %v4886_v2  ;;  %v4915_v21 = vld [vmem:[%s8058_s0 + $0x48] sm:$0xf]  ;;  %v4920_v22 = vld [vmem:[%s8058_s0 + $0x4c] sm:$0xf] }
   0xd   :  { %v271_v42 = vsel %vm236_vm0, %v261_v31, %v270_v40  ;;  %v282_v58 = vshrl.u32 %v4379_v55, 16  ;;  %v285_v59 = vshll.u32 %v4379_v55, 16  ;;  %v4381_v11 = vcombine.low %v42_v7, %v43_v8  ;;  %v4937_v28 = vld [vmem:[%s8058_s0 + $0x54] sm:$0xf]  ;;  %v4956_v41 = vld [vmem:[%s8058_s0 + $0x58] sm:$0xf] }
   0xe   :  { %418 = vrot.lane.b32.xlu1 %v253_v30, %s4746_s20  ;;  %v279_v57 = vor.u32 %v278_v54, %v275_v53  ;;  %v291_v5 = vshrl.u32 %v4380_v4, 16  ;;  %v294_v6 = vshll.u32 %v4380_v4, 16  ;;  %v4359_v12 = vcombine.low %v39_v52, %v4881_v1  ;;  %v4973_v47 = vld [vmem:[%s8058_s0 + $0x60] sm:$0xf]  ;;  %v4978_v48 = vld [vmem:[%s8058_s0 + $0x64] sm:$0xf] }
   0xf   :  { %4480 = vmatpush3.bf16.msra.mxu0 %v1238_v50  ;;  %v284_v61 = vrot.slane %v282_v58, 4  ;;  %v287_v62 = vrot.slane %v285_v59, 5  ;;  %v300_v14 = vshrl.u32 %v4381_v11, 16  ;;  %v303_v15 = vshll.u32 %v4381_v11, 16 }
  0x10   :  { %467 = vrot.lane.b32.xlu0 %v4394_v33, %s4747_s23  ;;  %v280_v60 = vsel %vm236_vm0, %v270_v40, %v279_v57  ;;  %v293_v9 = vrot.slane %v291_v5, 4  ;;  %v296_v10 = vrot.slane %v294_v6, 5  ;;  %v4360_v19 = vcombine.low %v4886_v2, %v42_v7 }
  0x11   :  { %v288_v0 = vor.u32 %v287_v62, %v284_v61  ;;  %v302_v17 = vrot.slane %v300_v14, 4  ;;  %v305_v18 = vrot.slane %v303_v15, 5  ;;  %v4382_v24 = vcombine.low %v4915_v21, %v4920_v22  ;;  %v5020_v14 = vld [vmem:[%s8058_s0 + $0x74] sm:$0xf] }
  0x12   :  { %420 = vrot.lane.b32.xlu1 %v262_v34, %s4746_s20  ;;  %v297_v13 = vor.u32 %v296_v10, %v293_v9  ;;  %v4361_v32 = vcombine.low %v43_v8, %v4915_v21  ;;  %v4385_v51 = vcombine.low %v4973_v47, %v4978_v48  ;;  %v4363_v52 = vcombine.low %v4937_v28, %v4956_v41 }
  0x13   :  { %v289_v3 = vsel %vm236_vm0, %v279_v57, %v288_v0  ;;  %v306_v20 = vor.u32 %v305_v18, %v302_v17  ;;  %v309_v25 = vshrl.u32 %v4382_v24, 16  ;;  %v312_v26 = vshll.u32 %v4382_v24, 16 }
  0x14   :  { %471 = vrot.lane.b32.xlu0 %v4356_v37, %s4747_s23  ;;  %v298_v16 = vsel %vm236_vm0, %v288_v0, %v297_v13  ;;  %v336_v54 = vshrl.u32 %v4385_v51, 16  ;;  %v339_v55 = vshll.u32 %v4385_v51, 16  ;;  %v4998_v0 = vld [vmem:[%s8058_s0 + $0x68] sm:$0xf]  ;;  %v4751_v7 = vmov 16  }
  0x15   :  { %v311_v29 = vrot.slane %v309_v25, 4  ;;  %v314_v30 = vrot.slane %v312_v26, 5  ;;  %4554 = vset.pattern.permute.xlu0 %v4751_v7  ;;  %4560 = vset.pattern.permute.xlu1 %v4751_v7  ;;  %vm709_vm3 = vcmask 64512   ;;  %vm731_vm4 = vcmask 97280  }
  0x16   :  { %469 = vrot.lane.b32.xlu1 %v4355_v23, %s4747_s23  ;;  %v338_v58 = vrot.slane %v336_v54, 4  ;;  %v341_v59 = vrot.slane %v339_v55, 5  ;;  %vm774_vm5 = vcmask 130048   ;;  %vm817_vm6 = vcmask 162816  }
  0x17   :  { %vm839_vm7 = vcmask 195584   ;;  %vm882_vm8 = vcmask 228352   ;;  %vm925_vm9 = vcmask 261120   ;;  %vm992_vm10 = vsmask.f32 4352 }
  0x18   :  { %521 = vrot.lane.b32.xlu0 %v262_v34, %s4748_s24  ;;  %v342_v62 = vor.u32 %v341_v59, %v338_v58  ;;  %vm1175_vm11 = vcmask 293888   ;;  %vm2400_vm12 = vcmask 1046528   ;;  %vm3042_vm13 = vsmask.f32 256 }
  0x19   :  { %vm2177_vm14 = vsmask.f32 7424  ;;  %vm2809_vm15 = vcmask 392192   ;;  %vm2895_vm1 = vcmask 654336  }
  0x1a   :  { %519 = vrot.lane.b32.xlu1 %v252_v27, %s4748_s24 }
  0x1c   :  { %561 = vrot.lane.b32.xlu0 %v4394_v33, %s4749_s27  ;;  %v315_v33 = vor.u32 %v314_v30, %v311_v29 }
  0x1e   :  { %523 = vrot.lane.b32.xlu1 %v271_v42, %s4748_s24  ;;  %v316_v36 = vsel %vm236_vm0, %v306_v20, %v315_v33 }
  0x20   :  { %565 = vrot.lane.b32.xlu0 %v4356_v37, %s4749_s27 }
  0x22   :  { %563 = vrot.lane.b32.xlu1 %v4355_v23, %s4749_s27  ;;  %v307_v23 = vsel %vm236_vm0, %v297_v13, %v306_v20  ;;  %v5015_v13 = vld [vmem:[%s8058_s0 + $0x70] sm:$0xf]  ;;  %v4365_v20 = vcombine.low %v4978_v48, %v4998_v0 }
  0x23   :  { %v4387_v18 = vcombine.low %v5015_v13, %v5020_v14 }
  0x24   :  { %605 = vrot.lane.b32.xlu0 %v262_v34, %s4750_s13 }
  0x25   :  { %v354_v26 = vshrl.u32 %v4387_v18, 16  ;;  %v357_v29 = vshll.u32 %v4387_v18, 16 }
  0x26   :  { %603 = vrot.lane.b32.xlu1 %v252_v27, %s4750_s13  ;;  %v4932_v27 = vld [vmem:[%s8058_s0 + $0x50] sm:$0xf] }
  0x27   :  { %v4383_v31 = vcombine.low %v4932_v27, %v4937_v28  ;;  %v4362_v39 = vcombine.low %v4920_v22, %v4932_v27 }
  0x28   :  { %180 = vrot.lane.b32.xlu0 %v4356_v37, %s4745_s15 }
  0x29   :  { %v318_v34 = vshrl.u32 %v4383_v31, 16  ;;  %v321_v35 = vshll.u32 %v4383_v31, 16 }
  0x2a   :  { %607 = vrot.lane.b32.xlu1 %v271_v42, %s4750_s13 }
  0x2b   :  { %v320_v37 = vrot.slane %v318_v34, 4  ;;  %v323_v38 = vrot.slane %v321_v35, 5 }
  0x2c   :  { %182 = vrot.lane.b32.xlu0 %v4357_v56, %s4745_s15 }
  0x2d   :  { %v324_v40 = vor.u32 %v323_v38, %v320_v37  ;;  %v356_v37 = vrot.slane %v354_v26, 4  ;;  %v359_v38 = vrot.slane %v357_v29, 5 }
  0x2e   :  { %422 = vrot.lane.b32.xlu1 %v271_v42, %s4746_s20  ;;  %v4961_v42 = vld [vmem:[%s8058_s0 + $0x5c] sm:$0xf] }
  0x2f   :  { %v325_v43 = vsel %vm236_vm0, %v315_v33, %v324_v40  ;;  %v4384_v44 = vcombine.low %v4956_v41, %v4961_v42  ;;  %v4364_v61 = vcombine.low %v4961_v42, %v4973_v47  ;;  %v5046_v51 = vor.u32 %v359_v38, %v356_v37 }
  0x30   :  { %473 = vrot.lane.b32.xlu0 %v4357_v56, %s4747_s23 }
  0x31   :  { %v327_v45 = vshrl.u32 %v4384_v44, 16  ;;  %v330_v46 = vshll.u32 %v4384_v44, 16 }
  0x32   :  { %424 = vrot.lane.b32.xlu1 %v280_v60, %s4746_s20 }
  0x33   :  { %v329_v49 = vrot.slane %v327_v45, 4  ;;  %v332_v50 = vrot.slane %v330_v46, 5 }
  0x34   :  { %525 = vrot.lane.b32.xlu0 %v280_v60, %s4748_s24 }
  0x35   :  { %v333_v53 = vor.u32 %v332_v50, %v329_v49 }
  0x36   :  { %475 = vrot.lane.b32.xlu1 %v4358_v63, %s4747_s23 }
  0x37   :  { %v334_v57 = vsel %vm236_vm0, %v324_v40, %v333_v53  ;;  %v343_v5 = vsel %vm236_vm0, %v333_v53, %v342_v62  ;;  %v5056_v53 = vld [vmem:[%s8058_s0 + $0x7c] sm:$0xf] }
  0x38   :  { %567 = vrot.lane.b32.xlu0 %v4357_v56, %s4749_s27 }
  0x3a   :  { %527 = vrot.lane.b32.xlu1 %v289_v3, %s4748_s24 }
  0x3c   :  { %609 = vrot.lane.b32.xlu0 %v280_v60, %s4750_s13 }
  0x3e   :  { %569 = vrot.lane.b32.xlu1 %v4358_v63, %s4749_s27 }
  0x40   :  { %184 = vrot.lane.b32.xlu0 %v4358_v63, %s4745_s15 }
  0x42   :  { %611 = vrot.lane.b32.xlu1 %v289_v3, %s4750_s13 }
  0x44   :  { %186 = vrot.lane.b32.xlu0 %v4359_v12, %s4745_s15 }
  0x46   :  { %426 = vrot.lane.b32.xlu1 %v289_v3, %s4746_s20  ;;  %v5003_v3 = vld [vmem:[%s8058_s0 + $0x6c] sm:$0xf] }
  0x47   :  { %v4386_v6 = vcombine.low %v4998_v0, %v5003_v3  ;;  %v4366_v50 = vcombine.low %v5003_v3, %v5015_v13 }
  0x48   :  { %477 = vrot.lane.b32.xlu0 %v4359_v12, %s4747_s23 }
  0x49   :  { %v345_v10 = vshrl.u32 %v4386_v6, 16  ;;  %v348_v11 = vshll.u32 %v4386_v6, 16 }
  0x4a   :  { %428 = vrot.lane.b32.xlu1 %v298_v16, %s4746_s20 }
  0x4b   :  { %v350_v17 = vrot.slane %v348_v11, 5 }
  0x4c   :  { %529 = vrot.lane.b32.xlu0 %v298_v16, %s4748_s24 }
  0x4e   :  { %479 = vrot.lane.b32.xlu1 %v4360_v19, %s4747_s23 }
  0x50   :  { %571 = vrot.lane.b32.xlu0 %v4359_v12, %s4749_s27 }
  0x52   :  { %531 = vrot.lane.b32.xlu1 %v307_v23, %s4748_s24 }
  0x54   :  { %613 = vrot.lane.b32.xlu0 %v298_v16, %s4750_s13  ;;  %v347_v16 = vrot.slane %v345_v10, 4 }
  0x56   :  { %573 = vrot.lane.b32.xlu1 %v4360_v19, %s4749_s27  ;;  %v351_v25 = vor.u32 %v350_v17, %v347_v16  ;;  %v5080_v17 = vld [vmem:[%s8058_s0 + $0x80] sm:$0xf] }
  0x58   :  { %188 = vrot.lane.b32.xlu0 %v4360_v19, %s4745_s15 }
  0x5a   :  { %615 = vrot.lane.b32.xlu1 %v307_v23, %s4750_s13 }
  0x5c   :  { %190 = vrot.lane.b32.xlu0 %v4361_v32, %s4745_s15 }
  0x5e   :  { %430 = vrot.lane.b32.xlu1 %v307_v23, %s4746_s20 }
  0x60   :  { %481 = vrot.lane.b32.xlu0 %v4361_v32, %s4747_s23 }
  0x62   :  { %432 = vrot.lane.b32.xlu1 %v316_v36, %s4746_s20 }
  0x64   :  { %533 = vrot.lane.b32.xlu0 %v316_v36, %s4748_s24 }
  0x66   :  { %483 = vrot.lane.b32.xlu1 %v4362_v39, %s4747_s23 }
  0x68   :  { %575 = vrot.lane.b32.xlu0 %v4361_v32, %s4749_s27 }
  0x6a   :  { %535 = vrot.lane.b32.xlu1 %v325_v43, %s4748_s24 }
  0x6c   :  { %617 = vrot.lane.b32.xlu0 %v316_v36, %s4750_s13  ;;  %v352_v36 = vsel %vm236_vm0, %v342_v62, %v351_v25 }
  0x6e   :  { %577 = vrot.lane.b32.xlu1 %v4362_v39, %s4749_s27 }
  0x70   :  { %192 = vrot.lane.b32.xlu0 %v4362_v39, %s4745_s15 }
  0x72   :  { %619 = vrot.lane.b32.xlu1 %v325_v43, %s4750_s13 }
  0x74   :  { %194 = vrot.lane.b32.xlu0 %v4363_v52, %s4745_s15 }
  0x76   :  { %434 = vrot.lane.b32.xlu1 %v325_v43, %s4746_s20  ;;  %v175_v56 = vpop.permute.xlu0 %174 }
  0x78   :  { %485 = vrot.lane.b32.xlu0 %v4363_v52, %s4747_s23 }
  0x7a   :  { %436 = vrot.lane.b32.xlu1 %v334_v57, %s4746_s20  ;;  %v177_v60 = vpop.permute.xlu0 %176 }
  0x7c   :  { %v417_v63 = vpop.permute.xlu1 %416  ;;  %537 = vrot.lane.b32.xlu0 %v334_v57, %s4748_s24 }
  0x7d   :  { %v648_v31 = vsel %vm645_vm2, %v175_v56, %v417_v63 }
  0x7e   :  { %487 = vrot.lane.b32.xlu1 %v4364_v61, %s4747_s23  ;;  %v179_v4 = vpop.permute.xlu0 %178  ;;  %v710_v39 = vsel %vm709_vm3, %v648_v31, %v417_v63  ;;  %v361_v63 = vsel %vm236_vm0, %v351_v25, %v5046_v51 }
  0x80   :  { %v419_v8 = vpop.permute.xlu1 %418  ;;  %579 = vrot.lane.b32.xlu0 %v4363_v52, %s4749_s27  ;;  %v5051_v52 = vld [vmem:[%s8058_s0 + $0x78] sm:$0xf] }
  0x81   :  { %v651_v23 = vsel %vm645_vm2, %v177_v60, %v419_v8 }
  0x82   :  { %539 = vrot.lane.b32.xlu1 %v343_v5, %s4748_s24  ;;  %v468_v9 = vpop.permute.xlu0 %467  ;;  %v711_v32 = vsel %vm709_vm3, %v651_v23, %v419_v8 }
  0x83   :  { %v733_v43 = vsel %vm731_vm4, %v710_v39, %v468_v9 }
  0x84   :  { %v421_v12 = vpop.permute.xlu1 %420  ;;  %621 = vrot.lane.b32.xlu0 %v334_v57, %s4750_s13 }
  0x85   :  { %v654_v35 = vsel %vm645_vm2, %v179_v4, %v421_v12 }
  0x86   :  { %581 = vrot.lane.b32.xlu1 %v4364_v61, %s4749_s27  ;;  %v472_v15 = vpop.permute.xlu0 %471  ;;  %v712_v45 = vsel %vm709_vm3, %v654_v35, %v421_v12 }
  0x87   :  { %v737_v56 = vsel %vm731_vm4, %v712_v45, %v472_v15 }
  0x88   :  { %v470_v19 = vpop.permute.xlu1 %469  ;;  %196 = vrot.lane.b32.xlu0 %v4364_v61, %s4745_s15  ;;  %v4388_v61 = vcombine.low %v5051_v52, %v5056_v53 }
  0x89   :  { %v735_v33 = vsel %vm731_vm4, %v711_v32, %v470_v19 }
  0x8a   :  { %623 = vrot.lane.b32.xlu1 %v343_v5, %s4750_s13  ;;  %v522_v24 = vpop.permute.xlu0 %521  ;;  %v363_v15 = vshrl.u32 %v4388_v61, 16  ;;  %v366_v16 = vshll.u32 %v4388_v61, 16 }
  0x8b   :  { %v778_v44 = vsel %vm774_vm5, %v735_v33, %v522_v24 }
  0x8c   :  { %v520_v30 = vpop.permute.xlu1 %519  ;;  %198 = vrot.lane.b32.xlu0 %v4365_v20, %s4745_s15  ;;  %v819_v54 = vsel %vm817_vm6, %v778_v44, %v522_v24  ;;  %v5085_v24 = vld [vmem:[%s8058_s0 + $0x84] sm:$0xf]  ;;  %v368_v35 = vrot.slane %v366_v16, 5  ;;  %v4367_v44 = vcombine.low %v5020_v14, %v5051_v52 }
  0x8d   :  { %v776_v46 = vsel %vm774_vm5, %v733_v43, %v520_v30  ;;  %v4389_v37 = vcombine.low %v5080_v17, %v5085_v24 }
  0x8e   :  { %438 = vrot.lane.b32.xlu1 %v343_v5, %s4746_s20  ;;  %v562_v34 = vpop.permute.xlu0 %561  ;;  %v818_v57 = vsel %vm817_vm6, %v776_v46, %v520_v30 }
  0x8f   :  { %v841_v4 = vsel %vm839_vm7, %v818_v57, %v562_v34  ;;  %v365_v34 = vrot.slane %v363_v15, 4  ;;  %v5128_v15 = vld [vmem:[%s8058_s0 + $0x8c] sm:$0xf] }
  0x90   :  { %v524_v40 = vpop.permute.xlu1 %523  ;;  %489 = vrot.lane.b32.xlu0 %v4365_v20, %s4747_s23 }
  0x91   :  { %v780_v59 = vsel %vm774_vm5, %v737_v56, %v524_v40 }
  0x92   :  { %440 = vrot.lane.b32.xlu1 %v352_v36, %s4746_s20  ;;  %v566_v49 = vpop.permute.xlu0 %565  ;;  %v820_v7 = vsel %vm817_vm6, %v780_v59, %v524_v40  ;;  %v375_v59 = vshll.u32 %v4389_v37, 16 }
  0x93   :  { %v845_v25 = vsel %vm839_vm7, %v820_v7, %v566_v49 }
  0x94   :  { %v564_v55 = vpop.permute.xlu1 %563  ;;  %541 = vrot.lane.b32.xlu0 %v352_v36, %s4748_s24 }
  0x95   :  { %v843_v58 = vsel %vm839_vm7, %v819_v54, %v564_v55  ;;  %v369_v55 = vor.u32 %v368_v35, %v365_v34 }
  0x96   :  { %491 = vrot.lane.b32.xlu1 %v4366_v50, %s4747_s23  ;;  %v606_v60 = vpop.permute.xlu0 %605 }
  0x97   :  { %v886_v62 = vsel %vm882_vm8, %v843_v58, %v606_v60  ;;  %v372_v58 = vshrl.u32 %v4389_v37, 16 }
  0x98   :  { %v927_v5 = vsel %vm925_vm9, %v886_v62, %v606_v60  ;;  %v604_v6 = vpop.permute.xlu1 %603  ;;  %583 = vrot.lane.b32.xlu0 %v4365_v20, %s4749_s27 }
  0x99   :  { %v1000_v8 = vshrl.u32 %v927_v5, 16  ;;  %v1003_v9 = vshll.u32 %v927_v5, 16  ;;  %v884_v10 = vsel %vm882_vm8, %v841_v4, %v604_v6  ;;  %v370_v4 = vsel %vm236_vm0, %v5046_v51, %v369_v55  ;;  %v5123_v51 = vld [vmem:[%s8058_s0 + $0x88] sm:$0xf] }
  0x9a   :  { %v926_v11 = vsel %vm925_vm9, %v884_v10, %v604_v6  ;;  %543 = vrot.lane.b32.xlu1 %v361_v63, %s4748_s24  ;;  %v181_v12 = vpop.permute.xlu0 %180  ;;  %v374_v5 = vrot.slane %v372_v58, 4  ;;  %v377_v6 = vrot.slane %v375_v59, 5 }
  0x9b   :  { %v1002_v18 = vrot.slane %v1000_v8, 3  ;;  %v1005_v19 = vrot.slane %v1003_v9, 4  ;;  %v993_v20 = vshrl.u32 %v926_v11, 16  ;;  %v996_v23 = vshll.u32 %v926_v11, 16 }
  0x9c   :  { %v608_v26 = vpop.permute.xlu1 %607  ;;  %625 = vrot.lane.b32.xlu0 %v352_v36, %s4750_s13 }
  0x9d   :  { %v995_v29 = vrot.slane %v993_v20, 3  ;;  %v998_v30 = vrot.slane %v996_v23, 4  ;;  %v888_v31 = vsel %vm882_vm8, %v845_v25, %v608_v26  ;;  %v1006_v36 = vor.u32 %v1005_v19, %v1002_v18 }
  0x9e   :  { %v928_v32 = vsel %vm925_vm9, %v888_v31, %v608_v26  ;;  %585 = vrot.lane.b32.xlu1 %v4366_v50, %s4749_s27  ;;  %v183_v33 = vpop.permute.xlu0 %182  ;;  %v4390_v25 = vcombine.low %v5123_v51, %v5128_v15 }
  0x9f   :  { %v1008_v38 = vshrl.u32 %v928_v32, 16  ;;  %v1011_v39 = vshll.u32 %v928_v32, 16  ;;  %v999_v40 = vor.u32 %v998_v30, %v995_v29 }
  0xa0   :  { %v423_v43 = vpop.permute.xlu1 %422  ;;  %200 = vrot.lane.b32.xlu0 %v4366_v50, %s4745_s15 }
  0xa1   :  { %v1010_v45 = vrot.slane %v1008_v38, 3  ;;  %v1013_v46 = vrot.slane %v1011_v39, 4  ;;  %v1007_v49 = vsel %vm992_vm10, %v999_v40, %v1006_v36  ;;  %v657_v57 = vsel %vm645_vm2, %v181_v12, %v423_v43 }
  0xa2   :  { %627 = vrot.lane.b32.xlu1 %v361_v63, %s4750_s13  ;;  %4481 = vmatprep.mubr.msk.bf16.mxu0 %vm1175_vm11, %v1007_v49  ;;  %v474_v54 = vpop.permute.xlu0 %473  ;;  %v713_v61 = vsel %vm709_vm3, %v657_v57, %v423_v43  ;;  %v5118_v12 = vor.u32 %v377_v6, %v374_v5  ;;  %v381_v38 = vshrl.u32 %v4390_v25, 16  ;;  %v384_v39 = vshll.u32 %v4390_v25, 16  ;;  %v5156_v49 = vld [vmem:[%s8058_s0 + $0x94] sm:$0xf] }
  0xa3   :  { %v5100_v56 = vor.u32 %v1013_v46, %v1010_v45  ;;  %v739_v8 = vsel %vm731_vm4, %v713_v61, %v474_v54  ;;  %v4369_v6 = vcombine.low %v5085_v24, %v5123_v51 }
  0xa4   :  { %v425_v50 = vpop.permute.xlu1 %424  ;;  %202 = vrot.lane.b32.xlu0 %v4367_v44, %s4745_s15  ;;  %v379_v30 = vsel %vm236_vm0, %v369_v55, %v5118_v12  ;;  %v383_v59 = vrot.slane %v381_v38, 4  ;;  %v5198_v38 = vld [vmem:[%s8058_s0 + $0x9c] sm:$0xf] }
  0xa5   :  { %v1015_v60 = vsel %vm992_vm10, %v1006_v36, %v5100_v56  ;;  %v660_v11 = vsel %vm645_vm2, %v183_v33, %v425_v50 }
  0xa6   :  { %442 = vrot.lane.b32.xlu1 %v361_v63, %s4746_s20  ;;  %4482 = vmatmul.mubr.msk.bf16.vlgmr.msra.gmra.mrb[0].mxu0 %vm1175_vm11, %v1015_v60  ;;  %v526_v62 = vpop.permute.xlu0 %525  ;;  %v4368_v63 = vcombine.low %v5056_v53, %v5080_v17  ;;  %v714_v19 = vsel %vm709_vm3, %v660_v11, %v425_v50  ;;  %v386_v50 = vrot.slane %v384_v39, 5 }
  0xa7   :  { %v782_v9 = vsel %vm774_vm5, %v739_v8, %v526_v62 }
  0xa8   :  { %v476_v7 = vpop.permute.xlu1 %475  ;;  %493 = vrot.lane.b32.xlu0 %v4367_v44, %s4747_s23  ;;  %v821_v18 = vsel %vm817_vm6, %v782_v9, %v526_v62 }
  0xa9   :  { %v741_v26 = vsel %vm731_vm4, %v714_v19, %v476_v7 }
  0xaa   :  { %444 = vrot.lane.b32.xlu1 %v370_v4, %s4746_s20  ;;  %v568_v10 = vpop.permute.xlu0 %567 }
  0xab   :  { %v847_v20 = vsel %vm839_vm7, %v821_v18, %v568_v10  ;;  %v387_v10 = vor.u32 %v386_v50, %v383_v59 }
  0xac   :  { %v528_v16 = vpop.permute.xlu1 %527  ;;  %545 = vrot.lane.b32.xlu0 %v370_v4, %s4748_s24 }
  0xad   :  { %v784_v31 = vsel %vm774_vm5, %v741_v26, %v528_v16  ;;  %v388_v25 = vsel %vm236_vm0, %v5118_v12, %v387_v10  ;;  %v5193_v12 = vld [vmem:[%s8058_s0 + $0x98] sm:$0xf] }
  0xae   :  { %495 = vrot.lane.b32.xlu1 %v4368_v63, %s4747_s23  ;;  %v610_v23 = vpop.permute.xlu0 %609  ;;  %v822_v40 = vsel %vm817_vm6, %v784_v31, %v528_v16 }
  0xaf   :  { %v890_v29 = vsel %vm882_vm8, %v847_v20, %v610_v23 }
  0xb0   :  { %v929_v32 = vsel %vm925_vm9, %v890_v29, %v610_v23  ;;  %v570_v33 = vpop.permute.xlu1 %569  ;;  %587 = vrot.lane.b32.xlu0 %v4367_v44, %s4749_s27  ;;  %v5151_v44 = vld [vmem:[%s8058_s0 + $0x90] sm:$0xf] }
  0xb1   :  { %v1016_v34 = vshrl.u32 %v929_v32, 16  ;;  %v1019_v35 = vshll.u32 %v929_v32, 16  ;;  %v849_v45 = vsel %vm839_vm7, %v822_v40, %v570_v33 }
  0xb2   :  { %547 = vrot.lane.b32.xlu1 %v379_v30, %s4748_s24  ;;  %v185_v37 = vpop.permute.xlu0 %184 }
  0xb3   :  { %v1018_v36 = vrot.slane %v1016_v34, 3  ;;  %v1021_v43 = vrot.slane %v1019_v35, 4 }
  0xb4   :  { %v612_v46 = vpop.permute.xlu1 %611  ;;  %629 = vrot.lane.b32.xlu0 %v370_v4, %s4750_s13  ;;  %v4391_v4 = vcombine.low %v5151_v44, %v5156_v49 }
  0xb5   :  { %v1022_v54 = vor.u32 %v1021_v43, %v1018_v36  ;;  %v892_v55 = vsel %vm882_vm8, %v849_v45, %v612_v46 }
  0xb6   :  { %v930_v57 = vsel %vm925_vm9, %v892_v55, %v612_v46  ;;  %589 = vrot.lane.b32.xlu1 %v4368_v63, %s4749_s27  ;;  %v187_v58 = vpop.permute.xlu0 %186  ;;  %v390_v16 = vshrl.u32 %v4391_v4, 16  ;;  %v393_v18 = vshll.u32 %v4391_v4, 16  ;;  %v4392_v46 = vcombine.low %v5193_v12, %v5198_v38 }
  0xb7   :  { %v1024_v60 = vshrl.u32 %v930_v57, 16  ;;  %v1027_v61 = vshll.u32 %v930_v57, 16  ;;  %v1023_v62 = vsel %vm992_vm10, %v5100_v56, %v1022_v54 }
  0xb8   :  { %v427_v5 = vpop.permute.xlu1 %426  ;;  %204 = vrot.lane.b32.xlu0 %v4368_v63, %s4745_s15  ;;  %4485 = vmatprep.mubr.msk.bf16.mxu0 %vm1175_vm11, %v1023_v62  ;;  %v392_v26 = vrot.slane %v390_v16, 4  ;;  %v395_v29 = vrot.slane %v393_v18, 5  ;;  %v399_v4 = vshrl.u32 %v4392_v46, 16  ;;  %v5226_v16 = vld [vmem:[%s8058_s0 + $0xa4] sm:$0xf] }
  0xb9   :  { %v1026_v7 = vrot.slane %v1024_v60, 3  ;;  %v1029_v8 = vrot.slane %v1027_v61, 4  ;;  %v663_v56 = vsel %vm645_vm2, %v185_v37, %v427_v5 }
  0xba   :  { %631 = vrot.lane.b32.xlu1 %v379_v30, %s4750_s13  ;;  %v478_v9 = vpop.permute.xlu0 %477  ;;  %v715_v20 = vsel %vm709_vm3, %v663_v56, %v427_v5  ;;  %v5188_v37 = vor.u32 %v395_v29, %v392_v26  ;;  %v402_v5 = vshll.u32 %v4392_v46, 16 }
  0xbb   :  { %v5170_v11 = vor.u32 %v1029_v8, %v1026_v7  ;;  %v743_v32 = vsel %vm731_vm4, %v715_v20, %v478_v9 }
  0xbc   :  { %v429_v19 = vpop.permute.xlu1 %428  ;;  %206 = vrot.lane.b32.xlu0 %v4369_v6, %s4745_s15  ;;  %v397_v57 = vsel %vm236_vm0, %v387_v10, %v5188_v37 }
  0xbd   :  { %v1031_v63 = vsel %vm992_vm10, %v1022_v54, %v5170_v11  ;;  %v666_v35 = vsel %vm645_vm2, %v187_v58, %v429_v19 }
  0xbe   :  { %446 = vrot.lane.b32.xlu1 %v379_v30, %s4746_s20  ;;  %4486 = vmatmul.mubr.msk.bf16.gmra.mrb[4].mxu0 %vm1175_vm11, %v1031_v63  ;;  %v530_v23 = vpop.permute.xlu0 %529  ;;  %v4370_v30 = vcombine.low %v5128_v15, %v5151_v44  ;;  %v716_v36 = vsel %vm709_vm3, %v666_v35, %v429_v19 }
  0xbf   :  { %v786_v33 = vsel %vm774_vm5, %v743_v32, %v530_v23 }
  0xc0   :  { %v480_v31 = vpop.permute.xlu1 %479  ;;  %497 = vrot.lane.b32.xlu0 %v4369_v6, %s4747_s23  ;;  %v823_v40 = vsel %vm817_vm6, %v786_v33, %v530_v23  ;;  %v401_v23 = vrot.slane %v399_v4, 4 }
  0xc1   :  { %v745_v54 = vsel %vm731_vm4, %v716_v36, %v480_v31 }
  0xc2   :  { %448 = vrot.lane.b32.xlu1 %v388_v25, %s4746_s20  ;;  %v572_v34 = vpop.permute.xlu0 %571 }
  0xc3   :  { %v851_v43 = vsel %vm839_vm7, %v823_v40, %v572_v34  ;;  %v4371_v34 = vcombine.low %v5156_v49, %v5193_v12 }
  0xc4   :  { %v532_v39 = vpop.permute.xlu1 %531  ;;  %549 = vrot.lane.b32.xlu0 %v388_v25, %s4748_s24 }
  0xc5   :  { %v788_v58 = vsel %vm774_vm5, %v745_v54, %v532_v39 }
  0xc6   :  { %499 = vrot.lane.b32.xlu1 %v4370_v30, %s4747_s23  ;;  %v614_v45 = vpop.permute.xlu0 %613  ;;  %v824_v7 = vsel %vm817_vm6, %v788_v58, %v532_v39 }
  0xc7   :  { %v894_v55 = vsel %vm882_vm8, %v851_v43, %v614_v45 }
  0xc8   :  { %v931_v59 = vsel %vm925_vm9, %v894_v55, %v614_v45  ;;  %v574_v50 = vpop.permute.xlu1 %573  ;;  %591 = vrot.lane.b32.xlu0 %v4369_v6, %s4749_s27  ;;  %v5221_v6 = vld [vmem:[%s8058_s0 + $0xa0] sm:$0xf] }
  0xc9   :  { %v1032_v60 = vshrl.u32 %v931_v59, 16  ;;  %v1035_v61 = vshll.u32 %v931_v59, 16  ;;  %v853_v10 = vsel %vm839_vm7, %v824_v7, %v574_v50  ;;  %v4393_v32 = vcombine.low %v5221_v6, %v5226_v16 }
  0xca   :  { %551 = vrot.lane.b32.xlu1 %v397_v57, %s4748_s24  ;;  %v189_v62 = vpop.permute.xlu0 %188 }
  0xcb   :  { %v1034_v8 = vrot.slane %v1032_v60, 3  ;;  %v1037_v9 = vrot.slane %v1035_v61, 4  ;;  %v408_v45 = vshrl.u32 %v4393_v32, 16  ;;  %v411_v46 = vshll.u32 %v4393_v32, 16 }
  0xcc   :  { %v616_v56 = vpop.permute.xlu1 %615  ;;  %633 = vrot.lane.b32.xlu0 %v388_v25, %s4750_s13  ;;  %v404_v25 = vrot.slane %v402_v5, 5 }
  0xcd   :  { %v1038_v18 = vor.u32 %v1037_v9, %v1034_v8  ;;  %v896_v19 = vsel %vm882_vm8, %v853_v10, %v616_v56  ;;  %v410_v50 = vrot.slane %v408_v45, 4  ;;  %v413_v60 = vrot.slane %v411_v46, 5 }
  0xce   :  { %v932_v63 = vsel %vm925_vm9, %v896_v19, %v616_v56  ;;  %593 = vrot.lane.b32.xlu1 %v4370_v30, %s4749_s27  ;;  %v191_v20 = vpop.permute.xlu0 %190  ;;  %v405_v36 = vor.u32 %v404_v25, %v401_v23  ;;  %v5265_v19 = vld [vmem:[%s8058_s0 + $0xa8] sm:$0xf] }
  0xcf   :  { %v1040_v26 = vshrl.u32 %v932_v63, 16  ;;  %v1043_v29 = vshll.u32 %v932_v63, 16  ;;  %v1039_v31 = vsel %vm992_vm10, %v5170_v11, %v1038_v18  ;;  %v5255_v8 = vor.u32 %v413_v60, %v410_v50  ;;  %v5270_v63 = vld [vmem:[%s8058_s0 + $0xac] sm:$0xf] }
  0xd0   :  { %v431_v33 = vpop.permute.xlu1 %430  ;;  %208 = vrot.lane.b32.xlu0 %v4370_v30, %s4745_s15  ;;  %4489 = vmatprep.mubr.msk.bf16.mxu0 %vm1175_vm11, %v1039_v31  ;;  %v406_v59 = vsel %vm236_vm0, %v5188_v37, %v405_v36 }
  0xd1   :  { %v1042_v35 = vrot.slane %v1040_v26, 3  ;;  %v1045_v39 = vrot.slane %v1043_v29, 4  ;;  %v669_v11 = vsel %vm645_vm2, %v189_v62, %v431_v33  ;;  %v415_v25 = vsel %vm236_vm0, %v405_v36, %v5255_v8 }
  0xd2   :  { %635 = vrot.lane.b32.xlu1 %v397_v57, %s4750_s13  ;;  %v482_v40 = vpop.permute.xlu0 %481  ;;  %v717_v55 = vsel %vm709_vm3, %v669_v11, %v431_v33 }
  0xd3   :  { %v1046_v43 = vor.u32 %v1045_v39, %v1042_v35  ;;  %v747_v62 = vsel %vm731_vm4, %v717_v55, %v482_v40  ;;  %v4397_v35 = vcombine.low %v5265_v19, %v5270_v63 }
  0xd4   :  { %v433_v54 = vpop.permute.xlu1 %432  ;;  %210 = vrot.lane.b32.xlu0 %v4371_v34, %s4745_s15 }
  0xd5   :  { %v1047_v30 = vsel %vm992_vm10, %v1038_v18, %v1046_v43  ;;  %v672_v7 = vsel %vm645_vm2, %v191_v20, %v433_v54  ;;  %v514_v55 = vshll.u32 %v4397_v35, 16 }
  0xd6   :  { %450 = vrot.lane.b32.xlu1 %v397_v57, %s4746_s20  ;;  %4490 = vmatmul.mubr.msk.bf16.gmra.mrb[8].mxu0 %vm1175_vm11, %v1047_v30  ;;  %v534_v58 = vpop.permute.xlu0 %533  ;;  %v4372_v57 = vcombine.low %v5198_v38, %v5221_v6  ;;  %v718_v10 = vsel %vm709_vm3, %v672_v7, %v433_v54  ;;  %v511_v30 = vshrl.u32 %v4397_v35, 16 }
  0xd7   :  { %v790_v4 = vsel %vm774_vm5, %v747_v62, %v534_v58 }
  0xd8   :  { %v484_v61 = vpop.permute.xlu1 %483  ;;  %501 = vrot.lane.b32.xlu0 %v4371_v34, %s4747_s23  ;;  %v825_v9 = vsel %vm817_vm6, %v790_v4, %v534_v58 }
  0xd9   :  { %v749_v20 = vsel %vm731_vm4, %v718_v10, %v484_v61 }
  0xda   :  { %452 = vrot.lane.b32.xlu1 %v406_v59, %s4746_s20  ;;  %v576_v5 = vpop.permute.xlu0 %575 }
  0xdb   :  { %v855_v56 = vsel %vm839_vm7, %v825_v9, %v576_v5  ;;  %v516_v9 = vrot.slane %v514_v55, 5 }
  0xdc   :  { %v536_v37 = vpop.permute.xlu1 %535  ;;  %553 = vrot.lane.b32.xlu0 %v406_v59, %s4748_s24 }
  0xdd   :  { %v792_v26 = vsel %vm774_vm5, %v749_v20, %v536_v37 }
  0xde   :  { %503 = vrot.lane.b32.xlu1 %v4372_v57, %s4747_s23  ;;  %v618_v18 = vpop.permute.xlu0 %617  ;;  %v826_v40 = vsel %vm817_vm6, %v792_v26, %v536_v37  ;;  %v513_v37 = vrot.slane %v511_v30, 4  ;;  %v4717_v30 = vld [vmem:[%s8058_s0 + $0x14] sm:$0xf] }
  0xdf   :  { %v898_v23 = vsel %vm882_vm8, %v855_v56, %v618_v18  ;;  %v948_v55 = vunpack.c.l.bf16 %v4717_v30 }
  0xe0   :  { %v933_v29 = vsel %vm925_vm9, %v898_v23, %v618_v18  ;;  %v578_v31 = vpop.permute.xlu1 %577  ;;  %595 = vrot.lane.b32.xlu0 %v4371_v34, %s4749_s27  ;;  %v5302_v23 = vor.u32 %v516_v9, %v513_v37 }
  0xe1   :  { %v1048_v32 = vshrl.u32 %v933_v29, 16  ;;  %v1051_v33 = vshll.u32 %v933_v29, 16  ;;  %v857_v36 = vsel %vm839_vm7, %v826_v40, %v578_v31 }
  0xe2   :  { %555 = vrot.lane.b32.xlu1 %v415_v25, %s4748_s24  ;;  %v193_v39 = vpop.permute.xlu0 %192 }
  0xe3   :  { %v1050_v11 = vrot.slane %v1048_v32, 3  ;;  %v1053_v45 = vrot.slane %v1051_v33, 4  ;;  %v518_v33 = vsel %vm236_vm0, %v5255_v8, %v5302_v23  ;;  %vm2852_vm0 = vcmask 523264  }
  0xe4   :  { %v620_v46 = vpop.permute.xlu1 %619  ;;  %637 = vrot.lane.b32.xlu0 %v406_v59, %s4750_s13  ;;  %v4373_v59 = vcombine.low %v5226_v16, %v5226_v16 }
  0xe5   :  { %v1054_v54 = vor.u32 %v1053_v45, %v1050_v11  ;;  %v900_v34 = vsel %vm882_vm8, %v857_v36, %v620_v46 }
  0xe6   :  { %v934_v58 = vsel %vm925_vm9, %v900_v34, %v620_v46  ;;  %597 = vrot.lane.b32.xlu1 %v4372_v57, %s4749_s27  ;;  %v195_v50 = vpop.permute.xlu0 %194 }
  0xe7   :  { %v1056_v60 = vshrl.u32 %v934_v58, 16  ;;  %v1059_v61 = vshll.u32 %v934_v58, 16  ;;  %v1055_v62 = vsel %vm992_vm10, %v1046_v43, %v1054_v54 }
  0xe8   :  { %v435_v4 = vpop.permute.xlu1 %434  ;;  %212 = vrot.lane.b32.xlu0 %v4372_v57, %s4745_s15  ;;  %4493 = vmatprep.mubr.msk.bf16.mxu0 %vm1175_vm11, %v1055_v62  ;;  %v4395_v57 = vcombine.low %v5226_v16, %v5265_v19 }
  0xe9   :  { %v1058_v5 = vrot.slane %v1056_v60, 3  ;;  %v1061_v7 = vrot.slane %v1059_v61, 4  ;;  %v675_v18 = vsel %vm645_vm2, %v193_v39, %v435_v4  ;;  %v4718_v61 = vld [vmem:[%s8058_s0 + $0x10] sm:$0xf] }
  0xea   :  { %639 = vrot.lane.b32.xlu1 %v415_v25, %s4750_s13  ;;  %v486_v10 = vpop.permute.xlu0 %485  ;;  %v719_v26 = vsel %vm709_vm3, %v675_v18, %v435_v4  ;;  %v947_v62 = vunpack.c.l.bf16 %v4718_v61 }
  0xeb   :  { %v5294_v56 = vor.u32 %v1061_v7, %v1058_v5  ;;  %v751_v32 = vsel %vm731_vm4, %v719_v26, %v486_v10  ;;  %v4719_v10 = vld [vmem:[%s8058_s0 + $0x28] sm:$0xf]  ;;  %v4720_v26 = vld [vmem:[%s8058_s0 + $0x2c] sm:$0xf] }
  0xec   :  { %v437_v43 = vpop.permute.xlu1 %436  ;;  %214 = vrot.lane.b32.xlu0 %v4373_v59, %s4745_s15  ;;  %v953_v18 = vunpack.c.l.bf16 %v4719_v10  ;;  %v4725_v10 = vld [vmem:[%s8058_s0 + $0x30] sm:$0xf] }
  0xed   :  { %v1063_v20 = vsel %vm992_vm10, %v1054_v54, %v5294_v56  ;;  %v678_v40 = vsel %vm645_vm2, %v195_v50, %v437_v43 }
  0xee   :  { %454 = vrot.lane.b32.xlu1 %v415_v25, %s4746_s20  ;;  %4494 = vmatmul.mubr.msk.bf16.gmra.mrb[12].mxu0 %vm1175_vm11, %v1063_v20  ;;  %v538_v29 = vpop.permute.xlu0 %537  ;;  %v4396_v25 = vcombine.low %v5270_v63, %v5270_v63  ;;  %v720_v36 = vsel %vm709_vm3, %v678_v40, %v437_v43  ;;  %v4555_v20 = vpack.i.bf16 %v948_v55, %v947_v62 }
  0xef   :  { %v794_v35 = vsel %vm774_vm5, %v751_v32, %v538_v29 }
  0xf0   :  { %v488_v31 = vpop.permute.xlu1 %487  ;;  %505 = vrot.lane.b32.xlu0 %v4395_v57, %s4747_s23  ;;  %v827_v45 = vsel %vm817_vm6, %v794_v35, %v538_v29  ;;  %v954_v29 = vunpack.c.l.bf16 %v4720_v26  ;;  %v4721_v35 = vld [vmem:[%s8058_s0 + $0x18] sm:$0xf] }
  0xf2   :  { %456 = vrot.lane.b32.xlu1 %v5255_v8, %s4746_s20  ;;  %v580_v39 = vpop.permute.xlu0 %579  ;;  %v753_v8 = vsel %vm731_vm4, %v720_v36, %v488_v31  ;;  %v4571_v30 = vpack.i.bf16 %v954_v29, %v953_v18  ;;  %v955_v18 = vunpack.c.l.bf16 %v4725_v10  ;;  %s4754_s20 = smov 48  }
  0xf3   :  { %v859_v46 = vsel %vm839_vm7, %v827_v45, %v580_v39  ;;  %v949_v39 = vunpack.c.l.bf16 %v4721_v35  ;;  %v4727_v35 = vld [vmem:[%s8058_s0 + $0x40] sm:$0xf] }
  0xf4   :  { %v540_v11 = vpop.permute.xlu1 %539  ;;  %557 = vrot.lane.b32.xlu0 %v518_v33, %s4748_s24 }
  0xf5   :  { %v796_v58 = vsel %vm774_vm5, %v753_v8, %v540_v11  ;;  %v957_v8 = vunpack.c.l.bf16 %v4881_v1  ;;  %v4724_v1 = vld [vmem:[%s8058_s0 + $0x24] sm:$0xf] }
  0xf6   :  { %507 = vrot.lane.b32.xlu1 %v4396_v25, %s4747_s23  ;;  %v622_v54 = vpop.permute.xlu0 %621  ;;  %v828_v7 = vsel %vm817_vm6, %v796_v58, %v540_v11  ;;  %v952_v62 = vunpack.c.l.bf16 %v4724_v1 }
  0xf7   :  { %v902_v34 = vsel %vm882_vm8, %v859_v46, %v622_v54 }
  0xf8   :  { %v935_v50 = vsel %vm925_vm9, %v902_v34, %v622_v54  ;;  %v582_v60 = vpop.permute.xlu1 %581  ;;  %599 = vrot.lane.b32.xlu0 %v4395_v57, %s4749_s27 }
  0xf9   :  { %v1064_v4 = vshrl.u32 %v935_v50, 16  ;;  %v1067_v59 = vshll.u32 %v935_v50, 16  ;;  %v861_v43 = vsel %vm839_vm7, %v828_v7, %v582_v60  ;;  %v4723_v50 = vld [vmem:[%s8058_s0 + $0x20] sm:$0xf] }
  0xfa   :  { %559 = vrot.lane.b32.xlu1 %v5302_v23, %s4748_s24  ;;  %v197_v5 = vpop.permute.xlu0 %196  ;;  %v951_v60 = vunpack.c.l.bf16 %v4723_v50 }
  0xfb   :  { %v1066_v37 = vrot.slane %v1064_v4, 3  ;;  %v1069_v9 = vrot.slane %v1067_v59, 4  ;;  %v961_v59 = vunpack.c.l.bf16 %v4915_v21 }
  0xfc   :  { %v624_v57 = vpop.permute.xlu1 %623  ;;  %641 = vrot.lane.b32.xlu0 %v518_v33, %s4750_s13  ;;  %v4722_v33 = vld [vmem:[%s8058_s0 + $0x1c] sm:$0xf]  ;;  %v4566_v21 = vpack.i.bf16 %v952_v62, %v951_v60 }
  0xfd   :  { %v1070_v31 = vor.u32 %v1069_v9, %v1066_v37  ;;  %v904_v32 = vsel %vm882_vm8, %v861_v43, %v624_v57  ;;  %v950_v45 = vunpack.c.l.bf16 %v4722_v33  ;;  %v962_v9 = vunpack.c.l.bf16 %v4920_v22 }
  0xfe   :  { %v936_v40 = vsel %vm925_vm9, %v904_v32, %v624_v57  ;;  %601 = vrot.lane.b32.xlu1 %v4396_v25, %s4749_s27  ;;  %v199_v11 = vpop.permute.xlu0 %198  ;;  %v958_v25 = vunpack.c.l.bf16 %v4886_v2  ;;  %v4726_v57 = vld [vmem:[%s8058_s0 + $0x34] sm:$0xf] }
  0xff   :  { %v1072_v36 = vshrl.u32 %v936_v40, 16  ;;  %v1075_v46 = vshll.u32 %v936_v40, 16  ;;  %v1071_v54 = vsel %vm992_vm10, %v5294_v56, %v1070_v31  ;;  %v4561_v61 = vpack.i.bf16 %v950_v45, %v949_v39 }
 0x100   :  { %v439_v34 = vpop.permute.xlu1 %438  ;;  %4556 = vperm.xlu0 %4554, %v4555_v20   ;;  %4497 = vmatprep.mubr.msk.bf16.mxu0 %vm1175_vm11, %v1071_v54  ;;  %v4581_v37 = vpack.i.bf16 %v958_v25, %v957_v8  ;;  %v956_v22 = vunpack.c.l.bf16 %v4726_v57  ;;  %v965_v20 = vunpack.c.l.bf16 %v4956_v41  ;;  %v4591_v29 = vpack.i.bf16 %v962_v9, %v961_v59  ;;  %v4728_v41 = vld [vmem:[%s8058_s0 + $0x44] sm:$0xf]  ;;  %s4753_s0 = smov 32  }
 0x101   :  { %v1074_v55 = vrot.slane %v1072_v36, 3  ;;  %v1077_v58 = vrot.slane %v1075_v46, 4  ;;  %v681_v2 = vsel %vm645_vm2, %v197_v5, %v439_v34  ;;  %v959_v39 = vunpack.c.l.bf16 %v4727_v35 }
 0x102   :  { %643 = vrot.lane.b32.xlu1 %v5302_v23, %s4750_s13  ;;  %v490_v56 = vpop.permute.xlu0 %489  ;;  %v721_v43 = vsel %vm709_vm3, %v681_v2, %v439_v34  ;;  %v4576_v45 = vpack.i.bf16 %v956_v22, %v955_v18  ;;  %v960_v36 = vunpack.c.l.bf16 %v4728_v41  ;;  %v970_v34 = vunpack.c.l.bf16 %v5003_v3 }
 0x103   :  { %v5367_v4 = vor.u32 %v1077_v58, %v1074_v55  ;;  %v755_v32 = vsel %vm731_vm4, %v721_v43, %v490_v56  ;;  %v974_v2 = vunpack.c.l.bf16 %v5056_v53  ;;  %v968_v9 = vunpack.c.l.bf16 %v4978_v48 }
 0x104   :  { %v441_v7 = vpop.permute.xlu1 %440  ;;  %4572 = vperm.xlu0 %4554, %v4571_v30   ;;  %v963_v30 = vunpack.c.l.bf16 %v4932_v27  ;;  %v4586_v60 = vpack.i.bf16 %v960_v36, %v959_v39  ;;  %v977_v43 = vunpack.c.l.bf16 %v5123_v51  ;;  %v978_v57 = vunpack.c.l.bf16 %v5128_v15 }
 0x105   :  { %v1079_v23 = vsel %vm992_vm10, %v1070_v31, %v5367_v4  ;;  %v966_v31 = vunpack.c.l.bf16 %v4961_v42  ;;  %v684_v46 = vsel %vm645_vm2, %v199_v11, %v441_v7  ;;  %v969_v42 = vunpack.c.l.bf16 %v4998_v0 }
 0x106   :  { %4562 = vperm.xlu1 %4560, %v4561_v61   ;;  %4498 = vmatmul.mubr.msk.bf16.gmra.mrb[16].mxu0 %vm1175_vm11, %v1079_v23  ;;  %v542_v5 = vpop.permute.xlu0 %541  ;;  %v722_v55 = vsel %vm709_vm3, %v684_v46, %v441_v7  ;;  %v964_v11 = vunpack.c.l.bf16 %v4937_v28  ;;  %v973_v0 = vunpack.c.l.bf16 %v5051_v52  ;;  %v4631_v15 = vpack.i.bf16 %v978_v57, %v977_v43 }
 0x107   :  { %v798_v40 = vsel %vm774_vm5, %v755_v32, %v542_v5  ;;  %v4601_v8 = vpack.i.bf16 %v966_v31, %v965_v20  ;;  %v4611_v62 = vpack.i.bf16 %v970_v34, %v969_v42  ;;  %v971_v20 = vunpack.c.l.bf16 %v5015_v13 }
 0x108   :  { %v492_v26 = vpop.permute.xlu1 %491  ;;  %4582 = vperm.xlu0 %4554, %v4581_v37   ;;  %v829_v25 = vsel %vm817_vm6, %v798_v40, %v542_v5  ;;  %v967_v37 = vunpack.c.l.bf16 %v4973_v47  ;;  %v4596_v52 = vpack.i.bf16 %v964_v11, %v963_v30  ;;  %v4621_v53 = vpack.i.bf16 %v974_v2, %v973_v0 }
 0x109   :  { %v757_v56 = vsel %vm731_vm4, %v722_v55, %v492_v26  ;;  %v972_v31 = vunpack.c.l.bf16 %v5020_v14  ;;  %v981_v40 = vunpack.c.l.bf16 %v5193_v12  ;;  %v982_v13 = vunpack.c.l.bf16 %v5198_v38 }
 0x10a   :  { %v584_v33 = vpop.permute.xlu0 %583  ;;  %4567 = vperm.xlu1 %4560, %v4566_v21   ;;  %v975_v41 = vunpack.c.l.bf16 %v5080_v17  ;;  %v976_v46 = vunpack.c.l.bf16 %v5085_v24  ;;  %v985_v34 = vunpack.c.l.bf16 %v5265_v19  ;;  %v986_v12 = vunpack.c.l.bf16 %v5270_v63 }
 0x10b   :  { %v863_v58 = vsel %vm839_vm7, %v829_v25, %v584_v33  ;;  %v4616_v14 = vpack.i.bf16 %v972_v31, %v971_v20  ;;  %v979_v30 = vunpack.c.l.bf16 %v5151_v44  ;;  %v980_v55 = vunpack.c.l.bf16 %v5156_v49 }
 0x10c   :  { %v544_v54 = vpop.permute.xlu1 %543  ;;  %4592 = vperm.xlu0 %4554, %v4591_v29   ;;  %v4606_v29 = vpack.i.bf16 %v968_v9, %v967_v37  ;;  %v4626_v24 = vpack.i.bf16 %v976_v46, %v975_v41  ;;  %v983_v44 = vunpack.c.l.bf16 %v5221_v6  ;;  %v984_v0 = vunpack.c.l.bf16 %v5226_v16 }
 0x10d   :  { %v800_v3 = vsel %vm774_vm5, %v757_v56, %v544_v54  ;;  %v4636_v11 = vpack.i.bf16 %v980_v55, %v979_v30 }
 0x10e   :  { %v626_v50 = vpop.permute.xlu0 %625  ;;  %4577 = vperm.xlu1 %4560, %v4576_v45   ;;  %v830_v23 = vsel %vm817_vm6, %v800_v3, %v544_v54 }
 0x10f   :  { %v906_v61 = vsel %vm882_vm8, %v863_v58, %v626_v50 }
 0x110   :  { %v937_v27 = vsel %vm925_vm9, %v906_v61, %v626_v50  ;;  %v586_v1 = vpop.permute.xlu1 %585  ;;  %4602 = vperm.xlu0 %4554, %v4601_v8   ;;  %v4641_v8 = vpack.i.bf16 %v982_v13, %v981_v40  ;;  %v4651_v50 = vpack.i.bf16 %v986_v12, %v985_v34 }
 0x111   :  { %v1080_v59 = vshrl.u32 %v937_v27, 16  ;;  %v1083_v7 = vshll.u32 %v937_v27, 16  ;;  %v865_v5 = vsel %vm839_vm7, %v830_v23, %v586_v1 }
 0x112   :  { %v201_v28 = vpop.permute.xlu0 %200  ;;  %4587 = vperm.xlu1 %4560, %v4586_v60  }
 0x113   :  { %v1082_v10 = vrot.slane %v1080_v59, 3  ;;  %v1085_v18 = vrot.slane %v1083_v7, 4 }
 0x114   :  { %v628_v21 = vpop.permute.xlu1 %627  ;;  %4612 = vperm.xlu0 %4554, %v4611_v62   ;;  %v4646_v62 = vpack.i.bf16 %v984_v0, %v983_v44 }
 0x115   :  { %v1086_v22 = vor.u32 %v1085_v18, %v1082_v10  ;;  %v908_v47 = vsel %vm882_vm8, %v865_v5, %v628_v21 }
 0x116   :  { %v938_v48 = vsel %vm925_vm9, %v908_v47, %v628_v21  ;;  %v203_v26 = vpop.permute.xlu0 %202  ;;  %4597 = vperm.xlu1 %4560, %v4596_v52  }
 0x117   :  { %v1088_v51 = vshrl.u32 %v938_v48, 16  ;;  %v1091_v32 = vshll.u32 %v938_v48, 16  ;;  %v1087_v35 = vsel %vm992_vm10, %v5367_v4, %v1086_v22 }
 0x118   :  { %v443_v39 = vpop.permute.xlu1 %442  ;;  %4501 = vmatprep.mubr.msk.bf16.mxu0 %vm1175_vm11, %v1087_v35  ;;  %4622 = vperm.xlu0 %4554, %v4621_v53  }
 0x119   :  { %v1090_v33 = vrot.slane %v1088_v51, 3  ;;  %v1093_v45 = vrot.slane %v1091_v32, 4  ;;  %v687_v4 = vsel %vm645_vm2, %v201_v28, %v443_v39 }
 0x11a   :  { %v494_v36 = vpop.permute.xlu0 %493  ;;  %4607 = vperm.xlu1 %4560, %v4606_v29   ;;  %v723_v17 = vsel %vm709_vm3, %v687_v4, %v443_v39 }
 0x11b   :  { %v1094_v42 = vor.u32 %v1093_v45, %v1090_v33  ;;  %v759_v19 = vsel %vm731_vm4, %v723_v17, %v494_v36 }
 0x11c   :  { %v445_v54 = vpop.permute.xlu1 %444  ;;  %4632 = vperm.xlu0 %4554, %v4631_v15  }
 0x11d   :  { %v1095_v38 = vsel %vm992_vm10, %v1086_v22, %v1094_v42  ;;  %v690_v56 = vsel %vm645_vm2, %v203_v26, %v445_v54 }
 0x11e   :  { %4502 = vmatmul.mubr.msk.bf16.gmra.mrb[20].mxu0 %vm1175_vm11, %v1095_v38  ;;  %v546_v25 = vpop.permute.xlu0 %545  ;;  %4617 = vperm.xlu1 %4560, %v4616_v14   ;;  %v724_v3 = vsel %vm709_vm3, %v690_v56, %v445_v54 }
 0x11f   :  { %v802_v63 = vsel %vm774_vm5, %v759_v19, %v546_v25 }
 0x120   :  { %v496_v58 = vpop.permute.xlu1 %495  ;;  %4642 = vperm.xlu0 %4554, %v4641_v8   ;;  %v831_v49 = vsel %vm817_vm6, %v802_v63, %v546_v25 }
 0x121   :  { %v761_v2 = vsel %vm731_vm4, %v724_v3, %v496_v58 }
 0x122   :  { %v588_v60 = vpop.permute.xlu0 %587  ;;  %4627 = vperm.xlu1 %4560, %v4626_v24  }
 0x123   :  { %v867_v27 = vsel %vm839_vm7, %v831_v49, %v588_v60 }
 0x124   :  { %v548_v61 = vpop.permute.xlu1 %547  ;;  %4652 = vperm.xlu0 %4554, %v4651_v50  }
 0x125   :  { %v804_v6 = vsel %vm774_vm5, %v761_v2, %v548_v61 }
 0x126   :  { %v630_v1 = vpop.permute.xlu0 %629  ;;  %4637 = vperm.xlu1 %4560, %v4636_v11   ;;  %v832_v9 = vsel %vm817_vm6, %v804_v6, %v548_v61 }
 0x127   :  { %v910_v59 = vsel %vm882_vm8, %v867_v27, %v630_v1 }
 0x128   :  { %v939_v16 = vsel %vm925_vm9, %v910_v59, %v630_v1  ;;  %v590_v7 = vpop.permute.xlu1 %589 }
 0x129   :  { %v1096_v37 = vshrl.u32 %v939_v16, 16  ;;  %v1099_v28 = vshll.u32 %v939_v16, 16  ;;  %v869_v18 = vsel %vm839_vm7, %v832_v9, %v590_v7 }
 0x12a   :  { %v205_v52 = vpop.permute.xlu0 %204  ;;  %4647 = vperm.xlu1 %4560, %v4646_v62  }
 0x12b   :  { %v1098_v23 = vrot.slane %v1096_v37, 3  ;;  %v1101_v10 = vrot.slane %v1099_v28, 4 }
 0x12c   :  { %v632_v43 = vpop.permute.xlu1 %631 }
 0x12d   :  { %v1102_v5 = vor.u32 %v1101_v10, %v1098_v23  ;;  %v912_v21 = vsel %vm882_vm8, %v869_v18, %v632_v43 }
 0x12e   :  { %v940_v53 = vsel %vm925_vm9, %v912_v21, %v632_v43  ;;  %v207_v57 = vpop.permute.xlu0 %206 }
 0x12f   :  { %v1104_v22 = vshrl.u32 %v940_v53, 16  ;;  %v1107_v47 = vshll.u32 %v940_v53, 16  ;;  %v1103_v20 = vsel %vm992_vm10, %v1094_v42, %v1102_v5 }
 0x130   :  { %v447_v48 = vpop.permute.xlu1 %446  ;;  %4505 = vmatprep.mubr.msk.bf16.mxu0 %vm1175_vm11, %v1103_v20 }
 0x131   :  { %v1106_v26 = vrot.slane %v1104_v22, 3  ;;  %v1109_v29 = vrot.slane %v1107_v47, 4  ;;  %v693_v32 = vsel %vm645_vm2, %v205_v52, %v447_v48 }
 0x132   :  { %v498_v31 = vpop.permute.xlu0 %497  ;;  %v725_v15 = vsel %vm709_vm3, %v693_v32, %v447_v48 }
 0x133   :  { %v1110_v51 = vor.u32 %v1109_v29, %v1106_v26  ;;  %v763_v33 = vsel %vm731_vm4, %v725_v15, %v498_v31 }
 0x134   :  { %v449_v35 = vpop.permute.xlu1 %448 }
 0x135   :  { %v1111_v39 = vsel %vm992_vm10, %v1102_v5, %v1110_v51  ;;  %v696_v36 = vsel %vm645_vm2, %v207_v57, %v449_v35 }
 0x136   :  { %4506 = vmatmul.mubr.msk.bf16.gmra.mrb[24].mxu0 %vm1175_vm11, %v1111_v39  ;;  %v550_v40 = vpop.permute.xlu0 %549  ;;  %v726_v42 = vsel %vm709_vm3, %v696_v36, %v449_v35 }
 0x137   :  { %v806_v45 = vsel %vm774_vm5, %v763_v33, %v550_v40 }
 0x138   :  { %v500_v13 = vpop.permute.xlu1 %499  ;;  %v833_v46 = vsel %vm817_vm6, %v806_v45, %v550_v40 }
 0x139   :  { %v765_v8 = vsel %vm731_vm4, %v726_v42, %v500_v13 }
 0x13a   :  { %v592_v41 = vpop.permute.xlu0 %591 }
 0x13b   :  { %v871_v4 = vsel %vm839_vm7, %v833_v46, %v592_v41 }
 0x13c   :  { %v552_v14 = vpop.permute.xlu1 %551 }
 0x13d   :  { %v808_v12 = vsel %vm774_vm5, %v765_v8, %v552_v14 }
 0x13e   :  { %v634_v54 = vpop.permute.xlu0 %633  ;;  %v834_v55 = vsel %vm817_vm6, %v808_v12, %v552_v14 }
 0x13f   :  { %v914_v34 = vsel %vm882_vm8, %v871_v4, %v634_v54 }
 0x140   :  { %v941_v38 = vsel %vm925_vm9, %v914_v34, %v634_v54  ;;  %v594_v30 = vpop.permute.xlu1 %593 }
 0x141   :  { %v1112_v17 = vshrl.u32 %v941_v38, 16  ;;  %v1115_v25 = vshll.u32 %v941_v38, 16  ;;  %v873_v19 = vsel %vm839_vm7, %v834_v55, %v594_v30 }
 0x142   :  { %v209_v24 = vpop.permute.xlu0 %208 }
 0x143   :  { %v1114_v58 = vrot.slane %v1112_v17, 3  ;;  %v1117_v50 = vrot.slane %v1115_v25, 4 }
 0x144   :  { %v636_v63 = vpop.permute.xlu1 %635 }
 0x145   :  { %v1118_v60 = vor.u32 %v1117_v50, %v1114_v58  ;;  %v916_v11 = vsel %vm882_vm8, %v873_v19, %v636_v63 }
 0x146   :  { %v942_v44 = vsel %vm925_vm9, %v916_v11, %v636_v63  ;;  %v211_v0 = vpop.permute.xlu0 %210 }
 0x147   :  { %v1120_v56 = vshrl.u32 %v942_v44, 16  ;;  %v1123_v61 = vshll.u32 %v942_v44, 16  ;;  %v1119_v49 = vsel %vm992_vm10, %v1110_v51, %v1118_v60 }
 0x148   :  { %v451_v3 = vpop.permute.xlu1 %450  ;;  %4509 = vmatprep.mubr.msk.bf16.mxu0 %vm1175_vm11, %v1119_v49 }
 0x149   :  { %v1122_v27 = vrot.slane %v1120_v56, 3  ;;  %v1125_v1 = vrot.slane %v1123_v61, 4  ;;  %v699_v59 = vsel %vm645_vm2, %v209_v24, %v451_v3 }
 0x14a   :  { %v502_v62 = vpop.permute.xlu0 %501  ;;  %v727_v7 = vsel %vm709_vm3, %v699_v59, %v451_v3 }
 0x14b   :  { %v1126_v2 = vor.u32 %v1125_v1, %v1122_v27  ;;  %v767_v52 = vsel %vm731_vm4, %v727_v7, %v502_v62 }
 0x14c   :  { %v453_v6 = vpop.permute.xlu1 %452 }
 0x14d   :  { %v1127_v16 = vsel %vm992_vm10, %v1118_v60, %v1126_v2  ;;  %v702_v10 = vsel %vm645_vm2, %v211_v0, %v453_v6 }
 0x14e   :  { %4510 = vmatmul.mubr.msk.bf16.gmra.mrb[28].mxu0 %vm1175_vm11, %v1127_v16  ;;  %v554_v37 = vpop.permute.xlu0 %553  ;;  %v728_v5 = vsel %vm709_vm3, %v702_v10, %v453_v6 }
 0x14f   :  { %v810_v9 = vsel %vm774_vm5, %v767_v52, %v554_v37 }
 0x150   :  { %v504_v28 = vpop.permute.xlu1 %503  ;;  %v835_v43 = vsel %vm817_vm6, %v810_v9, %v554_v37 }
 0x151   :  { %v769_v57 = vsel %vm731_vm4, %v728_v5, %v504_v28 }
 0x152   :  { %v596_v23 = vpop.permute.xlu0 %595 }
 0x153   :  { %v875_v21 = vsel %vm839_vm7, %v835_v43, %v596_v23 }
 0x154   :  { %v556_v18 = vpop.permute.xlu1 %555 }
 0x155   :  { %v812_v47 = vsel %vm774_vm5, %v769_v57, %v556_v18 }
 0x156   :  { %v638_v53 = vpop.permute.xlu0 %637  ;;  %v836_v51 = vsel %vm817_vm6, %v812_v47, %v556_v18 }
 0x157   :  { %v918_v22 = vsel %vm882_vm8, %v875_v21, %v638_v53 }
 0x158   :  { %v943_v20 = vsel %vm925_vm9, %v918_v22, %v638_v53  ;;  %v598_v48 = vpop.permute.xlu1 %597 }
 0x159   :  { %v1128_v26 = vshrl.u32 %v943_v20, 16  ;;  %v1131_v29 = vshll.u32 %v943_v20, 16  ;;  %v877_v39 = vsel %vm839_vm7, %v836_v51, %v598_v48 }
 0x15a   :  { %v213_v31 = vpop.permute.xlu0 %212 }
 0x15b   :  { %v1130_v32 = vrot.slane %v1128_v26, 3  ;;  %v1133_v35 = vrot.slane %v1131_v29, 4 }
 0x15c   :  { %v640_v15 = vpop.permute.xlu1 %639 }
 0x15d   :  { %v1134_v40 = vor.u32 %v1133_v35, %v1130_v32  ;;  %v920_v13 = vsel %vm882_vm8, %v877_v39, %v640_v15 }
 0x15e   :  { %v944_v33 = vsel %vm925_vm9, %v920_v13, %v640_v15  ;;  %v215_v45 = vpop.permute.xlu0 %214 }
 0x15f   :  { %v1136_v41 = vshrl.u32 %v944_v33, 16  ;;  %v1139_v36 = vshll.u32 %v944_v33, 16  ;;  %v1135_v14 = vsel %vm992_vm10, %v1126_v2, %v1134_v40 }
 0x160   :  { %v455_v46 = vpop.permute.xlu1 %454  ;;  %4513 = vmatprep.mubr.msk.bf16.mxu0 %vm1175_vm11, %v1135_v14 }
 0x161   :  { %v1138_v42 = vrot.slane %v1136_v41, 3  ;;  %v1141_v4 = vrot.slane %v1139_v36, 4  ;;  %v705_v34 = vsel %vm645_vm2, %v213_v31, %v455_v46 }
 0x162   :  { %v506_v54 = vpop.permute.xlu0 %505  ;;  %v729_v30 = vsel %vm709_vm3, %v705_v34, %v455_v46 }
 0x163   :  { %v1142_v8 = vor.u32 %v1141_v4, %v1138_v42  ;;  %v771_v24 = vsel %vm731_vm4, %v729_v30, %v506_v54 }
 0x164   :  { %v457_v12 = vpop.permute.xlu1 %456 }
 0x165   :  { %v1143_v38 = vsel %vm992_vm10, %v1134_v40, %v1142_v8  ;;  %v708_v50 = vsel %vm645_vm2, %v215_v45, %v457_v12  ;;  %vm2938_vm2 = vcmask 785408  }
 0x166   :  { %4514 = vmatmul.mubr.msk.bf16.gmra.mrb[32].mxu0 %vm1175_vm11, %v1143_v38  ;;  %v558_v17 = vpop.permute.xlu0 %557  ;;  %v730_v60 = vsel %vm709_vm3, %v708_v50, %v457_v12  ;;  %vm2981_vm3 = vcmask 916480  }
 0x167   :  { %v814_v55 = vsel %vm774_vm5, %v771_v24, %v558_v17 }
 0x168   :  { %v508_v25 = vpop.permute.xlu1 %507  ;;  %v837_v63 = vsel %vm817_vm6, %v814_v55, %v558_v17 }
 0x169   :  { %v773_v0 = vsel %vm731_vm4, %v730_v60, %v508_v25 }
 0x16a   :  { %v600_v58 = vpop.permute.xlu0 %599 }
 0x16b   :  { %v879_v11 = vsel %vm839_vm7, %v837_v63, %v600_v58 }
 0x16c   :  { %v560_v19 = vpop.permute.xlu1 %559 }
 0x16d   :  { %v816_v61 = vsel %vm774_vm5, %v773_v0, %v560_v19 }
 0x16e   :  { %v642_v44 = vpop.permute.xlu0 %641  ;;  %v838_v62 = vsel %vm817_vm6, %v816_v61, %v560_v19 }
 0x16f   :  { %v922_v56 = vsel %vm882_vm8, %v879_v11, %v642_v44 }
 0x170   :  { %v945_v49 = vsel %vm925_vm9, %v922_v56, %v642_v44  ;;  %v602_v3 = vpop.permute.xlu1 %601 }
 0x171   :  { %v1144_v27 = vshrl.u32 %v945_v49, 16  ;;  %v1147_v1 = vshll.u32 %v945_v49, 16  ;;  %v881_v6 = vsel %vm839_vm7, %v838_v62, %v602_v3 }
 0x173   :  { %v1146_v2 = vrot.slane %v1144_v27, 3  ;;  %v1149_v59 = vrot.slane %v1147_v1, 4 }
 0x174   :  { %v644_v16 = vpop.permute.xlu1 %643 }
 0x175   :  { %v1150_v7 = vor.u32 %v1149_v59, %v1146_v2  ;;  %v924_v37 = vsel %vm882_vm8, %v881_v6, %v644_v16 }
 0x176   :  { %v946_v28 = vsel %vm925_vm9, %v924_v37, %v644_v16 }
 0x177   :  { %v1152_v52 = vshrl.u32 %v946_v28, 16  ;;  %v1155_v9 = vshll.u32 %v946_v28, 16  ;;  %v1151_v23 = vsel %vm992_vm10, %v1142_v8, %v1150_v7 }
 0x178   :  { %4517 = vmatprep.mubr.msk.bf16.mxu0 %vm1175_vm11, %v1151_v23 }
 0x179   :  { %v1154_v10 = vrot.slane %v1152_v52, 3  ;;  %v1157_v18 = vrot.slane %v1155_v9, 4  ;;  %v5509_v43 = vpop.f32.mrb[0].mxu0 }
 0x17a   :  { %v5511_v5 = vpop.f32.mrb[1].mxu0 }
 0x17b   :  { %v1158_v21 = vor.u32 %v1157_v18, %v1154_v10  ;;  %v5513_v53 = vpop.f32.mrb[2].mxu0 }
 0x17c   :  { %v5515_v57 = vpop.f32.mrb[3].mxu0 }
 0x17d   :  { %v1159_v22 = vsel %vm992_vm10, %v1150_v7, %v1158_v21 }
 0x17e   :  { %4518 = vmatmul.mubr.msk.bf16.gmra.mrb[36].mxu0 %vm1175_vm11, %v1159_v22 }
 0x17f   :  { %v4557_v47 = vpop.permute.xlu0 %4556 }
 0x180   :  { %v5519_v20 = vunpack.i.h.bf16 %v4557_v47  ;;  %v5521_v48 = vunpack.i.l.bf16 %v4557_v47 }
 0x182   :  { %8207 = vst [vmem:[#allocation3_spill] sm:$0xff] %v5519_v20  ;;  %8208 = vst [vmem:[#allocation4_spill] sm:$0xff] %v5521_v48  ;;  %v1636_v26 = vmul.f32 %v5519_v20, %v5515_v57  ;;  %v1635_v29 = vmul.f32 %v5521_v48, %v5511_v5 }
 0x183   :  { %v4573_v8 = vpop.permute.xlu0 %4572 }
 0x184   :  { %v1676_v31 = vsel %vm925_vm9, %v1636_v26, 0.0  ;;  %v1761_v51 = vmul.f32 %v1636_v26, %v5515_v57  ;;  %v1675_v32 = vsel %vm925_vm9, %v1635_v29, 0.0  ;;  %v1760_v35 = vmul.f32 %v1635_v29, %v5511_v5 }
 0x185   :  { %v1677_v39 = vadd.f32 %v1676_v31, %v1675_v32  ;;  %v4563_v15 = vpop.permute.xlu1 %4562  ;;  %v5547_v24 = vunpack.i.l.bf16 %v4573_v8  ;;  %v5551_v50 = vunpack.i.h.bf16 %v4573_v8 }
 0x186   :  { %v1801_v40 = vsel %vm925_vm9, %v1761_v51, 0.0  ;;  %v1800_v13 = vsel %vm925_vm9, %v1760_v35, 0.0  ;;  %v5533_v33 = vunpack.i.h.bf16 %v4563_v15  ;;  %v5535_v45 = vunpack.i.l.bf16 %v4563_v15 }
 0x187   :  { %v1802_v41 = vadd.f32 %v1801_v40, %v1800_v13  ;;  %8211 = vst [vmem:[#allocation7_spill] sm:$0xff] %v5547_v24  ;;  %8213 = vst [vmem:[#allocation9_spill] sm:$0xff] %v5551_v50  ;;  %v4583_v29 = vpop.permute.xlu0 %4582 }
 0x188   :  { %8209 = vst [vmem:[#allocation5_spill] sm:$0xff] %v5533_v33  ;;  %8210 = vst [vmem:[#allocation6_spill] sm:$0xff] %v5535_v45  ;;  %v1637_v36 = vmul.f32 %v5535_v45, %v5509_v43  ;;  %v1638_v14 = vmul.f32 %v5533_v33, %v5513_v53  ;;  %v5583_v51 = vunpack.i.l.bf16 %v4583_v29  ;;  %v5587_v35 = vunpack.i.h.bf16 %v4583_v29 }
 0x189   :  { %v4568_v34 = vpop.permute.xlu1 %4567 }
 0x18a   :  { %v1678_v46 = vsel %vm925_vm9, %v1637_v36, 0.0  ;;  %v1762_v42 = vmul.f32 %v5509_v43, %v1637_v36  ;;  %v1763_v4 = vmul.f32 %v5513_v53, %v1638_v14  ;;  %v1680_v12 = vsel %vm925_vm9, %v1638_v14, 0.0  ;;  %8215 = vst [vmem:[#allocation11_spill] sm:$0xff] %v5583_v51  ;;  %8217 = vst [vmem:[#allocation13_spill] sm:$0xff] %v5587_v35 }
 0x18b   :  { %v1679_v54 = vadd.f32 %v1678_v46, %v1677_v39  ;;  %v5549_v55 = vunpack.i.l.bf16 %v4568_v34  ;;  %v5553_v19 = vunpack.i.h.bf16 %v4568_v34 }
 0x18c   :  { %v1803_v38 = vsel %vm925_vm9, %v1762_v42, 0.0  ;;  %v1805_v25 = vsel %vm925_vm9, %v1763_v4, 0.0 }
 0x18d   :  { %v1681_v30 = vadd.f32 %v1680_v12, %v1679_v54  ;;  %v1804_v17 = vadd.f32 %v1803_v38, %v1802_v41  ;;  %8212 = vst [vmem:[#allocation8_spill] sm:$0xff] %v5549_v55  ;;  %8214 = vst [vmem:[#allocation10_spill] sm:$0xff] %v5553_v19  ;;  %v4578_v31 = vpop.permute.xlu1 %4577 }
 0x18e   :  { %v5585_v32 = vunpack.i.l.bf16 %v4578_v31  ;;  %v5589_v39 = vunpack.i.h.bf16 %v4578_v31 }
 0x18f   :  { %v1806_v58 = vadd.f32 %v1805_v25, %v1804_v17 }
 0x190   :  { %8216 = vst [vmem:[#allocation12_spill] sm:$0xff] %v5585_v32  ;;  %8218 = vst [vmem:[#allocation14_spill] sm:$0xff] %v5589_v39 }
 0x191   :  { %v5555_v63 = vpop.f32.mrb[4].mxu0 }
 0x192   :  { %v5557_v60 = vpop.f32.mrb[5].mxu0  ;;  %v1641_v11 = vmul.f32 %v5547_v24, %v5555_v63 }
 0x193   :  { %v1639_v44 = vmul.f32 %v5549_v55, %v5557_v60  ;;  %v5563_v0 = vpop.f32.mrb[6].mxu0 }
 0x194   :  { %v5565_v56 = vpop.f32.mrb[7].mxu0  ;;  %v1642_v3 = vmul.f32 %v5551_v50, %v5563_v0  ;;  %v1766_v62 = vmul.f32 %v5555_v63, %v1641_v11  ;;  %v1686_v37 = vsel %vm925_vm9, %v1641_v11, 0.0 }
 0x195   :  { %v1682_v61 = vsel %vm925_vm9, %v1639_v44, 0.0  ;;  %v1764_v49 = vmul.f32 %v1639_v44, %v5557_v60  ;;  %v1640_v27 = vmul.f32 %v5553_v19, %v5565_v56 }
 0x196   :  { %v1683_v1 = vadd.f32 %v1682_v61, %v1681_v30  ;;  %v1767_v28 = vmul.f32 %v5563_v0, %v1642_v3  ;;  %v1811_v10 = vsel %vm925_vm9, %v1766_v62, 0.0  ;;  %v1688_v18 = vsel %vm925_vm9, %v1642_v3, 0.0 }
 0x197   :  { %v1807_v2 = vsel %vm925_vm9, %v1764_v49, 0.0  ;;  %v1684_v59 = vsel %vm925_vm9, %v1640_v27, 0.0  ;;  %v1765_v6 = vmul.f32 %v1640_v27, %v5565_v56 }
 0x198   :  { %v1808_v16 = vadd.f32 %v1807_v2, %v1806_v58  ;;  %v1685_v7 = vadd.f32 %v1684_v59, %v1683_v1  ;;  %v1813_v47 = vsel %vm925_vm9, %v1767_v28, 0.0 }
 0x199   :  { %v1809_v52 = vsel %vm925_vm9, %v1765_v6, 0.0  ;;  %v4593_v6 = vpop.permute.xlu0 %4592 }
 0x19a   :  { %v1687_v9 = vadd.f32 %v1686_v37, %v1685_v7  ;;  %v1810_v23 = vadd.f32 %v1809_v52, %v1808_v16  ;;  %v4588_v16 = vpop.permute.xlu1 %4587  ;;  %v5619_v7 = vunpack.i.l.bf16 %v4593_v6  ;;  %v5623_v28 = vunpack.i.h.bf16 %v4593_v6 }
 0x19b   :  { %v5621_v37 = vunpack.i.l.bf16 %v4588_v16  ;;  %v5625_v52 = vunpack.i.h.bf16 %v4588_v16 }
 0x19c   :  { %v1812_v21 = vadd.f32 %v1811_v10, %v1810_v23  ;;  %v1689_v22 = vadd.f32 %v1688_v18, %v1687_v9  ;;  %8219 = vst [vmem:[#allocation15_spill] sm:$0xff] %v5619_v7  ;;  %8221 = vst [vmem:[#allocation17_spill] sm:$0xff] %v5623_v28 }
 0x19d   :  { %8220 = vst [vmem:[#allocation16_spill] sm:$0xff] %v5621_v37  ;;  %8222 = vst [vmem:[#allocation18_spill] sm:$0xff] %v5625_v52 }
 0x19e   :  { %v1814_v26 = vadd.f32 %v1813_v47, %v1812_v21 }
 0x1a9   :  { %v5591_v15 = vpop.f32.mrb[8].mxu0 }
 0x1aa   :  { %v5593_v40 = vpop.f32.mrb[9].mxu0  ;;  %v1645_v13 = vmul.f32 %v5583_v51, %v5591_v15 }
 0x1ab   :  { %v1643_v41 = vmul.f32 %v5585_v32, %v5593_v40  ;;  %v5599_v36 = vpop.f32.mrb[10].mxu0 }
 0x1ac   :  { %v5601_v14 = vpop.f32.mrb[11].mxu0  ;;  %v1646_v4 = vmul.f32 %v5587_v35, %v5599_v36  ;;  %v1770_v34 = vmul.f32 %v5591_v15, %v1645_v13  ;;  %v1694_v58 = vsel %vm925_vm9, %v1645_v13, 0.0 }
 0x1ad   :  { %v1690_v46 = vsel %vm925_vm9, %v1643_v41, 0.0  ;;  %v1768_v42 = vmul.f32 %v1643_v41, %v5593_v40  ;;  %v1644_v54 = vmul.f32 %v5589_v39, %v5601_v14 }
 0x1ae   :  { %v1691_v8 = vadd.f32 %v1690_v46, %v1689_v22  ;;  %v1771_v11 = vmul.f32 %v5599_v36, %v1646_v4  ;;  %v1819_v3 = vsel %vm925_vm9, %v1770_v34, 0.0  ;;  %v1696_v27 = vsel %vm925_vm9, %v1646_v4, 0.0 }
 0x1af   :  { %v1815_v12 = vsel %vm925_vm9, %v1768_v42, 0.0  ;;  %v1692_v38 = vsel %vm925_vm9, %v1644_v54, 0.0  ;;  %v1769_v30 = vmul.f32 %v1644_v54, %v5601_v14 }
 0x1b0   :  { %v1816_v17 = vadd.f32 %v1815_v12, %v1814_v26  ;;  %v1693_v25 = vadd.f32 %v1692_v38, %v1691_v8  ;;  %v1821_v2 = vsel %vm925_vm9, %v1771_v11, 0.0 }
 0x1b1   :  { %v1817_v44 = vsel %vm925_vm9, %v1769_v30, 0.0 }
 0x1b2   :  { %v1695_v61 = vadd.f32 %v1694_v58, %v1693_v25  ;;  %v1818_v49 = vadd.f32 %v1817_v44, %v1816_v17 }
 0x1b4   :  { %v1820_v1 = vadd.f32 %v1819_v3, %v1818_v49  ;;  %v1697_v62 = vadd.f32 %v1696_v27, %v1695_v61  ;;  %v4603_v3 = vpop.permute.xlu0 %4602  ;;  %v4598_v27 = vpop.permute.xlu1 %4597 }
 0x1b6   :  { %v1822_v59 = vadd.f32 %v1821_v2, %v1820_v1  ;;  %v5655_v1 = vunpack.i.l.bf16 %v4603_v3  ;;  %v5659_v2 = vunpack.i.h.bf16 %v4603_v3 }
 0x1b8   :  { %8223 = vst [vmem:[#allocation19_spill] sm:$0xff] %v5655_v1  ;;  %8225 = vst [vmem:[#allocation21_spill] sm:$0xff] %v5659_v2 }
 0x1c1   :  { %v5627_v9 = vpop.f32.mrb[12].mxu0 }
 0x1c2   :  { %v5629_v23 = vpop.f32.mrb[13].mxu0  ;;  %v1649_v10 = vmul.f32 %v5619_v7, %v5627_v9 }
 0x1c3   :  { %v1647_v18 = vmul.f32 %v5621_v37, %v5629_v23  ;;  %v5635_v21 = vpop.f32.mrb[14].mxu0 }
 0x1c4   :  { %v5637_v22 = vpop.f32.mrb[15].mxu0  ;;  %v1650_v29 = vmul.f32 %v5623_v28, %v5635_v21  ;;  %v1774_v41 = vmul.f32 %v5627_v9, %v1649_v10  ;;  %v1702_v34 = vsel %vm925_vm9, %v1649_v10, 0.0 }
 0x1c5   :  { %v1698_v47 = vsel %vm925_vm9, %v1647_v18, 0.0  ;;  %v1772_v26 = vmul.f32 %v1647_v18, %v5629_v23  ;;  %v1648_v31 = vmul.f32 %v5625_v52, %v5637_v22 }
 0x1c6   :  { %v1699_v13 = vadd.f32 %v1698_v47, %v1697_v62  ;;  %v1775_v12 = vmul.f32 %v5635_v21, %v1650_v29  ;;  %v1827_v25 = vsel %vm925_vm9, %v1774_v41, 0.0  ;;  %v1704_v58 = vsel %vm925_vm9, %v1650_v29, 0.0 }
 0x1c7   :  { %v1823_v46 = vsel %vm925_vm9, %v1772_v26, 0.0  ;;  %v1700_v42 = vsel %vm925_vm9, %v1648_v31, 0.0  ;;  %v1773_v4 = vmul.f32 %v1648_v31, %v5637_v22  ;;  %v5657_v62 = vunpack.i.l.bf16 %v4598_v27 }
 0x1c8   :  { %v1824_v54 = vadd.f32 %v1823_v46, %v1822_v59  ;;  %v1701_v8 = vadd.f32 %v1700_v42, %v1699_v13  ;;  %v1829_v61 = vsel %vm925_vm9, %v1775_v12, 0.0  ;;  %v5661_v59 = vunpack.i.h.bf16 %v4598_v27 }
 0x1c9   :  { %v1825_v38 = vsel %vm925_vm9, %v1773_v4, 0.0  ;;  %8224 = vst [vmem:[#allocation20_spill] sm:$0xff] %v5657_v62 }
 0x1ca   :  { %v1703_v30 = vadd.f32 %v1702_v34, %v1701_v8  ;;  %v1826_v17 = vadd.f32 %v1825_v38, %v1824_v54  ;;  %8226 = vst [vmem:[#allocation22_spill] sm:$0xff] %v5661_v59 }
 0x1cc   :  { %v1828_v11 = vadd.f32 %v1827_v25, %v1826_v17  ;;  %v1705_v44 = vadd.f32 %v1704_v58, %v1703_v30 }
 0x1ce   :  { %v1830_v49 = vadd.f32 %v1829_v61, %v1828_v11 }
 0x1d9   :  { %v5663_v6 = vpop.f32.mrb[16].mxu0 }
 0x1da   :  { %v5665_v16 = vpop.f32.mrb[17].mxu0  ;;  %v1653_v10 = vmul.f32 %v5655_v1, %v5663_v6 }
 0x1db   :  { %v1651_v18 = vmul.f32 %v5657_v62, %v5665_v16  ;;  %v5671_v47 = vpop.f32.mrb[18].mxu0 }
 0x1dc   :  { %v5673_v26 = vpop.f32.mrb[19].mxu0  ;;  %v1654_v13 = vmul.f32 %v5659_v2, %v5671_v47  ;;  %v1778_v42 = vmul.f32 %v5663_v6, %v1653_v10  ;;  %v1710_v38 = vsel %vm925_vm9, %v1653_v10, 0.0 }
 0x1dd   :  { %v1706_v29 = vsel %vm925_vm9, %v1651_v18, 0.0  ;;  %v1776_v31 = vmul.f32 %v1651_v18, %v5665_v16  ;;  %v1652_v41 = vmul.f32 %v5661_v59, %v5673_v26 }
 0x1de   :  { %v1707_v46 = vadd.f32 %v1706_v29, %v1705_v44  ;;  %v1779_v30 = vmul.f32 %v5671_v47, %v1654_v13  ;;  %v1835_v11 = vsel %vm925_vm9, %v1778_v42, 0.0  ;;  %v1712_v44 = vsel %vm925_vm9, %v1654_v13, 0.0  ;;  %v4613_v29 = vpop.permute.xlu0 %4612 }
 0x1df   :  { %v1831_v4 = vsel %vm925_vm9, %v1776_v31, 0.0  ;;  %v1708_v54 = vsel %vm925_vm9, %v1652_v41, 0.0  ;;  %v1777_v8 = vmul.f32 %v1652_v41, %v5673_v26  ;;  %v5691_v31 = vunpack.i.l.bf16 %v4613_v29 }
 0x1e0   :  { %v1832_v34 = vadd.f32 %v1831_v4, %v1830_v49  ;;  %v1709_v12 = vadd.f32 %v1708_v54, %v1707_v46  ;;  %v1837_v27 = vsel %vm925_vm9, %v1779_v30, 0.0  ;;  %v4608_v49 = vpop.permute.xlu1 %4607  ;;  %v5695_v41 = vunpack.i.h.bf16 %v4613_v29 }
 0x1e1   :  { %v1833_v17 = vsel %vm925_vm9, %v1777_v8, 0.0  ;;  %8227 = vst [vmem:[#allocation23_spill] sm:$0xff] %v5691_v31  ;;  %v5693_v10 = vunpack.i.l.bf16 %v4608_v49  ;;  %v5697_v46 = vunpack.i.h.bf16 %v4608_v49 }
 0x1e2   :  { %v1711_v25 = vadd.f32 %v1710_v38, %v1709_v12  ;;  %v1834_v58 = vadd.f32 %v1833_v17, %v1832_v34  ;;  %8229 = vst [vmem:[#allocation25_spill] sm:$0xff] %v5695_v41 }
 0x1e3   :  { %8228 = vst [vmem:[#allocation24_spill] sm:$0xff] %v5693_v10  ;;  %8230 = vst [vmem:[#allocation26_spill] sm:$0xff] %v5697_v46 }
 0x1e4   :  { %v1836_v61 = vadd.f32 %v1835_v11, %v1834_v58  ;;  %v1713_v3 = vadd.f32 %v1712_v44, %v1711_v25 }
 0x1e6   :  { %v1838_v18 = vadd.f32 %v1837_v27, %v1836_v61 }
 0x1f1   :  { %v5699_v4 = vpop.f32.mrb[20].mxu0 }
 0x1f2   :  { %v5701_v42 = vpop.f32.mrb[21].mxu0  ;;  %v1657_v13 = vmul.f32 %v5691_v31, %v5699_v4 }
 0x1f3   :  { %v1655_v54 = vmul.f32 %v5693_v10, %v5701_v42  ;;  %v5707_v8 = vpop.f32.mrb[22].mxu0 }
 0x1f4   :  { %v5709_v34 = vpop.f32.mrb[23].mxu0  ;;  %v1658_v30 = vmul.f32 %v5695_v41, %v5707_v8  ;;  %v1782_v58 = vmul.f32 %v5699_v4, %v1657_v13  ;;  %v1718_v49 = vsel %vm925_vm9, %v1657_v13, 0.0 }
 0x1f5   :  { %v1714_v12 = vsel %vm925_vm9, %v1655_v54, 0.0  ;;  %v1780_v38 = vmul.f32 %v1655_v54, %v5701_v42  ;;  %v1656_v17 = vmul.f32 %v5697_v46, %v5709_v34 }
 0x1f6   :  { %v1715_v25 = vadd.f32 %v1714_v12, %v1713_v3  ;;  %v1783_v54 = vmul.f32 %v5707_v8, %v1658_v30  ;;  %v1843_v3 = vsel %vm925_vm9, %v1782_v58, 0.0  ;;  %v1720_v12 = vsel %vm925_vm9, %v1658_v30, 0.0 }
 0x1f7   :  { %v1839_v11 = vsel %vm925_vm9, %v1780_v38, 0.0  ;;  %v1716_v44 = vsel %vm925_vm9, %v1656_v17, 0.0  ;;  %v1781_v61 = vmul.f32 %v1656_v17, %v5709_v34  ;;  %v4623_v17 = vpop.permute.xlu0 %4622 }
 0x1f8   :  { %v1840_v27 = vadd.f32 %v1839_v11, %v1838_v18  ;;  %v1717_v29 = vadd.f32 %v1716_v44, %v1715_v25  ;;  %v1845_v2 = vsel %vm925_vm9, %v1783_v54, 0.0  ;;  %v4618_v18 = vpop.permute.xlu1 %4617  ;;  %v5727_v25 = vunpack.i.l.bf16 %v4623_v17 }
 0x1f9   :  { %v1841_v41 = vsel %vm925_vm9, %v1781_v61, 0.0  ;;  %v5729_v13 = vunpack.i.l.bf16 %v4618_v18  ;;  %v5731_v11 = vunpack.i.h.bf16 %v4623_v17  ;;  %v5733_v44 = vunpack.i.h.bf16 %v4618_v18 }
 0x1fa   :  { %v1719_v31 = vadd.f32 %v1718_v49, %v1717_v29  ;;  %v1842_v10 = vadd.f32 %v1841_v41, %v1840_v27  ;;  %8231 = vst [vmem:[#allocation27_spill] sm:$0xff] %v5727_v25 }
 0x1fb   :  { %8232 = vst [vmem:[#allocation28_spill] sm:$0xff] %v5729_v13  ;;  %8233 = vst [vmem:[#allocation29_spill] sm:$0xff] %v5731_v11 }
 0x1fc   :  { %v1844_v46 = vadd.f32 %v1843_v3, %v1842_v10  ;;  %v1721_v38 = vadd.f32 %v1720_v12, %v1719_v31  ;;  %8234 = vst [vmem:[#allocation30_spill] sm:$0xff] %v5733_v44 }
 0x1fe   :  { %v1846_v1 = vadd.f32 %v1845_v2, %v1844_v46  ;;  %v8078_v46 = vmov 0  }
 0x1ff   :  { %2106 = vst.msk [vmem:[#allocation2 + $0x8] sm:$0xff] %vm774_vm5, %v8078_v46  ;;  %2105 = vst.msk [vmem:[#allocation2] sm:$0xff] %vm774_vm5, %v8078_v46  ;;  %4521 = vmatprep.subr.bf16.mxu1 %v8078_v46  ;;  %3484 = vmatprep.subr.bf16.mxu0 %v8078_v46 }
 0x200   :  { %2107 = vst.msk [vmem:[#allocation2 + $0xb0] sm:$0xff] %vm774_vm5, %v8078_v46  ;;  %2108 = vst.msk [vmem:[#allocation2 + $0xb8] sm:$0xff] %vm774_vm5, %v8078_v46 }
 0x209   :  { %v5735_v41 = vpop.f32.mrb[24].mxu0 }
 0x20a   :  { %v5737_v58 = vpop.f32.mrb[25].mxu0  ;;  %v1661_v31 = vmul.f32 %v5727_v25, %v5735_v41 }
 0x20b   :  { %v1659_v2 = vmul.f32 %v5729_v13, %v5737_v58  ;;  %v5743_v10 = vpop.f32.mrb[26].mxu0 }
 0x20c   :  { %v5755_v30 = vpop.f32.mrb[27].mxu0  ;;  %v1662_v29 = vmul.f32 %v5731_v11, %v5743_v10  ;;  %v1786_v3 = vmul.f32 %v5735_v41, %v1661_v31  ;;  %v1726_v13 = vsel %vm925_vm9, %v1661_v31, 0.0 }
 0x20d   :  { %v1722_v61 = vsel %vm925_vm9, %v1659_v2, 0.0  ;;  %v1784_v27 = vmul.f32 %v1659_v2, %v5737_v58  ;;  %v1660_v49 = vmul.f32 %v5733_v44, %v5755_v30  ;;  %v5770_v44 = vld [vmem:[#allocation2 + $0x8] sm:$0xff] }
 0x20e   :  { %v1723_v54 = vadd.f32 %v1722_v61, %v1721_v38  ;;  %v1787_v2 = vmul.f32 %v5743_v10, %v1662_v29  ;;  %8235 = vst [vmem:[#allocation31_spill] sm:$0xff] %v5770_v44  ;;  %v1851_v38 = vsel %vm925_vm9, %v1786_v3, 0.0  ;;  %v1728_v61 = vsel %vm925_vm9, %v1662_v29, 0.0 }
 0x20f   :  { %v1847_v12 = vsel %vm925_vm9, %v1784_v27, 0.0  ;;  %v1724_v17 = vsel %vm925_vm9, %v1660_v49, 0.0  ;;  %v1785_v18 = vmul.f32 %v1660_v49, %v5755_v30  ;;  %v2179_v27 = vshll.u32 %v5770_v44, 16 }
 0x210   :  { %v1848_v46 = vadd.f32 %v1847_v12, %v1846_v1  ;;  %v1725_v25 = vadd.f32 %v1724_v17, %v1723_v54  ;;  %v8092_v49 = vrot.slane %v5770_v44, 1  ;;  %v1853_v31 = vsel %vm925_vm9, %v1787_v2, 0.0 }
 0x211   :  { %v1849_v11 = vsel %vm925_vm9, %v1785_v18, 0.0  ;;  %v5777_v12 = vrot.slane %v2179_v27, 1 }
 0x212   :  { %v1727_v59 = vadd.f32 %v1726_v13, %v1725_v25  ;;  %v1850_v62 = vadd.f32 %v1849_v11, %v1848_v46  ;;  %2442 = vrot.lane.b32.xlu0 %v8092_v49, %s4753_s0  ;;  %v2171_v13 = vld [vmem:[#allocation2 + $0x8] sm:$0x80]  ;;  %v4633_v11 = vpop.permute.xlu0 %4632 }
 0x213   :  { %8236 = vst [vmem:[#allocation32_spill] sm:$0xff] %v5777_v12  ;;  %2337 = vrot.lane.b32.xlu1 %v5777_v12, %s4748_s24  ;;  %v5793_v17 = vunpack.i.h.bf16 %v4633_v11 }
 0x214   :  { %v1852_v1 = vadd.f32 %v1851_v38, %v1850_v62  ;;  %v1729_v54 = vadd.f32 %v1728_v61, %v1727_v59  ;;  %v4628_v62 = vpop.permute.xlu1 %4627  ;;  %v5785_v59 = vunpack.i.l.bf16 %v4633_v11 }
 0x215   :  { %v5787_v46 = vunpack.i.l.bf16 %v4628_v62  ;;  %8239 = vst [vmem:[#allocation35_spill] sm:$0xff] %v5793_v17  ;;  %v5795_v18 = vunpack.i.h.bf16 %v4628_v62 }
 0x216   :  { %v1854_v25 = vadd.f32 %v1853_v31, %v1852_v1  ;;  %8237 = vst [vmem:[#allocation33_spill] sm:$0xff] %v5785_v59 }
 0x217   :  { %2486 = vrot.lane.b32.xlu1 %v2171_v13, %s4754_s20  ;;  %8238 = vst [vmem:[#allocation34_spill] sm:$0xff] %v5787_v46  ;;  %8240 = vst [vmem:[#allocation36_spill] sm:$0xff] %v5795_v18 }
 0x221   :  { %v5789_v29 = vpop.f32.mrb[28].mxu0 }
 0x222   :  { %v5791_v3 = vpop.f32.mrb[29].mxu0  ;;  %v1665_v2 = vmul.f32 %v5785_v59, %v5789_v29 }
 0x223   :  { %v1663_v38 = vmul.f32 %v5787_v46, %v5791_v3  ;;  %v5801_v61 = vpop.f32.mrb[30].mxu0 }
 0x224   :  { %v5803_v27 = vpop.f32.mrb[31].mxu0  ;;  %v1666_v13 = vmul.f32 %v5793_v17, %v5801_v61  ;;  %v1790_v49 = vmul.f32 %v5789_v29, %v1665_v2  ;;  %v1734_v7 = vsel %vm925_vm9, %v1665_v2, 0.0 }
 0x225   :  { %v1730_v1 = vsel %vm925_vm9, %v1663_v38, 0.0  ;;  %v1788_v31 = vmul.f32 %v1663_v38, %v5791_v3  ;;  %v1664_v11 = vmul.f32 %v5795_v18, %v5803_v27 }
 0x226   :  { %v1731_v62 = vadd.f32 %v1730_v1, %v1729_v54  ;;  %v1791_v38 = vmul.f32 %v5801_v61, %v1666_v13  ;;  %v1859_v54 = vsel %vm925_vm9, %v1790_v49, 0.0  ;;  %v1736_v1 = vsel %vm925_vm9, %v1666_v13, 0.0 }
 0x227   :  { %v1855_v12 = vsel %vm925_vm9, %v1788_v31, 0.0  ;;  %v1732_v44 = vsel %vm925_vm9, %v1664_v11, 0.0  ;;  %v1789_v59 = vmul.f32 %v1664_v11, %v5803_v27  ;;  %v4643_v11 = vpop.permute.xlu0 %4642 }
 0x228   :  { %v1856_v46 = vadd.f32 %v1855_v12, %v1854_v25  ;;  %v1733_v28 = vadd.f32 %v1732_v44, %v1731_v62  ;;  %v1861_v39 = vsel %vm925_vm9, %v1791_v38, 0.0  ;;  %v4638_v12 = vpop.permute.xlu1 %4637  ;;  %v5821_v44 = vunpack.i.l.bf16 %v4643_v11 }
 0x229   :  { %v1857_v17 = vsel %vm925_vm9, %v1789_v59, 0.0  ;;  %v5823_v25 = vunpack.i.l.bf16 %v4638_v12 }
 0x22a   :  { %v1735_v35 = vadd.f32 %v1734_v7, %v1733_v28  ;;  %v1858_v51 = vadd.f32 %v1857_v17, %v1856_v46  ;;  %8241 = vst [vmem:[#allocation37_spill] sm:$0xff] %v5821_v44  ;;  %v5829_v7 = vunpack.i.h.bf16 %v4643_v11  ;;  %v5831_v28 = vunpack.i.h.bf16 %v4638_v12 }
 0x22b   :  { %8242 = vst [vmem:[#allocation38_spill] sm:$0xff] %v5823_v25 }
 0x22c   :  { %v1860_v18 = vadd.f32 %v1859_v54, %v1858_v51  ;;  %v1737_v31 = vadd.f32 %v1736_v1, %v1735_v35  ;;  %8243 = vst [vmem:[#allocation39_spill] sm:$0xff] %v5829_v7  ;;  %8244 = vst [vmem:[#allocation40_spill] sm:$0xff] %v5831_v28 }
 0x22e   :  { %v1862_v32 = vadd.f32 %v1861_v39, %v1860_v18 }
 0x239   :  { %v5825_v2 = vpop.f32.mrb[32].mxu0 }
 0x23a   :  { %v5827_v59 = vpop.f32.mrb[33].mxu0  ;;  %v1669_v51 = vmul.f32 %v5821_v44, %v5825_v2 }
 0x23b   :  { %v1667_v35 = vmul.f32 %v5823_v25, %v5827_v59  ;;  %v5837_v39 = vpop.f32.mrb[34].mxu0 }
 0x23c   :  { %v5839_v49 = vpop.f32.mrb[35].mxu0  ;;  %v1670_v18 = vmul.f32 %v5829_v7, %v5837_v39  ;;  %v1794_v38 = vmul.f32 %v5825_v2, %v1669_v51  ;;  %v1742_v25 = vsel %vm925_vm9, %v1669_v51, 0.0 }
 0x23d   :  { %v1738_v46 = vsel %vm925_vm9, %v1667_v35, 0.0  ;;  %v1792_v17 = vmul.f32 %v1667_v35, %v5827_v59  ;;  %v1668_v13 = vmul.f32 %v5831_v28, %v5839_v49 }
 0x23e   :  { %v1739_v62 = vadd.f32 %v1738_v46, %v1737_v31  ;;  %v1795_v35 = vmul.f32 %v5837_v39, %v1670_v18  ;;  %v1867_v31 = vsel %vm925_vm9, %v1794_v38, 0.0  ;;  %v1744_v46 = vsel %vm925_vm9, %v1670_v18, 0.0 }
 0x23f   :  { %v1863_v54 = vsel %vm925_vm9, %v1792_v17, 0.0  ;;  %v1740_v1 = vsel %vm925_vm9, %v1668_v13, 0.0  ;;  %v1793_v11 = vmul.f32 %v1668_v13, %v5839_v49  ;;  %v4653_v13 = vpop.permute.xlu0 %4652 }
 0x240   :  { %v1864_v12 = vadd.f32 %v1863_v54, %v1862_v32  ;;  %v1741_v44 = vadd.f32 %v1740_v1, %v1739_v62  ;;  %v1869_v19 = vsel %vm925_vm9, %v1795_v35, 0.0  ;;  %v4648_v32 = vpop.permute.xlu1 %4647  ;;  %v5857_v62 = vunpack.i.l.bf16 %v4653_v13 }
 0x241   :  { %v1865_v7 = vsel %vm925_vm9, %v1793_v11, 0.0  ;;  %v5859_v51 = vunpack.i.l.bf16 %v4648_v32 }
 0x242   :  { %v1743_v50 = vadd.f32 %v1742_v25, %v1741_v44  ;;  %v1866_v24 = vadd.f32 %v1865_v7, %v1864_v12  ;;  %8245 = vst [vmem:[#allocation41_spill] sm:$0xff] %v5857_v62  ;;  %v5865_v44 = vunpack.i.h.bf16 %v4653_v13  ;;  %v5867_v25 = vunpack.i.h.bf16 %v4648_v32 }
 0x243   :  { %8246 = vst [vmem:[#allocation42_spill] sm:$0xff] %v5859_v51 }
 0x244   :  { %v1868_v28 = vadd.f32 %v1867_v31, %v1866_v24  ;;  %v1745_v17 = vadd.f32 %v1744_v46, %v1743_v50  ;;  %8247 = vst [vmem:[#allocation43_spill] sm:$0xff] %v5865_v44  ;;  %8248 = vst [vmem:[#allocation44_spill] sm:$0xff] %v5867_v25 }
 0x246   :  { %v1870_v55 = vadd.f32 %v1869_v19, %v1868_v28 }
 0x251   :  { %v5861_v54 = vpop.f32.mrb[36].mxu0 }
 0x252   :  { %v5863_v1 = vpop.f32.mrb[37].mxu0  ;;  %v1673_v24 = vmul.f32 %v5857_v62, %v5861_v54 }
 0x253   :  { %v1671_v50 = vmul.f32 %v5859_v51, %v5863_v1  ;;  %v5873_v19 = vpop.f32.mrb[38].mxu0 }
 0x254   :  { %v5875_v7 = vpop.f32.mrb[39].mxu0  ;;  %v1674_v38 = vmul.f32 %v5865_v44, %v5873_v19  ;;  %v1798_v35 = vmul.f32 %v5861_v54, %v1673_v24  ;;  %v1750_v33 = vsel %vm925_vm9, %v1673_v24, 0.0 }
 0x255   :  { %v1746_v28 = vsel %vm925_vm9, %v1671_v50, 0.0  ;;  %v1796_v18 = vmul.f32 %v1671_v50, %v5863_v1  ;;  %v1672_v11 = vmul.f32 %v5867_v25, %v5875_v7 }
 0x256   :  { %v1747_v12 = vadd.f32 %v1746_v28, %v1745_v17  ;;  %v1799_v50 = vmul.f32 %v5873_v19, %v1674_v38  ;;  %v1875_v17 = vsel %vm925_vm9, %v1798_v35, 0.0  ;;  %v1752_v28 = vsel %vm925_vm9, %v1674_v38, 0.0 }
 0x257   :  { %v1871_v31 = vsel %vm925_vm9, %v1796_v18, 0.0  ;;  %v1748_v46 = vsel %vm925_vm9, %v1672_v11, 0.0  ;;  %v1797_v13 = vmul.f32 %v1672_v11, %v5875_v7  ;;  %v1934_v38 = vlaneseq }
 0x258   :  { %v1872_v32 = vadd.f32 %v1871_v31, %v1870_v55  ;;  %v1749_v62 = vadd.f32 %v1748_v46, %v1747_v12  ;;  %v1877_v52 = vsel %vm925_vm9, %v1799_v50, 0.0 }
 0x259   :  { %v1873_v44 = vsel %vm925_vm9, %v1797_v13, 0.0 }
 0x25a   :  { %v1751_v45 = vadd.f32 %v1750_v33, %v1749_v62  ;;  %v1874_v20 = vadd.f32 %v1873_v44, %v1872_v32 }
 0x25c   :  { %v1753_v48 = vadd.f32 %v1752_v28, %v1751_v45  ;;  %v1876_v18 = vadd.f32 %v1875_v17, %v1874_v20 }
 0x25e   :  { %v1754_v37 = vrot.slane %v1753_v48, 4  ;;  %v1878_v11 = vadd.f32 %v1877_v52, %v1876_v18 }
 0x260   :  { %v1755_v55 = vadd.f32 %v1754_v37, %v1753_v48  ;;  %v1879_v12 = vrot.slane %v1878_v11, 4 }
 0x262   :  { %v1756_v31 = vrot.slane %v1755_v55, 2  ;;  %v1880_v24 = vadd.f32 %v1879_v12, %v1878_v11  ;;  %v5977_v11 = vshrl.u32 %v1934_v38, 7 }
 0x264   :  { %v1757_v46 = vadd.f32 %v1756_v31, %v1755_v55  ;;  %v1881_v25 = vrot.slane %v1880_v24, 2  ;;  %8249 = vst [vmem:[#allocation45_spill] sm:$0xff] %v5977_v11 }
 0x266   :  { %v1758_v51 = vrot.slane %v1757_v46, 1  ;;  %v1882_v13 = vadd.f32 %v1881_v25, %v1880_v24 }
 0x268   :  { %v1759_v33 = vadd.f32 %v1758_v51, %v1757_v46  ;;  %v1883_v62 = vrot.slane %v1882_v13, 1 }
 0x26a   :  { %v1884_v44 = vadd.f32 %v1883_v62, %v1882_v13  ;;  %v5893_v35 = vmul.f32 0.0078125, %v1759_v33 }
 0x26c   :  { %v1886_v45 = vmul.f32 0.0078125, %v1884_v44  ;;  %v1887_v20 = vmul.f32 %v5893_v35, %v5893_v35  ;;  %v1926_v48 = vsub.f32 %v5863_v1, %v5893_v35  ;;  %v1927_v37 = vsub.f32 %v5875_v7, %v5893_v35 }
 0x26d   :  { %v1890_v52 = vsub.f32 %v5511_v5, %v5893_v35  ;;  %v1891_v51 = vsub.f32 %v5515_v57, %v5893_v35  ;;  %v1892_v25 = vsub.f32 %v5509_v43, %v5893_v35  ;;  %v1893_v32 = vsub.f32 %v5513_v53, %v5893_v35 }
 0x26e   :  { %v1888_v50 = vsub.f32 %v1886_v45, %v1887_v20  ;;  %v1894_v17 = vsub.f32 %v5557_v60, %v5893_v35  ;;  %v1895_v1 = vsub.f32 %v5565_v56, %v5893_v35  ;;  %v1896_v7 = vsub.f32 %v5555_v63, %v5893_v35 }
 0x26f   :  { %v1897_v5 = vsub.f32 %v5563_v0, %v5893_v35  ;;  %v1898_v57 = vsub.f32 %v5593_v40, %v5893_v35  ;;  %v1899_v43 = vsub.f32 %v5601_v14, %v5893_v35  ;;  %v1900_v53 = vsub.f32 %v5591_v15, %v5893_v35 }
 0x270   :  { %v1889_v28 = vmax.f32 %v1888_v50, 0.0  ;;  %v1901_v60 = vsub.f32 %v5599_v36, %v5893_v35  ;;  %v1902_v56 = vsub.f32 %v5629_v23, %v5893_v35  ;;  %v1903_v63 = vsub.f32 %v5637_v22, %v5893_v35 }
 0x271   :  { %v1904_v0 = vsub.f32 %v5627_v9, %v5893_v35  ;;  %v1905_v40 = vsub.f32 %v5635_v21, %v5893_v35  ;;  %v1906_v14 = vsub.f32 %v5665_v16, %v5893_v35  ;;  %v1907_v15 = vsub.f32 %v5673_v26, %v5893_v35 }
 0x272   :  { %v1930_v18 = vadd.f32 1e-05, %v1889_v28  ;;  %v1908_v36 = vsub.f32 %v5663_v6, %v5893_v35  ;;  %v1909_v23 = vsub.f32 %v5671_v47, %v5893_v35  ;;  %v1910_v22 = vsub.f32 %v5701_v42, %v5893_v35 }
 0x273   :  { %v1911_v9 = vsub.f32 %v5709_v34, %v5893_v35  ;;  %v1912_v21 = vsub.f32 %v5699_v4, %v5893_v35  ;;  %v1913_v16 = vsub.f32 %v5707_v8, %v5893_v35  ;;  %v1914_v26 = vsub.f32 %v5737_v58, %v5893_v35 }
 0x274   :  { %4713 = vrsqrt.f32 %v1930_v18  ;;  %v1915_v6 = vsub.f32 %v5755_v30, %v5893_v35  ;;  %v1916_v47 = vsub.f32 %v5735_v41, %v5893_v35  ;;  %v1917_v42 = vsub.f32 %v5743_v10, %v5893_v35  ;;  %v8252_v18 = vld [vmem:[#allocation42_spill] sm:$0xff] }
 0x275   :  { %v1918_v34 = vsub.f32 %v5791_v3, %v5893_v35  ;;  %v1919_v4 = vsub.f32 %v5803_v27, %v5893_v35  ;;  %v1920_v8 = vsub.f32 %v5789_v29, %v5893_v35  ;;  %v1921_v58 = vsub.f32 %v5801_v61, %v5893_v35  ;;  %v1433_v61 = vld [vmem:[%s8060_s3] sm:$0x1]  ;;  %s4755_s3 = smov 96  }
 0x276   :  { %v1922_v30 = vsub.f32 %v5827_v59, %v5893_v35  ;;  %v1923_v41 = vsub.f32 %v5839_v49, %v5893_v35  ;;  %v1924_v10 = vsub.f32 %v5825_v2, %v5893_v35  ;;  %v1925_v3 = vsub.f32 %v5837_v39, %v5893_v35  ;;  %v5988_v39 = vld [vmem:[%s8061_s4] ss:$0 sm:$0xff]  ;;  %s4756_s4 = smov 80  }
 0x277   :  { %v1928_v27 = vsub.f32 %v5861_v54, %v5893_v35  ;;  %v1929_v29 = vsub.f32 %v5873_v19, %v5893_v35  ;;  %v8151_v59 = vsub.s32 0, %v5977_v11 }
 0x27e   :  { %v4714_v49 = vpop.eup %4713 }
 0x27f   :  { %v1932_v55 = vmul.f32 %v4714_v49, %v1433_v61  ;;  %v8253_v49 = vld [vmem:[#allocation44_spill] sm:$0xff] }
 0x281   :  { %v1937_v2 = vrot.slane %v1932_v55, %v8151_v59 }
 0x283   :  { %v1975_v54 = vmul.f32 %v1937_v2, %v1926_v48  ;;  %v1976_v19 = vmul.f32 %v1937_v2, %v1927_v37  ;;  %v1939_v12 = vmul.f32 %v1937_v2, %v1890_v52  ;;  %v1940_v31 = vmul.f32 %v1937_v2, %v1891_v51 }
 0x284   :  { %v1941_v24 = vmul.f32 %v1937_v2, %v1892_v25  ;;  %v1942_v46 = vmul.f32 %v1937_v2, %v1893_v32  ;;  %v1943_v13 = vmul.f32 %v1937_v2, %v1894_v17  ;;  %v1944_v33 = vmul.f32 %v1937_v2, %v1895_v1 }
 0x285   :  { %v5991_v62 = vadd.f32 %v5988_v39, %v1975_v54  ;;  %v5994_v44 = vadd.f32 %v5988_v39, %v1976_v19  ;;  %v1945_v35 = vmul.f32 %v1937_v2, %v1896_v7  ;;  %v1946_v38 = vmul.f32 %v1937_v2, %v1897_v5 }
 0x286   :  { %v1947_v45 = vmul.f32 %v1937_v2, %v1898_v57  ;;  %v1948_v20 = vmul.f32 %v1937_v2, %v1899_v43  ;;  %v1949_v50 = vmul.f32 %v1937_v2, %v1900_v53  ;;  %v1950_v28 = vmul.f32 %v1937_v2, %v1901_v60 }
 0x287   :  { %8250 = vst [vmem:[#allocation46_spill] sm:$0xff] %v5991_v62  ;;  %8251 = vst [vmem:[#allocation47_spill] sm:$0xff] %v5994_v44  ;;  %v2061_v48 = vmax.f32 %v5991_v62, 0.0  ;;  %v2062_v37 = vmax.f32 %v5994_v44, 0.0  ;;  %v1951_v52 = vmul.f32 %v1937_v2, %v1902_v56  ;;  %v1952_v51 = vmul.f32 %v1937_v2, %v1903_v63 }
 0x288   :  { %v1953_v25 = vmul.f32 %v1937_v2, %v1904_v0  ;;  %v1954_v32 = vmul.f32 %v1937_v2, %v1905_v40  ;;  %v1955_v17 = vmul.f32 %v1937_v2, %v1906_v14  ;;  %v1956_v1 = vmul.f32 %v1937_v2, %v1907_v15 }
 0x289   :  { %v2101_v61 = vmul.f32 %v8252_v18, %v2061_v48  ;;  %v2102_v55 = vmul.f32 %v8253_v49, %v2062_v37  ;;  %v1957_v7 = vmul.f32 %v1937_v2, %v1908_v36  ;;  %v1958_v5 = vmul.f32 %v1937_v2, %v1909_v23 }
 0x28a   :  { %v1959_v57 = vmul.f32 %v1937_v2, %v1910_v22  ;;  %v1960_v43 = vmul.f32 %v1937_v2, %v1911_v9  ;;  %v1961_v53 = vmul.f32 %v1937_v2, %v1912_v21  ;;  %v1962_v60 = vmul.f32 %v1937_v2, %v1913_v16 }
 0x28b   :  { %v2127_v54 = vpack.c.bf16 %v2102_v55, %v2101_v61  ;;  %v1963_v19 = vmul.f32 %v1937_v2, %v1914_v26  ;;  %v1964_v59 = vmul.f32 %v1937_v2, %v1915_v6  ;;  %v1965_v11 = vmul.f32 %v1937_v2, %v1916_v47 }
 0x28c   :  { %v1966_v56 = vmul.f32 %v1937_v2, %v1917_v42  ;;  %v1967_v63 = vmul.f32 %v1937_v2, %v1918_v34  ;;  %v1968_v0 = vmul.f32 %v1937_v2, %v1919_v4  ;;  %v1969_v40 = vmul.f32 %v1937_v2, %v1920_v8 }
 0x28d   :  { %2147 = vst.msk [vmem:[#allocation2 + $0xa0] sm:$0xff] %vm774_vm5, %v2127_v54  ;;  %v1970_v14 = vmul.f32 %v1937_v2, %v1921_v58  ;;  %v1971_v15 = vmul.f32 %v1937_v2, %v1922_v30  ;;  %v1972_v48 = vmul.f32 %v1937_v2, %v1923_v41  ;;  %v1973_v37 = vmul.f32 %v1937_v2, %v1924_v10 }
 0x28e   :  { %v1974_v36 = vmul.f32 %v1937_v2, %v1925_v3  ;;  %v1977_v23 = vmul.f32 %v1937_v2, %v1928_v27  ;;  %v1978_v22 = vmul.f32 %v1937_v2, %v1929_v29  ;;  %v6002_v9 = vadd.f32 %v5988_v39, %v1939_v12 }
 0x28f   :  { %v6005_v21 = vadd.f32 %v5988_v39, %v1940_v31  ;;  %v6008_v16 = vadd.f32 %v5988_v39, %v1941_v24  ;;  %v6011_v26 = vadd.f32 %v5988_v39, %v1942_v46  ;;  %v6014_v6 = vadd.f32 %v5988_v39, %v1943_v13 }
 0x290   :  { %8254 = vst [vmem:[#allocation48_spill] sm:$0xff] %v6002_v9  ;;  %v6017_v47 = vadd.f32 %v5988_v39, %v1944_v33  ;;  %v6020_v42 = vadd.f32 %v5988_v39, %v1945_v35  ;;  %v6023_v34 = vadd.f32 %v5988_v39, %v1946_v38  ;;  %v6026_v4 = vadd.f32 %v5988_v39, %v1947_v45 }
 0x291   :  { %8255 = vst [vmem:[#allocation49_spill] sm:$0xff] %v6005_v21  ;;  %8256 = vst [vmem:[#allocation50_spill] sm:$0xff] %v6008_v16  ;;  %v6029_v8 = vadd.f32 %v5988_v39, %v1948_v20  ;;  %v6032_v58 = vadd.f32 %v5988_v39, %v1949_v50  ;;  %v6035_v30 = vadd.f32 %v5988_v39, %v1950_v28  ;;  %v2025_v61 = vmax.f32 %v6002_v9, 0.0 }
 0x292   :  { %8257 = vst [vmem:[#allocation51_spill] sm:$0xff] %v6011_v26  ;;  %8258 = vst [vmem:[#allocation52_spill] sm:$0xff] %v6014_v6  ;;  %v6038_v41 = vadd.f32 %v5988_v39, %v1951_v52  ;;  %v6041_v10 = vadd.f32 %v5988_v39, %v1952_v51  ;;  %v6044_v3 = vadd.f32 %v5988_v39, %v1953_v25  ;;  %v2026_v55 = vmax.f32 %v6005_v21, 0.0 }
 0x293   :  { %8259 = vst [vmem:[#allocation53_spill] sm:$0xff] %v6017_v47  ;;  %8260 = vst [vmem:[#allocation54_spill] sm:$0xff] %v6020_v42  ;;  %v6047_v27 = vadd.f32 %v5988_v39, %v1954_v32  ;;  %v6050_v29 = vadd.f32 %v5988_v39, %v1955_v17  ;;  %v6053_v2 = vadd.f32 %v5988_v39, %v1956_v1  ;;  %v2033_v54 = vmax.f32 %v6026_v4, 0.0 }
 0x294   :  { %8261 = vst [vmem:[#allocation55_spill] sm:$0xff] %v6023_v34  ;;  %8262 = vst [vmem:[#allocation56_spill] sm:$0xff] %v6026_v4  ;;  %v6056_v12 = vadd.f32 %v5988_v39, %v1957_v7  ;;  %v6059_v31 = vadd.f32 %v5988_v39, %v1958_v5  ;;  %v6062_v24 = vadd.f32 %v5988_v39, %v1959_v57  ;;  %v2027_v7 = vmax.f32 %v6008_v16, 0.0  ;;  %v8299_v4 = vld [vmem:[#allocation10_spill] sm:$0xff] }
 0x295   :  { %8263 = vst [vmem:[#allocation57_spill] sm:$0xff] %v6029_v8  ;;  %8264 = vst [vmem:[#allocation58_spill] sm:$0xff] %v6032_v58  ;;  %v6065_v46 = vadd.f32 %v5988_v39, %v1960_v43  ;;  %v6068_v13 = vadd.f32 %v5988_v39, %v1961_v53  ;;  %v6071_v33 = vadd.f32 %v5988_v39, %v1962_v60  ;;  %v2028_v5 = vmax.f32 %v6011_v26, 0.0 }
 0x296   :  { %8265 = vst [vmem:[#allocation59_spill] sm:$0xff] %v6035_v30  ;;  %8266 = vst [vmem:[#allocation60_spill] sm:$0xff] %v6038_v41  ;;  %v6074_v35 = vadd.f32 %v5988_v39, %v1963_v19  ;;  %v6077_v38 = vadd.f32 %v5988_v39, %v1964_v59  ;;  %v6080_v45 = vadd.f32 %v5988_v39, %v1965_v11  ;;  %v2029_v57 = vmax.f32 %v6014_v6, 0.0 }
 0x297   :  { %8267 = vst [vmem:[#allocation61_spill] sm:$0xff] %v6041_v10  ;;  %8268 = vst [vmem:[#allocation62_spill] sm:$0xff] %v6044_v3  ;;  %v6083_v20 = vadd.f32 %v5988_v39, %v1966_v56  ;;  %v6086_v50 = vadd.f32 %v5988_v39, %v1967_v63  ;;  %v6089_v28 = vadd.f32 %v5988_v39, %v1968_v0  ;;  %v2030_v43 = vmax.f32 %v6017_v47, 0.0 }
 0x298   :  { %8269 = vst [vmem:[#allocation63_spill] sm:$0xff] %v6047_v27  ;;  %8270 = vst [vmem:[#allocation64_spill] sm:$0xff] %v6050_v29  ;;  %v6092_v52 = vadd.f32 %v5988_v39, %v1969_v40  ;;  %v6095_v51 = vadd.f32 %v5988_v39, %v1970_v14  ;;  %v6098_v59 = vadd.f32 %v5988_v39, %v1971_v15  ;;  %v2031_v53 = vmax.f32 %v6020_v42, 0.0 }
 0x299   :  { %8271 = vst [vmem:[#allocation65_spill] sm:$0xff] %v6053_v2  ;;  %8272 = vst [vmem:[#allocation66_spill] sm:$0xff] %v6056_v12  ;;  %v6101_v11 = vadd.f32 %v5988_v39, %v1972_v48  ;;  %v6104_v25 = vadd.f32 %v5988_v39, %v1973_v37  ;;  %v6107_v32 = vadd.f32 %v5988_v39, %v1974_v36  ;;  %v2032_v60 = vmax.f32 %v6023_v34, 0.0  ;;  %v8300_v34 = vld [vmem:[#allocation7_spill] sm:$0xff] }
 0x29a   :  { %8273 = vst [vmem:[#allocation67_spill] sm:$0xff] %v6059_v31  ;;  %8274 = vst [vmem:[#allocation68_spill] sm:$0xff] %v6062_v24  ;;  %v6110_v17 = vadd.f32 %v5988_v39, %v1977_v23  ;;  %v6113_v1 = vadd.f32 %v5988_v39, %v1978_v22  ;;  %v2034_v39 = vmax.f32 %v6029_v8, 0.0  ;;  %v2035_v19 = vmax.f32 %v6032_v58, 0.0  ;;  %v8297_v58 = vld [vmem:[#allocation5_spill] sm:$0xff]  ;;  %v8298_v8 = vld [vmem:[#allocation8_spill] sm:$0xff] }
 0x29b   :  { %8275 = vst [vmem:[#allocation69_spill] sm:$0xff] %v6065_v46  ;;  %8276 = vst [vmem:[#allocation70_spill] sm:$0xff] %v6068_v13  ;;  %v2036_v56 = vmax.f32 %v6035_v30, 0.0  ;;  %v2037_v63 = vmax.f32 %v6038_v41, 0.0  ;;  %v2038_v0 = vmax.f32 %v6041_v10, 0.0  ;;  %v2039_v40 = vmax.f32 %v6044_v3, 0.0 }
 0x29c   :  { %8277 = vst [vmem:[#allocation71_spill] sm:$0xff] %v6071_v33  ;;  %8278 = vst [vmem:[#allocation72_spill] sm:$0xff] %v6074_v35  ;;  %v2040_v14 = vmax.f32 %v6047_v27, 0.0  ;;  %v2041_v15 = vmax.f32 %v6050_v29, 0.0  ;;  %v2042_v48 = vmax.f32 %v6053_v2, 0.0  ;;  %v2043_v37 = vmax.f32 %v6056_v12, 0.0 }
 0x29d   :  { %8279 = vst [vmem:[#allocation73_spill] sm:$0xff] %v6077_v38  ;;  %8280 = vst [vmem:[#allocation74_spill] sm:$0xff] %v6080_v45  ;;  %v2044_v36 = vmax.f32 %v6059_v31, 0.0  ;;  %v2045_v23 = vmax.f32 %v6062_v24, 0.0  ;;  %v2046_v22 = vmax.f32 %v6065_v46, 0.0  ;;  %v2047_v49 = vmax.f32 %v6068_v13, 0.0 }
 0x29e   :  { %8281 = vst [vmem:[#allocation75_spill] sm:$0xff] %v6083_v20  ;;  %8282 = vst [vmem:[#allocation76_spill] sm:$0xff] %v6086_v50  ;;  %v2048_v18 = vmax.f32 %v6071_v33, 0.0  ;;  %v2049_v44 = vmax.f32 %v6074_v35, 0.0  ;;  %v2050_v62 = vmax.f32 %v6077_v38, 0.0  ;;  %v2051_v29 = vmax.f32 %v6080_v45, 0.0 }
 0x29f   :  { %8283 = vst [vmem:[#allocation77_spill] sm:$0xff] %v6089_v28  ;;  %8284 = vst [vmem:[#allocation78_spill] sm:$0xff] %v6092_v52  ;;  %v2052_v2 = vmax.f32 %v6083_v20, 0.0  ;;  %v2053_v12 = vmax.f32 %v6086_v50, 0.0  ;;  %v2054_v31 = vmax.f32 %v6089_v28, 0.0  ;;  %v2055_v24 = vmax.f32 %v6092_v52, 0.0 }
 0x2a0   :  { %8285 = vst [vmem:[#allocation79_spill] sm:$0xff] %v6095_v51  ;;  %8286 = vst [vmem:[#allocation80_spill] sm:$0xff] %v6098_v59  ;;  %v2056_v46 = vmax.f32 %v6095_v51, 0.0  ;;  %v2057_v13 = vmax.f32 %v6098_v59, 0.0  ;;  %v2058_v33 = vmax.f32 %v6101_v11, 0.0  ;;  %v2059_v35 = vmax.f32 %v6104_v25, 0.0 }
 0x2a1   :  { %8287 = vst [vmem:[#allocation81_spill] sm:$0xff] %v6101_v11  ;;  %8288 = vst [vmem:[#allocation82_spill] sm:$0xff] %v6104_v25  ;;  %v2060_v38 = vmax.f32 %v6107_v32, 0.0  ;;  %v2063_v45 = vmax.f32 %v6110_v17, 0.0  ;;  %v2064_v20 = vmax.f32 %v6113_v1, 0.0  ;;  %v8292_v27 = vld [vmem:[#allocation16_spill] sm:$0xff]  ;;  %v2068_v11 = vmul.f32 %v8297_v58, %v2028_v5 }
 0x2a2   :  { %8289 = vst [vmem:[#allocation83_spill] sm:$0xff] %v6107_v32  ;;  %8290 = vst [vmem:[#allocation84_spill] sm:$0xff] %v6110_v17  ;;  %v2077_v50 = vmul.f32 %v8292_v27, %v2037_v63  ;;  %v8293_v3 = vld [vmem:[#allocation18_spill] sm:$0xff]  ;;  %v8294_v10 = vld [vmem:[#allocation4_spill] sm:$0xff]  ;;  %v2069_v25 = vmul.f32 %v8298_v8, %v2029_v57  ;;  %v2070_v32 = vmul.f32 %v8299_v4, %v2030_v43 }
 0x2a3   :  { %8291 = vst [vmem:[#allocation85_spill] sm:$0xff] %v6113_v1  ;;  %v2078_v28 = vmul.f32 %v8293_v3, %v2038_v0  ;;  %v2065_v52 = vmul.f32 %v8294_v10, %v2025_v61  ;;  %v8295_v41 = vld [vmem:[#allocation3_spill] sm:$0xff]  ;;  %v8296_v30 = vld [vmem:[#allocation6_spill] sm:$0xff]  ;;  %v2071_v17 = vmul.f32 %v8300_v34, %v2031_v53  ;;  %v8301_v1 = vld [vmem:[#allocation9_spill] sm:$0xff] }
 0x2a4   :  { %v2066_v51 = vmul.f32 %v8295_v41, %v2026_v55  ;;  %v2067_v59 = vmul.f32 %v8296_v30, %v2027_v7  ;;  %v2072_v47 = vmul.f32 %v8301_v1, %v2032_v60  ;;  %v8302_v63 = vld [vmem:[#allocation12_spill] sm:$0xff]  ;;  %v8303_v0 = vld [vmem:[#allocation14_spill] sm:$0xff]  ;;  %v8304_v61 = vld [vmem:[#allocation11_spill] sm:$0xff] }
 0x2a5   :  { %v2115_v42 = vpack.c.bf16 %v2078_v28, %v2077_v50  ;;  %v2073_v27 = vmul.f32 %v8302_v63, %v2033_v54  ;;  %v2074_v3 = vmul.f32 %v8303_v0, %v2034_v39  ;;  %v2075_v10 = vmul.f32 %v8304_v61, %v2035_v19  ;;  %v8305_v55 = vld [vmem:[#allocation13_spill] sm:$0xff]  ;;  %v8306_v7 = vld [vmem:[#allocation15_spill] sm:$0xff]  ;;  %v8308_v57 = vld [vmem:[#allocation20_spill] sm:$0xff] }
 0x2a6   :  { %v2076_v41 = vmul.f32 %v8305_v55, %v2036_v56  ;;  %v2079_v30 = vmul.f32 %v8306_v7, %v2039_v40  ;;  %v8307_v5 = vld [vmem:[#allocation17_spill] sm:$0xff]  ;;  %v2081_v43 = vmul.f32 %v8308_v57, %v2041_v15  ;;  %v8309_v53 = vld [vmem:[#allocation22_spill] sm:$0xff]  ;;  %v8310_v28 = vld [vmem:[#allocation19_spill] sm:$0xff] }
 0x2a7   :  { %v2080_v58 = vmul.f32 %v8307_v5, %v2040_v14  ;;  %2135 = vst.msk [vmem:[#allocation2 + $0x40] sm:$0xff] %vm774_vm5, %v2115_v42  ;;  %v2082_v50 = vmul.f32 %v8309_v53, %v2042_v48  ;;  %v2083_v60 = vmul.f32 %v8310_v28, %v2043_v37  ;;  %v8311_v1 = vld [vmem:[#allocation21_spill] sm:$0xff]  ;;  %v8312_v63 = vld [vmem:[#allocation24_spill] sm:$0xff]  ;;  %v8313_v0 = vld [vmem:[#allocation26_spill] sm:$0xff] }
 0x2a8   :  { %v2084_v54 = vmul.f32 %v8311_v1, %v2044_v36  ;;  %v2085_v39 = vmul.f32 %v8312_v63, %v2045_v23  ;;  %v2086_v19 = vmul.f32 %v8313_v0, %v2046_v22  ;;  %v8314_v61 = vld [vmem:[#allocation23_spill] sm:$0xff]  ;;  %v8315_v55 = vld [vmem:[#allocation25_spill] sm:$0xff]  ;;  %v8316_v7 = vld [vmem:[#allocation28_spill] sm:$0xff] }
 0x2a9   :  { %v2087_v56 = vmul.f32 %v8314_v61, %v2047_v49  ;;  %v2088_v40 = vmul.f32 %v8315_v55, %v2048_v18  ;;  %v2089_v14 = vmul.f32 %v8316_v7, %v2049_v44  ;;  %v8317_v5 = vld [vmem:[#allocation30_spill] sm:$0xff]  ;;  %v8318_v34 = vld [vmem:[#allocation27_spill] sm:$0xff]  ;;  %v8319_v57 = vld [vmem:[#allocation29_spill] sm:$0xff] }
 0x2aa   :  { %v2090_v42 = vmul.f32 %v8317_v5, %v2050_v62  ;;  %v2091_v15 = vmul.f32 %v8318_v34, %v2051_v29  ;;  %v2092_v48 = vmul.f32 %v8319_v57, %v2052_v2  ;;  %v8320_v53 = vld [vmem:[#allocation34_spill] sm:$0xff]  ;;  %v8321_v28 = vld [vmem:[#allocation36_spill] sm:$0xff]  ;;  %v8322_v1 = vld [vmem:[#allocation33_spill] sm:$0xff]  ;;  %v2114_v57 = vpack.c.bf16 %v2076_v41, %v2075_v10 }
 0x2ab   :  { %v2093_v37 = vmul.f32 %v8320_v53, %v2053_v12  ;;  %v2094_v36 = vmul.f32 %v8321_v28, %v2054_v31  ;;  %v2095_v23 = vmul.f32 %v8322_v1, %v2055_v24  ;;  %v8323_v63 = vld [vmem:[#allocation35_spill] sm:$0xff]  ;;  %v8324_v0 = vld [vmem:[#allocation38_spill] sm:$0xff]  ;;  %v8325_v61 = vld [vmem:[#allocation40_spill] sm:$0xff]  ;;  %v2109_v12 = vpack.c.bf16 %v2066_v51, %v2065_v52 }
 0x2ac   :  { %v2096_v22 = vmul.f32 %v8323_v63, %v2056_v46  ;;  %v2097_v49 = vmul.f32 %v8324_v0, %v2057_v13  ;;  %v2098_v18 = vmul.f32 %v8325_v61, %v2058_v33  ;;  %v8326_v55 = vld [vmem:[#allocation37_spill] sm:$0xff]  ;;  %v8327_v7 = vld [vmem:[#allocation39_spill] sm:$0xff]  ;;  %v2110_v53 = vpack.c.bf16 %v2068_v11, %v2067_v59  ;;  %2134 = vst.msk [vmem:[#allocation2 + $0x38] sm:$0xff] %vm774_vm5, %v2114_v57 }
 0x2ad   :  { %v2099_v44 = vmul.f32 %v8326_v55, %v2059_v35  ;;  %v2100_v62 = vmul.f32 %v8327_v7, %v2060_v38  ;;  %v8328_v5 = vld [vmem:[#allocation41_spill] sm:$0xff]  ;;  %v8329_v34 = vld [vmem:[#allocation43_spill] sm:$0xff]  ;;  %v2111_v31 = vpack.c.bf16 %v2070_v32, %v2069_v25  ;;  %v2112_v28 = vpack.c.bf16 %v2072_v47, %v2071_v17  ;;  %2129 = vst.msk [vmem:[#allocation2 + $0x10] sm:$0xff] %vm774_vm5, %v2109_v12 }
 0x2ae   :  { %v2103_v29 = vmul.f32 %v8328_v5, %v2063_v45  ;;  %v2104_v2 = vmul.f32 %v8329_v34, %v2064_v20  ;;  %v2113_v24 = vpack.c.bf16 %v2074_v3, %v2073_v27  ;;  %v6192_v1 = vld [vmem:[#allocation2 + $0x40] sm:$0xff]  ;;  %v2116_v46 = vpack.c.bf16 %v2080_v58, %v2079_v30  ;;  %2130 = vst.msk [vmem:[#allocation2 + $0x18] sm:$0xff] %vm774_vm5, %v2110_v53 }
 0x2af   :  { %v2117_v13 = vpack.c.bf16 %v2082_v50, %v2081_v43  ;;  %v2118_v33 = vpack.c.bf16 %v2084_v54, %v2083_v60  ;;  %v2119_v35 = vpack.c.bf16 %v2086_v19, %v2085_v39  ;;  %2500 = vrot.lane.b32.xlu0 %v6192_v1, %s4754_s20  ;;  %v2120_v38 = vpack.c.bf16 %v2088_v40, %v2087_v56 }
 0x2b0   :  { %v2121_v41 = vpack.c.bf16 %v2090_v42, %v2089_v14  ;;  %v2122_v10 = vpack.c.bf16 %v2092_v48, %v2091_v15  ;;  %v2123_v45 = vpack.c.bf16 %v2094_v36, %v2093_v37  ;;  %2131 = vst.msk [vmem:[#allocation2 + $0x20] sm:$0xff] %vm774_vm5, %v2111_v31  ;;  %2132 = vst.msk [vmem:[#allocation2 + $0x28] sm:$0xff] %vm774_vm5, %v2112_v28  ;;  %v2414_v51 = vrot.slane %v6192_v1, 1 }
 0x2b1   :  { %2133 = vst.msk [vmem:[#allocation2 + $0x30] sm:$0xff] %vm774_vm5, %v2113_v24  ;;  %v2124_v47 = vpack.c.bf16 %v2096_v22, %v2095_v23  ;;  %v2125_v58 = vpack.c.bf16 %v2098_v18, %v2097_v49  ;;  %v2126_v30 = vpack.c.bf16 %v2100_v62, %v2099_v44  ;;  %v2128_v3 = vpack.c.bf16 %v2104_v2, %v2103_v29 }
 0x2b2   :  { %2136 = vst.msk [vmem:[#allocation2 + $0x48] sm:$0xff] %vm774_vm5, %v2116_v46  ;;  %2137 = vst.msk [vmem:[#allocation2 + $0x50] sm:$0xff] %vm774_vm5, %v2117_v13 }
 0x2b3   :  { %2138 = vst.msk [vmem:[#allocation2 + $0x58] sm:$0xff] %vm774_vm5, %v2118_v33  ;;  %2139 = vst.msk [vmem:[#allocation2 + $0x60] sm:$0xff] %vm774_vm5, %v2119_v35  ;;  %v6214_v27 = vld [vmem:[#allocation2 + $0x38] sm:$0xff] }
 0x2b4   :  { %2140 = vst.msk [vmem:[#allocation2 + $0x68] sm:$0xff] %vm774_vm5, %v2120_v38  ;;  %2141 = vst.msk [vmem:[#allocation2 + $0x70] sm:$0xff] %vm774_vm5, %v2121_v41  ;;  %2498 = vrot.lane.b32.xlu1 %v6214_v27, %s4754_s20  ;;  %v6253_v54 = vld [vmem:[#allocation2 + $0x10] sm:$0xff]  ;;  %v2412_v24 = vrot.slane %v6214_v27, 1 }
 0x2b5   :  { %2142 = vst.msk [vmem:[#allocation2 + $0x78] sm:$0xff] %vm774_vm5, %v2122_v10  ;;  %2143 = vst.msk [vmem:[#allocation2 + $0x80] sm:$0xff] %vm774_vm5, %v2123_v45  ;;  %v6218_v20 = vld [vmem:[#allocation2 + $0x18] sm:$0xff]  ;;  %v2174_v44 = vld [vmem:[#allocation2 + $0x10] sm:$0x80]  ;;  %v2402_v45 = vrot.slane %v6253_v54, 1 }
 0x2b6   :  { %2144 = vst.msk [vmem:[#allocation2 + $0x88] sm:$0xff] %vm774_vm5, %v2124_v47  ;;  %2145 = vst.msk [vmem:[#allocation2 + $0x90] sm:$0xff] %vm774_vm5, %v2125_v58  ;;  %v6226_v11 = vrot.slane %v6218_v20, 1  ;;  %v6321_v13 = vsel %vm2400_vm12, %v2412_v24, %v2414_v51 }
 0x2b7   :  { %2146 = vst.msk [vmem:[#allocation2 + $0x98] sm:$0xff] %vm774_vm5, %v2126_v30  ;;  %2148 = vst.msk [vmem:[#allocation2 + $0xa8] sm:$0xff] %vm774_vm5, %v2128_v3  ;;  %v6220_v52 = vld [vmem:[#allocation2 + $0x20] sm:$0xff]  ;;  %v6297_v2 = vld [vmem:[#allocation2 + $0x28] sm:$0xff]  ;;  %v3118_v33 = vshrl.u32 %v6321_v13, 16 }
 0x2b8   :  { %v2406_v25 = vrot.slane %v6220_v52, 1  ;;  %2639 = vrot.lane.b32.xlu1 %v6192_v1, %s4755_s3  ;;  %v3054_v53 = vshrl.u32 %v6226_v11, 16  ;;  %v6309_v31 = vld [vmem:[#allocation2 + $0x30] sm:$0xff]  ;;  %8330 = vst [vmem:[#allocation86_spill] sm:$0xff] %v6321_v13  ;;  %v8333_v30 = vld [vmem:[#allocation31_spill] sm:$0xff] }
 0x2b9   :  { %v6223_v59 = vld [vmem:[#allocation2 + $0x48] sm:$0xff]  ;;  %v6229_v32 = vld [vmem:[#allocation2 + $0x50] sm:$0xff]  ;;  %v6334_v38 = vrot.slane %v3118_v33, 7  ;;  %v2410_v47 = vrot.slane %v6309_v31, 1  ;;  %v8334_v3 = vrot.slane %v8333_v30, 1  ;;  %v4708_v33 = vld [vmem:[%s8062_s2 + $0x20] sm:$0xff]  }
 0x2ba   :  { %2641 = vrot.lane.b32.xlu0 %v6223_v59, %s4755_s3  ;;  %v2416_v17 = vrot.slane %v6223_v59, 1  ;;  %v2418_v57 = vrot.slane %v6229_v32, 1  ;;  %v6239_v43 = vsel %vm2400_vm12, %v6226_v11, %v2406_v25  ;;  %v3056_v37 = vrot.slane %v3054_v53, 7  ;;  %v6283_v62 = vld [vmem:[#allocation2 + $0x58] sm:$0xff]  ;;  %v6293_v29 = vld [vmem:[#allocation2 + $0x60] sm:$0xff] }
 0x2bb   :  { %v3058_v50 = vshrl.u32 %v6239_v43, 16  ;;  %v3061_v40 = vshll.u32 %v6239_v43, 16  ;;  %v6305_v12 = vld [vmem:[#allocation2 + $0x68] sm:$0xff]  ;;  %v6318_v46 = vld [vmem:[#allocation2 + $0x70] sm:$0xff]  ;;  %8331 = vst [vmem:[#allocation87_spill] sm:$0xff] %v6334_v38  ;;  %v6352_v58 = vsel %vm2400_vm12, %v2410_v47, %v2412_v24  ;;  %v2420_v53 = vrot.slane %v6283_v62, 1 }
 0x2bc   :  { %v6246_v28 = vsel %vm2400_vm12, %v2414_v51, %v2416_v17  ;;  %v6251_v60 = vsel %vm2400_vm12, %v2416_v17, %v2418_v57  ;;  %2502 = vrot.lane.b32.xlu1 %v6223_v59, %s4754_s20  ;;  %v6328_v35 = vld [vmem:[#allocation2 + $0x78] sm:$0xff]  ;;  %v6342_v10 = vld [vmem:[#allocation2 + $0x80] sm:$0xff]  ;;  %v2403_v51 = vsel %vm2400_vm12, %v8334_v3, %v2402_v45  ;;  %v2405_v17 = vsel %vm2400_vm12, %v2402_v45, %v6226_v11  ;;  %v6470_v3 = vld [vmem:[#allocation2 + $0x8] sm:$0xff] }
 0x2bd   :  { %v3133_v39 = vshrl.u32 %v6246_v28, 16  ;;  %v3148_v19 = vshrl.u32 %v6251_v60, 16  ;;  %v6259_v56 = vrot.slane %v3058_v50, 7  ;;  %v3136_v42 = vshll.u32 %v6246_v28, 16 }
 0x2be   :  { %2488 = vrot.lane.b32.xlu0 %v6253_v54, %s4754_s20  ;;  %v3151_v48 = vshll.u32 %v6251_v60, 16  ;;  %v6380_v50 = vsel %vm2400_vm12, %v2418_v57, %v2420_v53  ;;  %v2408_v11 = vrot.slane %v6297_v2, 1  ;;  %v2226_v24 = vshll.u32 %v6214_v27, 16 }
 0x2bf   :  { %v3135_v14 = vrot.slane %v3133_v39, 7  ;;  %v6263_v15 = vrot.slane %v3148_v19, 7  ;;  %v3063_v36 = vor.u32 %v3061_v40, %v6259_v56  ;;  %v4704_v39 = vld [vmem:[%s8062_s2] sm:$0xff]   ;;  %v4705_v19 = vld [vmem:[%s8062_s2 + $0x8] sm:$0xff]   ;;  %v2234_v30 = vshll.u32 %v6192_v1, 16 }
 0x2c0   :  { %2629 = vrot.lane.b32.xlu1 %v6218_v20, %s4755_s3  ;;  %4530 = vmatpush1.bf16.msra.mxu1 %v4704_v39  ;;  %v6415_v40 = vsel %vm2400_vm12, %v2408_v11, %v2410_v47  ;;  %v2186_v47 = vshll.u32 %v6253_v54, 16  ;;  %v2242_v34 = vshll.u32 %v6223_v59, 16  ;;  %v2254_v0 = vshrl.u32 %v6229_v32, 16 }
 0x2c1   :  { %v3138_v23 = vor.u32 %v3136_v42, %v3135_v14  ;;  %v3153_v22 = vor.u32 %v3151_v48, %v6263_v15  ;;  %v3064_v49 = vsel %vm3042_vm13, %v3056_v37, %v3063_v36  ;;  %3485 = vmatpush1.bf16.msra.mxu0 %v4704_v39  ;;  %v4706_v42 = vld [vmem:[%s8062_s2 + $0x10] sm:$0xff]   ;;  %v2426_v48 = vrot.slane %v6318_v46, 1  ;;  %v4707_v37 = vld [vmem:[%s8062_s2 + $0x18] sm:$0xff]  }
 0x2c2   :  { %2643 = vrot.lane.b32.xlu0 %v6229_v32, %s4755_s3  ;;  %4431 = vmatprep.mubr.msk.bf16.mxu0 %vm774_vm5, %v3064_v49  ;;  %v2428_v36 = vrot.slane %v6328_v35, 1  ;;  %v2218_v39 = vshll.u32 %v6309_v31, 16  ;;  %v2244_v7 = vrot.slane %v2242_v34, 1  ;;  %v2250_v34 = vshll.u32 %v6229_v32, 16 }
 0x2c3   :  { %v3154_v18 = vsel %vm3042_vm13, %v3135_v14, %v3153_v22  ;;  %v6340_v41 = vsel %vm3042_vm13, %v6334_v38, %v3138_v23  ;;  %v6443_v23 = vpop.permute.xlu1 %2337  ;;  %v2258_v63 = vshll.u32 %v6283_v62, 16 }
 0x2c4   :  { %4437 = vmatprep.mubr.msk.bf16.mxu1 %vm774_vm5, %v3154_v18  ;;  %2504 = vrot.lane.b32.xlu1 %v6229_v32, %s4754_s20  ;;  %8332 = vst [vmem:[#allocation88_spill] sm:$0xff] %v6340_v41  ;;  %v6452_v49 = vsel %vm2400_vm12, %v2426_v48, %v2428_v36  ;;  %v6455_v18 = vpop.permute.xlu0 %2442 }
 0x2c5   :  { %8337 = vst [vmem:[#allocation89_spill] sm:$0xff] %v6452_v49  ;;  %v2260_v8 = vrot.slane %v2258_v63, 1  ;;  %v2210_v63 = vshll.u32 %v6297_v2, 16 }
 0x2c6   :  { %2627 = vrot.lane.b32.xlu0 %v2174_v44, %s4755_s3  ;;  %v8188_v44 = vrot.slane %v6342_v10, 1 }
 0x2c7   :  { %v2212_v26 = vrot.slane %v2210_v63, 1 }
 0x2c8   :  { %2645 = vrot.lane.b32.xlu1 %v6283_v62, %s4755_s3 }
 0x2ca   :  { %2490 = vrot.lane.b32.xlu0 %v6218_v20, %s4754_s20 }
 0x2cc   :  { %2506 = vrot.lane.b32.xlu1 %v6283_v62, %s4754_s20 }
 0x2ce   :  { %2631 = vrot.lane.b32.xlu0 %v6220_v52, %s4755_s3 }
 0x2d0   :  { %2647 = vrot.lane.b32.xlu1 %v6293_v29, %s4755_s3 }
 0x2d2   :  { %2492 = vrot.lane.b32.xlu0 %v6220_v52, %s4754_s20 }
 0x2d4   :  { %2508 = vrot.lane.b32.xlu1 %v6293_v29, %s4754_s20 }
 0x2d6   :  { %2633 = vrot.lane.b32.xlu0 %v6297_v2, %s4755_s3 }
 0x2d8   :  { %2649 = vrot.lane.b32.xlu1 %v6305_v12, %s4755_s3 }
 0x2da   :  { %2494 = vrot.lane.b32.xlu0 %v6297_v2, %s4754_s20 }
 0x2dc   :  { %2510 = vrot.lane.b32.xlu1 %v6305_v12, %s4754_s20 }
 0x2de   :  { %2635 = vrot.lane.b32.xlu0 %v6309_v31, %s4755_s3 }
 0x2e0   :  { %2651 = vrot.lane.b32.xlu1 %v6318_v46, %s4755_s3 }
 0x2e2   :  { %2496 = vrot.lane.b32.xlu0 %v6309_v31, %s4754_s20 }
 0x2e4   :  { %2653 = vrot.lane.b32.xlu1 %v6328_v35, %s4755_s3 }
 0x2e6   :  { %2637 = vrot.lane.b32.xlu0 %v6214_v27, %s4755_s3 }
 0x2e8   :  { %2514 = vrot.lane.b32.xlu1 %v6328_v35, %s4754_s20 }
 0x2ea   :  { %2512 = vrot.lane.b32.xlu0 %v6318_v46, %s4754_s20 }
 0x2ec   :  { %2583 = vrot.lane.b32.xlu1 %v2402_v45, %s4756_s4  ;;  %v6466_v45 = vpop.permute.xlu1 %2486 }
 0x2ee   :  { %2655 = vrot.lane.b32.xlu0 %v6342_v10, %s4755_s3 }
 0x2f0   :  { %2454 = vrot.lane.b32.xlu1 %v6352_v58, %s4753_s0 }
 0x2f2   :  { %2456 = vrot.lane.b32.xlu0 %v6321_v13, %s4753_s0 }
 0x2f4   :  { %2595 = vrot.lane.b32.xlu1 %v6321_v13, %s4756_s4 }
 0x2f6   :  { %2597 = vrot.lane.b32.xlu0 %v6246_v28, %s4756_s4 }
 0x2f8   :  { %2444 = vrot.lane.b32.xlu1 %v2403_v51, %s4753_s0  ;;  %v2182_v51 = vshrl.u32 %v6470_v3, 16 }
 0x2fa   :  { %2458 = vrot.lane.b32.xlu0 %v6246_v28, %s4753_s0  ;;  %v2422_v28 = vrot.slane %v6293_v29, 1 }
 0x2fc   :  { %2599 = vrot.lane.b32.xlu1 %v6251_v60, %s4756_s4  ;;  %v6398_v57 = vsel %vm2400_vm12, %v2420_v53, %v2422_v28 }
 0x2fe   :  { %2585 = vrot.lane.b32.xlu0 %v2405_v17, %s4756_s4 }
 0x300   :  { %2460 = vrot.lane.b32.xlu1 %v6251_v60, %s4753_s0  ;;  %v6393_v60 = vsel %vm2400_vm12, %v2406_v25, %v2408_v11  ;;  %v8335_v25 = vmov 0   ;;  %v2194_v11 = vshll.u32 %v6218_v20, 16 }
 0x301   :  { %4522 = vmatprep.subr.bf16.mxu1 %v8335_v25  ;;  %3486 = vmatprep.subr.bf16.mxu0 %v8335_v25 }
 0x302   :  { %2446 = vrot.lane.b32.xlu0 %v2405_v17, %s4753_s0  ;;  %4531 = vmatpush1.bf16.msra.mxu1 %v4705_v19  ;;  %v4709_v17 = vld [vmem:[%s8062_s2 + $0x28] sm:$0xff]  }
 0x303   :  { %3487 = vmatpush1.bf16.msra.mxu0 %v4705_v19  ;;  %4523 = vmatprep.subr.bf16.mxu1 %v8335_v25  ;;  %v2188_v19 = vrot.slane %v2186_v47, 1 }
 0x304   :  { %2601 = vrot.lane.b32.xlu1 %v6380_v50, %s4756_s4  ;;  %3488 = vmatprep.subr.bf16.mxu0 %v8335_v25 }
 0x306   :  { %2587 = vrot.lane.b32.xlu0 %v6239_v43, %s4756_s4  ;;  %4532 = vmatpush1.bf16.msra.mxu1 %v4706_v42 }
 0x307   :  { %3489 = vmatpush1.bf16.msra.mxu0 %v4706_v42  ;;  %4524 = vmatprep.subr.bf16.mxu1 %v8335_v25  ;;  %v2230_v42 = vshrl.u32 %v6214_v27, 16 }
 0x308   :  { %2462 = vrot.lane.b32.xlu1 %v6380_v50, %s4753_s0  ;;  %3490 = vmatprep.subr.bf16.mxu0 %v8335_v25 }
 0x30a   :  { %2448 = vrot.lane.b32.xlu0 %v6239_v43, %s4753_s0  ;;  %v2424_v43 = vrot.slane %v6305_v12, 1  ;;  %4533 = vmatpush1.bf16.msra.mxu1 %v4707_v37 }
 0x30b   :  { %3491 = vmatpush1.bf16.msra.mxu0 %v4707_v37  ;;  %4525 = vmatprep.subr.bf16.mxu1 %v8335_v25  ;;  %v8339_v37 = vld [vmem:[#allocation32_spill] sm:$0xff] }
 0x30c   :  { %2603 = vrot.lane.b32.xlu1 %v6398_v57, %s4756_s4  ;;  %v6421_v14 = vsel %vm2400_vm12, %v2422_v28, %v2424_v43  ;;  %v6446_v22 = vsel %vm2400_vm12, %v2424_v43, %v2426_v48  ;;  %3492 = vmatprep.subr.bf16.mxu0 %v8335_v25  ;;  %v6485_v28 = vsel %vm2400_vm12, %v2428_v36, %v8188_v44  ;;  %v2228_v43 = vrot.slane %v2226_v24, 1  ;;  %v4710_v36 = vld [vmem:[%s8062_s2 + $0x30] sm:$0xff]  }
 0x30d   :  { %8336 = vst [vmem:[#allocation31_spill] sm:$0xff] %v6446_v22  ;;  %8338 = vst [vmem:[#allocation90_spill] sm:$0xff] %v6485_v28  ;;  %v2236_v48 = vrot.slane %v2234_v30, 1  ;;  %v6499_v44 = vrot.slane %v2194_v11, 1  ;;  %v6503_v30 = vrot.slane %v2218_v39, 1 }
 0x30e   :  { %2589 = vrot.lane.b32.xlu0 %v6393_v60, %s4756_s4  ;;  %4534 = vmatpush1.bf16.msra.mxu1 %v4708_v33  ;;  %v2232_v47 = vor.u32 %v2230_v42, %v2228_v43  ;;  %v4711_v42 = vld [vmem:[%s8062_s2 + $0x38] sm:$0xff]  }
 0x30f   :  { %3493 = vmatpush1.bf16.msra.mxu0 %v4708_v33  ;;  %4526 = vmatprep.subr.bf16.mxu1 %v8335_v25  ;;  %v2184_v33 = vor.u32 %v2182_v51, %v8339_v37  ;;  %v2238_v51 = vshrl.u32 %v6192_v1, 16  ;;  %v2222_v37 = vshrl.u32 %v6309_v31, 16 }
 0x310   :  { %2464 = vrot.lane.b32.xlu1 %v6398_v57, %s4753_s0  ;;  %3494 = vmatprep.subr.bf16.mxu0 %v8335_v25  ;;  %v6521_v55 = vsel %vm2177_vm14, %v2232_v47, %v2236_v48  ;;  %v2252_v47 = vrot.slane %v2250_v34, 1  ;;  %v2202_v34 = vshll.u32 %v6220_v52, 16 }
 0x311   :  { %v2189_v11 = vsel %vm2177_vm14, %v2184_v33, %v2188_v19  ;;  %v2240_v5 = vor.u32 %v2238_v51, %v2236_v48  ;;  %v2224_v33 = vor.u32 %v2222_v37, %v6503_v30  ;;  %v2246_v51 = vshrl.u32 %v6223_v59, 16  ;;  %v4712_v37 = vld [vmem:[%s8062_s2 + $0x40] sm:$0xff]  }
 0x312   :  { %2450 = vrot.lane.b32.xlu0 %v6393_v60, %s4753_s0  ;;  %4535 = vmatpush1.bf16.msra.mxu1 %v4709_v17 }
 0x313   :  { %3495 = vmatpush1.bf16.msra.mxu0 %v4709_v17  ;;  %4527 = vmatprep.subr.bf16.mxu1 %v8335_v25  ;;  %v2248_v61 = vor.u32 %v2246_v51, %v2244_v7  ;;  %v6537_v59 = vsel %vm2177_vm14, %v2224_v33, %v2228_v43 }
 0x314   :  { %2605 = vrot.lane.b32.xlu1 %v6421_v14, %s4756_s4  ;;  %3496 = vmatprep.subr.bf16.mxu0 %v8335_v25 }
 0x316   :  { %2591 = vrot.lane.b32.xlu0 %v6415_v40, %s4756_s4  ;;  %4536 = vmatpush1.bf16.msra.mxu1 %v4710_v36 }
 0x317   :  { %3497 = vmatpush1.bf16.msra.mxu0 %v4710_v36  ;;  %4528 = vmatprep.subr.bf16.mxu1 %v8335_v25 }
 0x318   :  { %2466 = vrot.lane.b32.xlu1 %v6421_v14, %s4753_s0  ;;  %3498 = vmatprep.subr.bf16.mxu0 %v8335_v25 }
 0x31a   :  { %2452 = vrot.lane.b32.xlu0 %v6415_v40, %s4753_s0  ;;  %4537 = vmatpush1.bf16.msra.mxu1 %v4711_v42 }
 0x31b   :  { %3499 = vmatpush1.bf16.msra.mxu0 %v4711_v42  ;;  %4529 = vmatprep.subr.bf16.mxu1 %v8335_v25 }
 0x31c   :  { %2607 = vrot.lane.b32.xlu1 %v6446_v22, %s4756_s4  ;;  %3500 = vmatprep.subr.bf16.mxu0 %v8335_v25  ;;  %v2190_v25 = vshrl.u32 %v6253_v54, 16 }
 0x31e   :  { %2593 = vrot.lane.b32.xlu0 %v6352_v58, %s4756_s4  ;;  %4538 = vmatpush1.bf16.msra.mxu1 %v4712_v37  ;;  %v2192_v51 = vor.u32 %v2190_v25, %v2188_v19  ;;  %v2204_v25 = vrot.slane %v2202_v34, 1 }
 0x31f   :  { %3501 = vmatpush1.bf16.msra.mxu0 %v4712_v37 }
 0x320   :  { %2468 = vrot.lane.b32.xlu1 %v6446_v22, %s4753_s0 }
 0x321   :  { %v6478_v53 = vpop.permute.xlu0 %2500 }
 0x322   :  { %2609 = vrot.lane.b32.xlu0 %v6452_v49, %s4756_s4 }
 0x324   :  { %2611 = vrot.lane.b32.xlu1 %v6485_v28, %s4756_s4 }
 0x326   :  { %2470 = vrot.lane.b32.xlu0 %v6452_v49, %s4753_s0  ;;  %v6497_v24 = vpop.permute.xlu1 %2498 }
 0x328   :  { %2677 = vrot.lane.b32.xlu1 %v6499_v44, %s4758_s25 }
 0x32a   :  { %2536 = vrot.lane.b32.xlu0 %v2188_v19, %s4757_s22  ;;  %v6513_v39 = vpop.permute.xlu1 %2639  ;;  %v2197_v19 = vsel %vm2177_vm14, %v2192_v51, %v6499_v44  ;;  %v2266_v51 = vshll.u32 %v6293_v29, 16 }
 0x32c   :  { %v6509_v17 = vpop.permute.xlu0 %2641  ;;  %2351 = vrot.lane.b32.xlu1 %v6521_v55, %s4748_s24 }
 0x32e   :  { %2339 = vrot.lane.b32.xlu0 %v2189_v11, %s4748_s24  ;;  %v2245_v11 = vsel %vm2177_vm14, %v2240_v5, %v2244_v7  ;;  %v6532_v48 = vpop.permute.xlu1 %2502  ;;  %v2253_v5 = vsel %vm2177_vm14, %v2248_v61, %v2252_v47  ;;  %v2198_v61 = vshrl.u32 %v6218_v20, 16  ;;  %v2256_v20 = vor.u32 %v2254_v0, %v2252_v47 }
 0x32f   :  { %v2206_v0 = vshrl.u32 %v6220_v52, 16  ;;  %v2262_v47 = vshrl.u32 %v6283_v62, 16 }
 0x330   :  { %v6529_v36 = vpop.permute.xlu0 %2488  ;;  %2349 = vrot.lane.b32.xlu1 %v6537_v59, %s4748_s24  ;;  %v2200_v4 = vor.u32 %v2198_v61, %v6499_v44  ;;  %v2261_v61 = vsel %vm2177_vm14, %v2256_v20, %v2260_v8 }
 0x331   :  { %v2208_v34 = vor.u32 %v2206_v0, %v2204_v25  ;;  %v2264_v38 = vor.u32 %v2262_v47, %v2260_v8  ;;  %v2214_v8 = vshrl.u32 %v6297_v2, 16  ;;  %v2270_v47 = vshrl.u32 %v6293_v29, 16 }
 0x332   :  { %2550 = vrot.lane.b32.xlu0 %v2245_v11, %s4757_s22  ;;  %v6548_v42 = vpop.permute.xlu1 %2629  ;;  %v2205_v32 = vsel %vm2177_vm14, %v2200_v4, %v2204_v25 }
 0x334   :  { %v6545_v7 = vpop.permute.xlu0 %2643  ;;  %2548 = vrot.lane.b32.xlu1 %v6521_v55, %s4757_s22 }
 0x336   :  { %2691 = vrot.lane.b32.xlu0 %v2253_v5, %s4758_s25  ;;  %v6556_v33 = vpop.permute.xlu1 %2504 }
 0x338   :  { %v6553_v43 = vpop.permute.xlu0 %2627  ;;  %2353 = vrot.lane.b32.xlu1 %v2245_v11, %s4748_s24 }
 0x33a   :  { %2689 = vrot.lane.b32.xlu0 %v2245_v11, %s4758_s25  ;;  %v6567_v54 = vpop.permute.xlu1 %2645 }
 0x33c   :  { %v6562_v37 = vpop.permute.xlu0 %2490  ;;  %2538 = vrot.lane.b32.xlu1 %v2197_v19, %s4757_s22 }
 0x33e   :  { %2552 = vrot.lane.b32.xlu0 %v2253_v5, %s4757_s22  ;;  %v6576_v41 = vpop.permute.xlu1 %2506 }
 0x340   :  { %v6573_v11 = vpop.permute.xlu0 %2631  ;;  %2693 = vrot.lane.b32.xlu1 %v2261_v61, %s4758_s25 }
 0x342   :  { %2679 = vrot.lane.b32.xlu0 %v2205_v32, %s4758_s25  ;;  %v6583_v44 = vpop.permute.xlu1 %2647 }
 0x343   :  { %8340 = vst [vmem:[#allocation32_spill] sm:$0xff] %v6583_v44 }
 0x344   :  { %v6581_v6 = vpop.permute.xlu0 %2492  ;;  %2341 = vrot.lane.b32.xlu1 %v2197_v19, %s4748_s24  ;;  %v2213_v19 = vsel %vm2177_vm14, %v2208_v34, %v2212_v26  ;;  %v2216_v34 = vor.u32 %v2214_v8, %v2212_v26 }
 0x346   :  { %2355 = vrot.lane.b32.xlu0 %v2253_v5, %s4748_s24  ;;  %v6593_v20 = vpop.permute.xlu1 %2508  ;;  %v2268_v5 = vrot.slane %v2266_v51, 1  ;;  %v2274_v51 = vshll.u32 %v6305_v12, 16  ;;  %v2221_v2 = vsel %vm2177_vm14, %v2216_v34, %v6503_v30  ;;  %v2278_v30 = vshrl.u32 %v6305_v12, 16 }
 0x347   :  { %8342 = vst [vmem:[#allocation92_spill] sm:$0xff] %v6593_v20 }
 0x348   :  { %v6589_v4 = vpop.permute.xlu0 %2633  ;;  %2554 = vrot.lane.b32.xlu1 %v2261_v61, %s4757_s22  ;;  %v2269_v62 = vsel %vm2177_vm14, %v2264_v38, %v2268_v5  ;;  %v2272_v16 = vor.u32 %v2270_v47, %v2268_v5  ;;  %v2282_v47 = vshll.u32 %v6318_v46, 16 }
 0x349   :  { %8341 = vst [vmem:[#allocation91_spill] sm:$0xff] %v6589_v4 }
 0x34a   :  { %2540 = vrot.lane.b32.xlu0 %v2205_v32, %s4757_s22  ;;  %v6600_v13 = vpop.permute.xlu1 %2649 }
 0x34b   :  { %8344 = vst [vmem:[#allocation94_spill] sm:$0xff] %v6600_v13 }
 0x34c   :  { %v6597_v52 = vpop.permute.xlu0 %2494  ;;  %2695 = vrot.lane.b32.xlu1 %v2269_v62, %s4758_s25 }
 0x34d   :  { %8343 = vst [vmem:[#allocation93_spill] sm:$0xff] %v6597_v52 }
 0x34e   :  { %2681 = vrot.lane.b32.xlu0 %v2213_v19, %s4758_s25  ;;  %v6607_v0 = vpop.permute.xlu1 %2510 }
 0x34f   :  { %8346 = vst [vmem:[#allocation96_spill] sm:$0xff] %v6607_v0 }
 0x350   :  { %v6605_v25 = vpop.permute.xlu0 %2635  ;;  %2357 = vrot.lane.b32.xlu1 %v2261_v61, %s4748_s24 }
 0x351   :  { %8345 = vst [vmem:[#allocation95_spill] sm:$0xff] %v6605_v25 }
 0x352   :  { %2343 = vrot.lane.b32.xlu0 %v2205_v32, %s4748_s24  ;;  %v6616_v38 = vpop.permute.xlu1 %2651  ;;  %v2276_v32 = vrot.slane %v2274_v51, 1 }
 0x353   :  { %8348 = vst [vmem:[#allocation98_spill] sm:$0xff] %v6616_v38 }
 0x354   :  { %v6612_v63 = vpop.permute.xlu0 %2496  ;;  %2556 = vrot.lane.b32.xlu1 %v2269_v62, %s4757_s22  ;;  %v2277_v29 = vsel %vm2177_vm14, %v2272_v16, %v2276_v32  ;;  %v2280_v16 = vor.u32 %v2278_v30, %v2276_v32  ;;  %v2286_v30 = vshrl.u32 %v6318_v46, 16 }
 0x355   :  { %8347 = vst [vmem:[#allocation97_spill] sm:$0xff] %v6612_v63 }
 0x356   :  { %2542 = vrot.lane.b32.xlu0 %v2213_v19, %s4757_s22  ;;  %v6624_v61 = vpop.permute.xlu1 %2653 }
 0x357   :  { %8350 = vst [vmem:[#allocation100_spill] sm:$0xff] %v6624_v61 }
 0x358   :  { %v6620_v0 = vpop.permute.xlu0 %2637  ;;  %2697 = vrot.lane.b32.xlu1 %v2277_v29, %s4758_s25 }
 0x359   :  { %8349 = vst [vmem:[#allocation99_spill] sm:$0xff] %v6620_v0  ;;  %v2298_v0 = vshll.u32 %v6342_v10, 16 }
 0x35a   :  { %2683 = vrot.lane.b32.xlu0 %v2221_v2, %s4758_s25  ;;  %v6631_v8 = vpop.permute.xlu1 %2514 }
 0x35b   :  { %8352 = vst [vmem:[#allocation102_spill] sm:$0xff] %v6631_v8  ;;  %v2284_v8 = vrot.slane %v2282_v47, 1  ;;  %v2290_v47 = vshll.u32 %v6328_v35, 16  ;;  %v2300_v63 = vrot.slane %v2298_v0, 1 }
 0x35c   :  { %v6629_v26 = vpop.permute.xlu0 %2512  ;;  %2359 = vrot.lane.b32.xlu1 %v2269_v62, %s4748_s24 }
 0x35d   :  { %8351 = vst [vmem:[#allocation101_spill] sm:$0xff] %v6629_v26  ;;  %v2292_v38 = vrot.slane %v2290_v47, 1  ;;  %v6681_v47 = vld [vmem:[#allocation2 + $0x88] sm:$0xff] }
 0x35e   :  { %2345 = vrot.lane.b32.xlu0 %v2213_v19, %s4748_s24  ;;  %v6639_v51 = vpop.permute.xlu1 %2583  ;;  %v2285_v19 = vsel %vm2177_vm14, %v2280_v16, %v2284_v8  ;;  %v2288_v16 = vor.u32 %v2286_v30, %v2284_v8  ;;  %8354 = vst [vmem:[#allocation104_spill] sm:$0xff] %v6681_v47  ;;  %v2306_v13 = vshll.u32 %v6681_v47, 16 }
 0x360   :  { %v6635_v5 = vpop.permute.xlu0 %2655  ;;  %2558 = vrot.lane.b32.xlu1 %v2277_v29, %s4757_s22  ;;  %v2293_v46 = vsel %vm2177_vm14, %v2288_v16, %v2292_v38  ;;  %v2302_v16 = vshrl.u32 %v6342_v10, 16  ;;  %v2308_v0 = vrot.slane %v2306_v13, 1  ;;  %v2167_v13 = vld [vmem:[#allocation2 + $0x90] sm:$0xff] }
 0x361   :  { %8353 = vst [vmem:[#allocation103_spill] sm:$0xff] %v6635_v5  ;;  %v2314_v9 = vshll.u32 %v2167_v13, 16 }
 0x362   :  { %2544 = vrot.lane.b32.xlu0 %v2221_v2, %s4757_s22  ;;  %v6645_v61 = vpop.permute.xlu1 %2454 }
 0x364   :  { %v6643_v34 = vpop.permute.xlu0 %2456  ;;  %2699 = vrot.lane.b32.xlu1 %v2285_v19, %s4758_s25 }
 0x366   :  { %2685 = vrot.lane.b32.xlu0 %v6537_v59, %s4758_s25  ;;  %v6653_v62 = vpop.permute.xlu1 %2595 }
 0x368   :  { %v6651_v12 = vpop.permute.xlu0 %2597  ;;  %2361 = vrot.lane.b32.xlu1 %v2277_v29, %s4748_s24  ;;  %v2294_v29 = vshrl.u32 %v6328_v35, 16 }
 0x36a   :  { %2347 = vrot.lane.b32.xlu0 %v2221_v2, %s4748_s24  ;;  %v6661_v5 = vpop.permute.xlu1 %2444  ;;  %v2296_v8 = vor.u32 %v2294_v29, %v2292_v38  ;;  %v2304_v38 = vor.u32 %v2302_v16, %v2300_v63 }
 0x36c   :  { %v6657_v32 = vpop.permute.xlu0 %2458  ;;  %2560 = vrot.lane.b32.xlu1 %v2285_v19, %s4757_s22  ;;  %v2301_v35 = vsel %vm2177_vm14, %v2296_v8, %v2300_v63  ;;  %v2309_v8 = vsel %vm2177_vm14, %v2304_v38, %v2308_v0  ;;  %v2310_v38 = vshrl.u32 %v6681_v47, 16 }
 0x36e   :  { %2546 = vrot.lane.b32.xlu0 %v6537_v59, %s4757_s22  ;;  %v6668_v2 = vpop.permute.xlu1 %2599  ;;  %v2312_v52 = vor.u32 %v2310_v38, %v2308_v0  ;;  %v2434_v38 = vrot.slane %v2167_v13, 1 }
 0x370   :  { %v6666_v26 = vpop.permute.xlu0 %2585  ;;  %2701 = vrot.lane.b32.xlu1 %v2293_v46, %s4758_s25 }
 0x372   :  { %2687 = vrot.lane.b32.xlu0 %v6521_v55, %s4758_s25  ;;  %v6678_v30 = vpop.permute.xlu1 %2460 }
 0x374   :  { %v6676_v59 = vpop.permute.xlu0 %2446  ;;  %2562 = vrot.lane.b32.xlu1 %v2293_v46, %s4757_s22 }
 0x376   :  { %2363 = vrot.lane.b32.xlu0 %v2285_v19, %s4748_s24  ;;  %v6689_v21 = vpop.permute.xlu1 %2601 }
 0x378   :  { %v6684_v55 = vpop.permute.xlu0 %2587  ;;  %2365 = vrot.lane.b32.xlu1 %v2293_v46, %s4748_s24  ;;  %v2432_v46 = vrot.slane %v6681_v47, 1 }
 0x37a   :  { %2703 = vrot.lane.b32.xlu0 %v2301_v35, %s4758_s25  ;;  %v6695_v29 = vpop.permute.xlu1 %2462 }
 0x37c   :  { %v6693_v19 = vpop.permute.xlu0 %2448  ;;  %2705 = vrot.lane.b32.xlu1 %v2309_v8, %s4758_s25 }
 0x37e   :  { %2564 = vrot.lane.b32.xlu0 %v2301_v35, %s4757_s22  ;;  %v6702_v49 = vpop.permute.xlu1 %2603 }
 0x37f   :  { %8355 = vst [vmem:[#allocation105_spill] sm:$0xff] %v6702_v49 }
 0x380   :  { %v6700_v25 = vpop.permute.xlu0 %2589  ;;  %2472 = vrot.lane.b32.xlu1 %v6485_v28, %s4753_s0 }
 0x382   :  { %2367 = vrot.lane.b32.xlu0 %v2301_v35, %s4748_s24  ;;  %v6710_v16 = vpop.permute.xlu1 %2464  ;;  %v8359_v35 = vrot.slane %v6342_v10, 1 }
 0x383   :  { %8357 = vst [vmem:[#allocation107_spill] sm:$0xff] %v6710_v16  ;;  %v2316_v16 = vrot.slane %v2314_v9, 1  ;;  %v6742_v9 = vld [vmem:[#allocation2 + $0x98] sm:$0xff] }
 0x384   :  { %v6707_v63 = vpop.permute.xlu0 %2450  ;;  %2566 = vrot.lane.b32.xlu1 %v2309_v8, %s4757_s22  ;;  %v6721_v28 = vsel %vm2400_vm12, %v8359_v35, %v2432_v46  ;;  %v2318_v35 = vshrl.u32 %v2167_v13, 16 }
 0x385   :  { %8356 = vst [vmem:[#allocation106_spill] sm:$0xff] %v6707_v63  ;;  %8360 = vst [vmem:[#allocation109_spill] sm:$0xff] %v6721_v28  ;;  %v2317_v49 = vsel %vm2177_vm14, %v2312_v52, %v2316_v16 }
 0x386   :  { %2516 = vrot.lane.b32.xlu0 %v6342_v10, %s4754_s20  ;;  %v6723_v63 = vpop.permute.xlu1 %2605 }
 0x387   :  { %8361 = vst [vmem:[#allocation110_spill] sm:$0xff] %v6723_v63 }
 0x388   :  { %v6716_v20 = vpop.permute.xlu0 %2591  ;;  %2657 = vrot.lane.b32.xlu1 %v6681_v47, %s4755_s3 }
 0x389   :  { %8358 = vst [vmem:[#allocation108_spill] sm:$0xff] %v6716_v20 }
 0x38a   :  { %2613 = vrot.lane.b32.xlu0 %v6721_v28, %s4756_s4  ;;  %v6732_v20 = vpop.permute.xlu1 %2466 }
 0x38b   :  { %8363 = vst [vmem:[#allocation112_spill] sm:$0xff] %v6732_v20  ;;  %v2322_v20 = vshll.u32 %v6742_v9, 16 }
 0x38c   :  { %v6729_v44 = vpop.permute.xlu0 %2452  ;;  %2369 = vrot.lane.b32.xlu1 %v2309_v8, %s4748_s24  ;;  %v6753_v8 = vsel %vm2400_vm12, %v2432_v46, %v2434_v38  ;;  %v2149_v46 = vld [vmem:[#allocation2] sm:$0x80] }
 0x38d   :  { %8362 = vst [vmem:[#allocation111_spill] sm:$0xff] %v6729_v44  ;;  %8368 = vst [vmem:[#allocation117_spill] sm:$0xff] %v6753_v8 }
 0x38e   :  { %2707 = vrot.lane.b32.xlu0 %v2317_v49, %s4758_s25  ;;  %v6738_v0 = vpop.permute.xlu1 %2607 }
 0x38f   :  { %8365 = vst [vmem:[#allocation114_spill] sm:$0xff] %v6738_v0  ;;  %v2320_v0 = vor.u32 %v2318_v35, %v2316_v16  ;;  %v6769_v35 = vld [vmem:[#allocation2 + $0xa0] sm:$0xff] }
 0x390   :  { %v6736_v10 = vpop.permute.xlu0 %2593  ;;  %2518 = vrot.lane.b32.xlu1 %v6681_v47, %s4754_s20  ;;  %v2330_v4 = vshll.u32 %v6769_v35, 16 }
 0x391   :  { %8364 = vst [vmem:[#allocation113_spill] sm:$0xff] %v6736_v10  ;;  %v2324_v10 = vrot.slane %v2322_v20, 1 }
 0x392   :  { %2474 = vrot.lane.b32.xlu0 %v6721_v28, %s4753_s0  ;;  %v6749_v44 = vpop.permute.xlu1 %2468 }
 0x393   :  { %8367 = vst [vmem:[#allocation116_spill] sm:$0xff] %v6749_v44 }
 0x394   :  { %v6746_v52 = vpop.permute.xlu0 %2609  ;;  %2615 = vrot.lane.b32.xlu1 %v6753_v8, %s4756_s4 }
 0x395   :  { %8366 = vst [vmem:[#allocation115_spill] sm:$0xff] %v6746_v52  ;;  %v2325_v52 = vsel %vm2177_vm14, %v2320_v0, %v2324_v10  ;;  %v2726_v0 = vsel %vm774_vm5, %v2149_v46, %v6443_v23  ;;  %v8371_v23 = vrot.slane %v6742_v9, 1 }
 0x396   :  { %2568 = vrot.lane.b32.xlu0 %v2317_v49, %s4757_s22  ;;  %v6759_v47 = vpop.permute.xlu1 %2611  ;;  %v2768_v22 = vsel %vm925_vm9, %v2726_v0, %v6455_v18 }
 0x397   :  { %8370 = vst [vmem:[#allocation119_spill] sm:$0xff] %v6759_v47  ;;  %v6787_v46 = vsel %vm2400_vm12, %v2434_v38, %v8371_v23  ;;  %v2811_v0 = vsel %vm2809_vm15, %v2768_v22, %v6466_v45  ;;  %v3166_v22 = vshll.u32 %v6380_v50, 16 }
 0x398   :  { %v6757_v28 = vpop.permute.xlu0 %2470  ;;  %2709 = vrot.lane.b32.xlu1 %v2325_v52, %s4758_s25 }
 0x399   :  { %8369 = vst [vmem:[#allocation118_spill] sm:$0xff] %v6757_v28 }
 0x39a   :  { %2659 = vrot.lane.b32.xlu0 %v2167_v13, %s4755_s3  ;;  %v6764_v63 = vpop.permute.xlu1 %2677 }
 0x39c   :  { %v2537_v44 = vpop.permute.xlu0 %2536  ;;  %2476 = vrot.lane.b32.xlu1 %v6753_v8, %s4753_s0 }
 0x39e   :  { %2371 = vrot.lane.b32.xlu0 %v2317_v49, %s4748_s24  ;;  %v2352_v47 = vpop.permute.xlu1 %2351  ;;  %v2326_v49 = vshrl.u32 %v6742_v9, 16 }
 0x39f   :  { %v2740_v28 = vsel %vm774_vm5, %v6214_v27, %v2352_v47  ;;  %v3163_v47 = vshrl.u32 %v6380_v50, 16  ;;  %v6833_v50 = vrot.slane %v6769_v35, 1 }
 0x3a0   :  { %v2340_v16 = vpop.permute.xlu0 %2339  ;;  %v2782_v8 = vsel %vm925_vm9, %v2740_v28, %v6643_v34  ;;  %2570 = vrot.lane.b32.xlu1 %v2325_v52, %s4757_s22  ;;  %v2328_v27 = vor.u32 %v2326_v49, %v2324_v10  ;;  %v2332_v10 = vrot.slane %v2330_v4, 1 }
 0x3a1   :  { %v6813_v49 = vrot.slane %v3163_v47, 7  ;;  %v2728_v45 = vsel %vm774_vm5, %v6470_v3, %v2340_v16  ;;  %v6835_v3 = vld [vmem:[#allocation2 + $0xa8] sm:$0xff] }
 0x3a2   :  { %2520 = vrot.lane.b32.xlu0 %v2167_v13, %s4754_s20  ;;  %v2825_v13 = vsel %vm2809_vm15, %v2782_v8, %v6478_v53  ;;  %v2350_v28 = vpop.permute.xlu1 %2349  ;;  %v6811_v4 = vsel %vm2177_vm14, %v2328_v27, %v2332_v10 }
 0x3a3   :  { %v2738_v53 = vsel %vm774_vm5, %v6309_v31, %v2350_v28 }
 0x3a4   :  { %v2551_v20 = vpop.permute.xlu0 %2550  ;;  %v2780_v8 = vsel %vm925_vm9, %v2738_v53, %v6645_v61  ;;  %2661 = vrot.lane.b32.xlu1 %v6742_v9, %s4755_s3  ;;  %v2854_v61 = vsel %vm2852_vm0, %v2811_v0, %v2537_v44  ;;  %v2334_v44 = vshrl.u32 %v6769_v35, 16 }
 0x3a5   :  { %v2868_v34 = vsel %vm2852_vm0, %v2825_v13, %v2551_v20  ;;  %v2823_v31 = vsel %vm2809_vm15, %v2780_v8, %v6497_v24  ;;  %v2897_v47 = vsel %vm2895_vm1, %v2854_v61, %v6639_v51  ;;  %v3168_v51 = vor.u32 %v3166_v22, %v6813_v49 }
 0x3a6   :  { %2617 = vrot.lane.b32.xlu0 %v6787_v46, %s4756_s4  ;;  %v2911_v38 = vsel %vm2895_vm1, %v2868_v34, %v6651_v12  ;;  %v2549_v13 = vpop.permute.xlu1 %2548  ;;  %v6842_v53 = vor.u32 %v2334_v44, %v2332_v10  ;;  %v2940_v0 = vsel %vm2938_vm2, %v2897_v47, %v6553_v43  ;;  %v2529_v61 = vshll.u32 %v6835_v3, 16 }
 0x3a7   :  { %v2954_v18 = vsel %vm2938_vm2, %v2911_v38, %v6509_v17  ;;  %v2866_v17 = vsel %vm2852_vm0, %v2823_v31, %v2549_v13 }
 0x3a8   :  { %v2692_v20 = vpop.permute.xlu0 %2691  ;;  %v2909_v24 = vsel %vm2895_vm1, %v2866_v17, %v6653_v62  ;;  %2373 = vrot.lane.b32.xlu1 %v2325_v52, %s4748_s24  ;;  %v3073_v62 = vshrl.u32 %v6393_v60, 16 }
 0x3a9   :  { %v2997_v12 = vsel %vm2981_vm3, %v2954_v18, %v2692_v20  ;;  %v2952_v34 = vsel %vm2938_vm2, %v2909_v24, %v6513_v39  ;;  %v2770_v39 = vsel %vm925_vm9, %v2728_v45, %v6661_v5  ;;  %v3178_v20 = vshrl.u32 %v6398_v57, 16 }
 0x3aa   :  { %v3140_v23 = vshrl.u32 %v2997_v12, 16  ;;  %2711 = vrot.lane.b32.xlu0 %v6811_v4, %s4758_s25  ;;  %v2354_v16 = vpop.permute.xlu1 %2353  ;;  %v3143_v38 = vshll.u32 %v2997_v12, 16  ;;  %v2813_v43 = vsel %vm2809_vm15, %v2770_v39, %v6529_v36  ;;  %v3169_v45 = vsel %vm3042_vm13, %v6263_v15, %v3168_v51 }
 0x3ab   :  { %v2742_v8 = vsel %vm774_vm5, %v6192_v1, %v2354_v16  ;;  %v6891_v16 = vrot.slane %v3073_v62, 7  ;;  %v3076_v62 = vshll.u32 %v6393_v60, 16 }
 0x3ac   :  { %v2690_v27 = vpop.permute.xlu0 %2689  ;;  %v6828_v28 = vrot.slane %v3140_v23, 7  ;;  %v2784_v31 = vsel %vm925_vm9, %v2742_v8, %v6657_v32  ;;  %2522 = vrot.lane.b32.xlu1 %v6742_v9, %s4754_s20  ;;  %v8372_v32 = vrot.slane %v6742_v9, 1  ;;  %v2983_v9 = vsel %vm2981_vm3, %v2940_v0, %v6764_v63 }
 0x3ad   :  { %v2995_v52 = vsel %vm2981_vm3, %v2952_v34, %v2690_v27  ;;  %v2827_v1 = vsel %vm2809_vm15, %v2784_v31, %v6532_v48  ;;  %v6889_v34 = vrot.slane %v2529_v61, 1  ;;  %v6893_v63 = vrot.slane %v3178_v20, 7  ;;  %v4730_v61 = vld [vmem:[#allocation2 + $0x48] sm:$0xff] }
 0x3ae   :  { %2478 = vrot.lane.b32.xlu0 %v6787_v46, %s4753_s0  ;;  %v3125_v18 = vshrl.u32 %v2995_v52, 16  ;;  %v3145_v5 = vor.u32 %v3143_v38, %v6828_v28  ;;  %v3128_v13 = vshll.u32 %v2995_v52, 16  ;;  %v2539_v23 = vpop.permute.xlu1 %2538  ;;  %v6866_v22 = vsel %vm2400_vm12, %v8372_v32, %v6833_v50  ;;  %v6902_v38 = vld [vmem:[#allocation2 + $0xb0] sm:$0xff] }
 0x3af   :  { %v2856_v48 = vsel %vm2852_vm0, %v2813_v43, %v2539_v23  ;;  %v3043_v51 = vshrl.u32 %v2983_v9, 16  ;;  %v2670_v20 = vshll.u32 %v6902_v38, 16  ;;  %v3181_v0 = vshll.u32 %v6398_v57, 16 }
 0x3b0   :  { %v2553_v10 = vpop.permute.xlu0 %2552  ;;  %v3127_v12 = vrot.slane %v3125_v18, 7  ;;  %v2899_v44 = vsel %vm2895_vm1, %v2856_v48, %v6666_v26  ;;  %2619 = vrot.lane.b32.xlu1 %v6866_v22, %s4756_s4  ;;  %v3078_v23 = vor.u32 %v3076_v62, %v6891_v16  ;;  %v3088_v48 = vshrl.u32 %v6415_v40, 16 }
 0x3b1   :  { %v2870_v17 = vsel %vm2852_vm0, %v2827_v1, %v2553_v10  ;;  %v3045_v43 = vrot.slane %v3043_v51, 7 }
 0x3b2   :  { %2572 = vrot.lane.b32.xlu0 %v6811_v4, %s4757_s22  ;;  %v6872_v24 = vor.u32 %v3128_v13, %v3127_v12  ;;  %v2913_v36 = vsel %vm2895_vm1, %v2870_v17, %v6668_v2  ;;  %v3146_v27 = vsel %vm3042_vm13, %v3127_v12, %v3145_v5  ;;  %v2942_v2 = vsel %vm2938_vm2, %v2899_v44, %v6548_v42  ;;  %v2694_v26 = vpop.permute.xlu1 %2693  ;;  %v4731_v17 = vld [vmem:[#allocation2 + $0x10] sm:$0xff] }
 0x3b3   :  { %3565 = vmatmul.mubr.bf16.vlgmr.msra.gmra.mrb[0].mxu1 %v3146_v27  ;;  %v2956_v15 = vsel %vm2938_vm2, %v2913_v36, %v6545_v7  ;;  %v2532_v42 = vsel %vm2177_vm14, %v6842_v53, %v6889_v34 }
 0x3b4   :  { %v2680_v47 = vpop.permute.xlu0 %2679  ;;  %4438 = vmatprep.mubr.msk.bf16.mxu1 %vm774_vm5, %v3169_v45  ;;  %v2999_v7 = vsel %vm2981_vm3, %v2956_v15, %v2694_v26  ;;  %2713 = vrot.lane.b32.xlu1 %v2532_v42, %s4758_s25  ;;  %v3183_v45 = vor.u32 %v3181_v0, %v6893_v63  ;;  %v6933_v15 = vrot.slane %v6835_v3, 1 }
 0x3b5   :  { %v2985_v52 = vsel %vm2981_vm3, %v2942_v2, %v2680_v47  ;;  %v3155_v8 = vshrl.u32 %v2999_v7, 16  ;;  %v3158_v13 = vshll.u32 %v2999_v7, 16  ;;  %v3193_v47 = vshrl.u32 %v6421_v14, 16 }
 0x3b6   :  { %2663 = vrot.lane.b32.xlu0 %v6769_v35, %s4755_s3  ;;  %v3046_v39 = vshrl.u32 %v2985_v52, 16  ;;  %v3049_v10 = vshll.u32 %v2985_v52, 16  ;;  %v2342_v1 = vpop.permute.xlu1 %2341  ;;  %v3184_v51 = vsel %vm3042_vm13, %v6813_v49, %v3183_v45  ;;  %v2533_v7 = vshrl.u32 %v6835_v3, 16 }
 0x3b7   :  { %v6911_v12 = vrot.slane %v3155_v8, 7  ;;  %v2730_v32 = vsel %vm774_vm5, %v4731_v17, %v2342_v1  ;;  %v6966_v8 = vsel %vm2400_vm12, %v6833_v50, %v6933_v15  ;;  %v6972_v0 = vrot.slane %v3193_v47, 7  ;;  %v4732_v1 = vld [vmem:[#allocation2 + $0x18] sm:$0xff] }
 0x3b8   :  { %v2356_v18 = vpop.permute.xlu0 %2355  ;;  %v6908_v31 = vrot.slane %v3046_v39, 7  ;;  %2480 = vrot.lane.b32.xlu1 %v6866_v22, %s4753_s0  ;;  %v6958_v39 = vrot.slane %v2670_v20, 1  ;;  %v3091_v20 = vshll.u32 %v6415_v40, 16 }
 0x3b9   :  { %v2744_v5 = vsel %vm774_vm5, %v4730_v61, %v2356_v18  ;;  %v3160_v36 = vor.u32 %v3158_v13, %v6911_v12 }
 0x3ba   :  { %v2786_v60 = vsel %vm925_vm9, %v2744_v5, %v6678_v30  ;;  %2375 = vrot.lane.b32.xlu0 %v6811_v4, %s4748_s24  ;;  %v3051_v57 = vor.u32 %v3049_v10, %v6908_v31  ;;  %v2772_v30 = vsel %vm925_vm9, %v2730_v32, %v6676_v59  ;;  %v2555_v2 = vpop.permute.xlu1 %2554  ;;  %v3196_v10 = vshll.u32 %v6421_v14, 16 }
 0x3bb   :  { %v2829_v4 = vsel %vm2809_vm15, %v2786_v60, %v6556_v33  ;;  %v2815_v9 = vsel %vm2809_vm15, %v2772_v30, %v6562_v37  ;;  %v3161_v26 = vsel %vm3042_vm13, %v6828_v28, %v3160_v36  ;;  %v3079_v33 = vsel %vm3042_vm13, %v6259_v56, %v3078_v23 }
 0x3bc   :  { %v2541_v27 = vpop.permute.xlu0 %2540  ;;  %v3052_v44 = vsel %vm3042_vm13, %v3045_v43, %v3051_v57  ;;  %v2872_v37 = vsel %vm2852_vm0, %v2829_v4, %v2555_v2  ;;  %3573 = vmatmul.mubr.bf16.gmra.mrb[4].mxu1 %v3161_v26  ;;  %v6950_v28 = vrot.slane %v3088_v48, 7  ;;  %2574 = vrot.lane.b32.xlu1 %v2532_v42, %s4757_s22  ;;  %v4733_v48 = vld [vmem:[#allocation2 + $0x50] sm:$0xff]  ;;  %v3198_v4 = vor.u32 %v3196_v10, %v6972_v0 }
 0x3bd   :  { %v2858_v59 = vsel %vm2852_vm0, %v2815_v9, %v2541_v27  ;;  %3517 = vmatmul.mubr.bf16.vlgmr.msra.gmra.mrb[40].mxu0 %v3052_v44  ;;  %4439 = vmatprep.mubr.msk.bf16.mxu1 %vm774_vm5, %v3184_v51  ;;  %v2173_v27 = vld [vmem:[#allocation2 + $0xb0] sm:$0x1]  ;;  %v3103_v9 = vshrl.u32 %v6352_v58, 16 }
 0x3be   :  { %2524 = vrot.lane.b32.xlu0 %v6769_v35, %s4754_s20  ;;  %v2901_v52 = vsel %vm2895_vm1, %v2858_v59, %v6684_v55  ;;  %4432 = vmatprep.mubr.msk.bf16.mxu0 %vm774_vm5, %v3079_v33  ;;  %v2915_v35 = vsel %vm2895_vm1, %v2872_v37, %v6689_v21  ;;  %v2535_v21 = vor.u32 %v2533_v7, %v6889_v34  ;;  %v2696_v42 = vpop.permute.xlu1 %2695 }
 0x3bf   :  { %v2944_v56 = vsel %vm2938_vm2, %v2901_v52, %v6573_v11  ;;  %v2958_v49 = vsel %vm2938_vm2, %v2915_v35, %v6567_v54  ;;  %v2170_v11 = vld [vmem:[#allocation2 + $0xa8] sm:$0x1]  ;;  %v3093_v43 = vor.u32 %v3091_v20, %v6950_v28 }
 0x3c0   :  { %v2682_v55 = vpop.permute.xlu0 %2681  ;;  %v3001_v54 = vsel %vm2981_vm3, %v2958_v49, %v2696_v42  ;;  %2665 = vrot.lane.b32.xlu1 %v6835_v3, %s4755_s3  ;;  %v2673_v40 = vsel %vm2177_vm14, %v2535_v21, %v6958_v39  ;;  %v2440_v23 = vrot.slane %v2170_v11, 1  ;;  %v8376_v49 = vld [vmem:[#allocation32_spill] sm:$0xff]  ;;  %v3106_v11 = vshll.u32 %v6352_v58, 16 }
 0x3c1   :  { %v2987_v62 = vsel %vm2981_vm3, %v2944_v56, %v2682_v55  ;;  %v3170_v61 = vshrl.u32 %v3001_v54, 16  ;;  %v3173_v14 = vshll.u32 %v3001_v54, 16  ;;  %v3094_v33 = vsel %vm3042_vm13, %v6891_v16, %v3093_v43  ;;  %v8374_v16 = vld [vmem:[#allocation91_spill] sm:$0xff] }
 0x3c2   :  { %v3065_v18 = vshrl.u32 %v2987_v62, 16  ;;  %2621 = vrot.lane.b32.xlu0 %v6966_v8, %s4756_s4  ;;  %v3068_v13 = vshll.u32 %v2987_v62, 16  ;;  %v2358_v32 = vpop.permute.xlu1 %2357  ;;  %v2441_v26 = vsel %vm2400_vm12, %v6833_v50, %v2440_v23  ;;  %v3199_v50 = vsel %vm3042_vm13, %v6893_v63, %v3198_v4 }
 0x3c3   :  { %v6984_v57 = vrot.slane %v3170_v61, 7  ;;  %v2746_v36 = vsel %vm774_vm5, %v4733_v48, %v2358_v32  ;;  %v2674_v56 = vshrl.u32 %v6902_v38, 16  ;;  %v7027_v55 = vrot.slane %v3103_v9, 7  ;;  %v8377_v32 = vld [vmem:[#allocation106_spill] sm:$0xff]  ;;  %v8379_v9 = vld [vmem:[#allocation107_spill] sm:$0xff] }
 0x3c4   :  { %v6976_v5 = vrot.slane %v3065_v18, 7  ;;  %v2344_v34 = vpop.permute.xlu0 %2343  ;;  %v2788_v47 = vsel %vm925_vm9, %v2746_v36, %v6695_v29  ;;  %2377 = vrot.lane.b32.xlu1 %v6842_v53, %s4748_s24  ;;  %v8378_v36 = vld [vmem:[#allocation93_spill] sm:$0xff] }
 0x3c5   :  { %v2732_v60 = vsel %vm774_vm5, %v4732_v1, %v2344_v34  ;;  %v3175_v44 = vor.u32 %v3173_v14, %v6984_v57  ;;  %v2676_v1 = vor.u32 %v2674_v56, %v6958_v39  ;;  %v4735_v39 = vld [vmem:[#allocation2 + $0x58] sm:$0xff] }
 0x3c6   :  { %v3070_v17 = vor.u32 %v3068_v13, %v6976_v5  ;;  %v2774_v45 = vsel %vm925_vm9, %v2732_v60, %v6693_v19  ;;  %2715 = vrot.lane.b32.xlu0 %v2673_v40, %s4758_s25  ;;  %v2557_v29 = vpop.permute.xlu1 %2556  ;;  %v4734_v60 = vld [vmem:[#allocation2 + $0x20] sm:$0xff]  ;;  %v3108_v40 = vor.u32 %v3106_v11, %v7027_v55 }
 0x3c7   :  { %v2817_v30 = vsel %vm2809_vm15, %v2774_v45, %v6581_v6  ;;  %v2831_v6 = vsel %vm2809_vm15, %v2788_v47, %v6576_v41  ;;  %v3176_v37 = vsel %vm3042_vm13, %v6911_v12, %v3175_v44  ;;  %v2581_v41 = vrot.slane %v2173_v27, 1 }
 0x3c8   :  { %v2543_v19 = vpop.permute.xlu0 %2542  ;;  %v3071_v2 = vsel %vm3042_vm13, %v6908_v31, %v3070_v17  ;;  %v8373_v31 = vld [vmem:[#allocation31_spill] sm:$0xff]  ;;  %v2874_v51 = vsel %vm2852_vm0, %v2831_v6, %v2557_v29  ;;  %3581 = vmatmul.mubr.bf16.gmra.mrb[8].mxu1 %v3176_v37  ;;  %2526 = vrot.lane.b32.xlu1 %v6835_v3, %s4754_s20  ;;  %v8381_v29 = vld [vmem:[#allocation108_spill] sm:$0xff] }
 0x3c9   :  { %v2860_v59 = vsel %vm2852_vm0, %v2817_v30, %v2543_v19  ;;  %3525 = vmatmul.mubr.bf16.gmra.mrb[44].mxu0 %v3071_v2  ;;  %v3208_v52 = vshrl.u32 %v8373_v31, 16  ;;  %4440 = vmatprep.mubr.msk.bf16.mxu1 %vm774_vm5, %v3199_v50  ;;  %v2582_v54 = vsel %vm2400_vm12, %v6933_v15, %v2581_v41  ;;  %v8380_v2 = vld [vmem:[#allocation92_spill] sm:$0xff] }
 0x3ca   :  { %v2903_v53 = vsel %vm2895_vm1, %v2860_v59, %v6700_v25  ;;  %2482 = vrot.lane.b32.xlu0 %v2441_v26, %s4753_s0  ;;  %4433 = vmatprep.mubr.msk.bf16.mxu0 %vm774_vm5, %v3094_v33  ;;  %v8375_v25 = vld [vmem:[#allocation105_spill] sm:$0xff]  ;;  %v2698_v42 = vpop.permute.xlu1 %2697  ;;  %v3109_v26 = vsel %vm3042_vm13, %v6950_v28, %v3108_v40  ;;  %v8382_v41 = vld [vmem:[#allocation48_spill] sm:$0xff] }
 0x3cb   :  { %v2946_v7 = vsel %vm2938_vm2, %v2903_v53, %v8374_v16  ;;  %v2917_v35 = vsel %vm2895_vm1, %v2874_v51, %v8375_v25  ;;  %v7034_v20 = vrot.slane %v3208_v52, 7  ;;  %v8384_v51 = vld [vmem:[#allocation95_spill] sm:$0xff]  ;;  %v8385_v16 = vld [vmem:[#allocation110_spill] sm:$0xff] }
 0x3cc   :  { %v2684_v12 = vpop.permute.xlu0 %2683  ;;  %v2960_v62 = vsel %vm2938_vm2, %v2917_v35, %v8376_v49  ;;  %2623 = vrot.lane.b32.xlu1 %v2582_v54, %s4756_s4  ;;  %v8387_v35 = vld [vmem:[#allocation94_spill] sm:$0xff] }
 0x3cd   :  { %v2989_v63 = vsel %vm2981_vm3, %v2946_v7, %v2684_v12  ;;  %v3003_v3 = vsel %vm2981_vm3, %v2960_v62, %v2698_v42 }
 0x3ce   :  { %v3080_v18 = vshrl.u32 %v2989_v63, 16  ;;  %2576 = vrot.lane.b32.xlu0 %v2535_v21, %s4757_s22  ;;  %v3185_v10 = vshrl.u32 %v3003_v3, 16  ;;  %v3083_v13 = vshll.u32 %v2989_v63, 16  ;;  %v3211_v21 = vshll.u32 %v8373_v31, 16  ;;  %v2360_v17 = vpop.permute.xlu1 %2359  ;;  %v8389_v63 = vld [vmem:[#allocation86_spill] sm:$0xff] }
 0x3cf   :  { %v3188_v43 = vshll.u32 %v3003_v3, 16  ;;  %v2748_v48 = vsel %vm774_vm5, %v4735_v39, %v2360_v17  ;;  %v3121_v42 = vshll.u32 %v8389_v63, 16 }
 0x3d0   :  { %v7039_v61 = vrot.slane %v3080_v18, 7  ;;  %v2346_v34 = vpop.permute.xlu0 %2345  ;;  %v7046_v23 = vrot.slane %v3185_v10, 7  ;;  %v3213_v4 = vor.u32 %v3211_v21, %v7034_v20  ;;  %v2790_v44 = vsel %vm925_vm9, %v2748_v48, %v8379_v9  ;;  %2717 = vrot.lane.b32.xlu1 %v2676_v1, %s4758_s25  ;;  %v4736_v21 = vld [vmem:[#allocation2 + $0x28] sm:$0xff] }
 0x3d1   :  { %v2734_v58 = vsel %vm774_vm5, %v4734_v60, %v2346_v34  ;;  %v2833_v6 = vsel %vm2809_vm15, %v2790_v44, %v8380_v2  ;;  %v8393_v48 = vld [vmem:[#allocation52_spill] sm:$0xff]  ;;  %v8396_v2 = vld [vmem:[#allocation53_spill] sm:$0xff] }
 0x3d2   :  { %v3085_v14 = vor.u32 %v3083_v13, %v7039_v61  ;;  %v2776_v45 = vsel %vm925_vm9, %v2734_v58, %v8377_v32  ;;  %2667 = vrot.lane.b32.xlu0 %v6902_v38, %s4755_s3  ;;  %v3190_v27 = vor.u32 %v3188_v43, %v7046_v23  ;;  %v2559_v33 = vpop.permute.xlu1 %2558  ;;  %v3214_v28 = vsel %vm3042_vm13, %v6972_v0, %v3213_v4  ;;  %v8388_v0 = vld [vmem:[#allocation50_spill] sm:$0xff]  ;;  %v8390_v13 = vld [vmem:[#allocation51_spill] sm:$0xff]  ;;  %v8394_v4 = vld [vmem:[#allocation97_spill] sm:$0xff] }
 0x3d3   :  { %v2819_v30 = vsel %vm2809_vm15, %v2776_v45, %v8378_v36  ;;  %v2876_v52 = vsel %vm2852_vm0, %v2833_v6, %v2559_v33  ;;  %v8391_v58 = vld [vmem:[#allocation87_spill] sm:$0xff] }
 0x3d4   :  { %v2545_v47 = vpop.permute.xlu0 %2544  ;;  %v3086_v19 = vsel %vm3042_vm13, %v6976_v5, %v3085_v14  ;;  %v3191_v37 = vsel %vm3042_vm13, %v6984_v57, %v3190_v27  ;;  %v8383_v5 = vld [vmem:[#allocation89_spill] sm:$0xff]  ;;  %v2919_v7 = vsel %vm2895_vm1, %v2876_v52, %v8385_v16  ;;  %v3123_v40 = vor.u32 %v3121_v42, %v8391_v58  ;;  %v8392_v45 = vld [vmem:[#allocation111_spill] sm:$0xff]  ;;  %v8399_v52 = vld [vmem:[#allocation54_spill] sm:$0xff] }
 0x3d5   :  { %v2862_v59 = vsel %vm2852_vm0, %v2819_v30, %v2545_v47  ;;  %3533 = vmatmul.mubr.bf16.gmra.mrb[48].mxu0 %v3086_v19  ;;  %v3223_v31 = vshrl.u32 %v8383_v5, 16  ;;  %3589 = vmatmul.mubr.bf16.gmra.mrb[12].mxu1 %v3191_v37  ;;  %v8386_v57 = vld [vmem:[#allocation49_spill] sm:$0xff]  ;;  %v2962_v12 = vsel %vm2938_vm2, %v2919_v7, %v8387_v35  ;;  %v3226_v1 = vshll.u32 %v8383_v5, 16  ;;  %v4737_v36 = vld [vmem:[#allocation2 + $0x60] sm:$0xff]  ;;  %v8395_v47 = vld [vmem:[#allocation112_spill] sm:$0xff] }
 0x3d6   :  { %v2905_v53 = vsel %vm2895_vm1, %v2862_v59, %v8381_v29  ;;  %4109 = vrot.lane.b32.xlu0 %v8382_v41, %s4758_s25  ;;  %4434 = vmatprep.mubr.msk.bf16.mxu0 %vm774_vm5, %v3109_v26  ;;  %v2700_v49 = vpop.permute.xlu1 %2699  ;;  %v8397_v26 = vld [vmem:[#allocation96_spill] sm:$0xff]  ;;  %v8398_v41 = vld [vmem:[#allocation113_spill] sm:$0xff]  ;;  %v8402_v7 = vld [vmem:[#allocation114_spill] sm:$0xff] }
 0x3d7   :  { %v2948_v50 = vsel %vm2938_vm2, %v2905_v53, %v8384_v51  ;;  %4111 = vrot.lane.b32.xlu1 %v8386_v57, %s4758_s25  ;;  %4441 = vmatprep.mubr.msk.bf16.mxu1 %vm774_vm5, %v3214_v28  ;;  %v7092_v18 = vrot.slane %v3223_v31, 7  ;;  %v3005_v11 = vsel %vm2981_vm3, %v2962_v12, %v2700_v49  ;;  %v3124_v53 = vsel %vm3042_vm13, %v7027_v55, %v3123_v40  ;;  %v8404_v35 = vld [vmem:[#allocation98_spill] sm:$0xff] }
 0x3d8   :  { %v2686_v25 = vpop.permute.xlu0 %2685  ;;  %v3200_v3 = vshrl.u32 %v3005_v11, 16  ;;  %v3203_v14 = vshll.u32 %v3005_v11, 16 }
 0x3d9   :  { %v2991_v56 = vsel %vm2981_vm3, %v2948_v50, %v2686_v25  ;;  %v3228_v9 = vor.u32 %v3226_v1, %v7092_v18  ;;  %v8401_v50 = vld [vmem:[#allocation99_spill] sm:$0xff]  ;;  %v4738_v1 = vld [vmem:[#allocation2 + $0x68] sm:$0xff] }
 0x3da   :  { %v3095_v62 = vshrl.u32 %v2991_v56, 16  ;;  %4113 = vrot.lane.b32.xlu0 %v8388_v0, %s4758_s25  ;;  %v3098_v10 = vshll.u32 %v2991_v56, 16  ;;  %v7102_v43 = vrot.slane %v3200_v3, 7  ;;  %v2362_v32 = vpop.permute.xlu1 %2361 }
 0x3db   :  { %4115 = vrot.lane.b32.xlu1 %v8390_v13, %s4758_s25  ;;  %v2750_v30 = vsel %vm774_vm5, %v4737_v36, %v2362_v32  ;;  %v3229_v55 = vsel %vm3042_vm13, %v7034_v20, %v3228_v9  ;;  %v8405_v20 = vld [vmem:[#allocation56_spill] sm:$0xff]  ;;  %v8410_v36 = vld [vmem:[#allocation101_spill] sm:$0xff]  ;;  %v8411_v9 = vld [vmem:[#allocation59_spill] sm:$0xff] }
 0x3dc   :  { %v7095_v54 = vrot.slane %v3095_v62, 7  ;;  %v2348_v34 = vpop.permute.xlu0 %2347  ;;  %v3205_v44 = vor.u32 %v3203_v14, %v7102_v43  ;;  %v2792_v19 = vsel %vm925_vm9, %v2750_v30, %v8395_v47 }
 0x3dd   :  { %v2736_v60 = vsel %vm774_vm5, %v4736_v21, %v2348_v34  ;;  %v2835_v33 = vsel %vm2809_vm15, %v2792_v19, %v8397_v26  ;;  %v8413_v26 = vld [vmem:[#allocation100_spill] sm:$0xff] }
 0x3de   :  { %v3100_v17 = vor.u32 %v3098_v10, %v7095_v54  ;;  %v2778_v39 = vsel %vm925_vm9, %v2736_v60, %v8392_v45  ;;  %4117 = vrot.lane.b32.xlu0 %v8393_v48, %s4758_s25  ;;  %v2561_v37 = vpop.permute.xlu1 %2560  ;;  %v3206_v31 = vsel %vm3042_vm13, %v7046_v23, %v3205_v44  ;;  %v8403_v23 = vld [vmem:[#allocation55_spill] sm:$0xff]  ;;  %v8406_v10 = vld [vmem:[#allocation57_spill] sm:$0xff]  ;;  %v8408_v45 = vld [vmem:[#allocation58_spill] sm:$0xff] }
 0x3df   :  { %v2821_v27 = vsel %vm2809_vm15, %v2778_v39, %v8394_v4  ;;  %4119 = vrot.lane.b32.xlu1 %v8396_v2, %s4758_s25  ;;  %v2878_v51 = vsel %vm2852_vm0, %v2835_v33, %v2561_v37  ;;  %3597 = vmatmul.mubr.bf16.gmra.mrb[16].mxu1 %v3206_v31  ;;  %v8409_v39 = vld [vmem:[#allocation109_spill] sm:$0xff]  ;;  %v8412_v2 = vld [vmem:[#allocation115_spill] sm:$0xff]  ;;  %v8415_v37 = vld [vmem:[#allocation88_spill] sm:$0xff] }
 0x3e0   :  { %v2547_v6 = vpop.permute.xlu0 %2546  ;;  %v3101_v59 = vsel %vm3042_vm13, %v7039_v61, %v3100_v17  ;;  %v8400_v61 = vld [vmem:[#allocation90_spill] sm:$0xff]  ;;  %v2921_v57 = vsel %vm2895_vm1, %v2878_v51, %v8402_v7  ;;  %4442 = vmatprep.mubr.msk.bf16.mxu1 %vm774_vm5, %v3229_v55  ;;  %v8407_v17 = vld [vmem:[#allocation116_spill] sm:$0xff]  ;;  %v3253_v48 = vshrl.u32 %v8409_v39, 16  ;;  %v8417_v51 = vld [vmem:[#allocation61_spill] sm:$0xff] }
 0x3e1   :  { %v2864_v29 = vsel %vm2852_vm0, %v2821_v27, %v2547_v6  ;;  %3541 = vmatmul.mubr.bf16.gmra.mrb[52].mxu0 %v3101_v59  ;;  %v3238_v28 = vshrl.u32 %v8400_v61, 16  ;;  %v2964_v12 = vsel %vm2938_vm2, %v2921_v57, %v8404_v35  ;;  %v3241_v34 = vshll.u32 %v8400_v61, 16  ;;  %v8416_v61 = vld [vmem:[#allocation118_spill] sm:$0xff] }
 0x3e2   :  { %v2907_v5 = vsel %vm2895_vm1, %v2864_v29, %v8398_v41  ;;  %4121 = vrot.lane.b32.xlu0 %v8399_v52, %s4758_s25  ;;  %4435 = vmatprep.mubr.msk.bf16.mxu0 %vm774_vm5, %v3124_v53  ;;  %v2702_v49 = vpop.permute.xlu1 %2701  ;;  %v8414_v53 = vld [vmem:[#allocation60_spill] sm:$0xff]  ;;  %v3255_v41 = vrot.slane %v3253_v48, 7  ;;  %v8419_v35 = vld [vmem:[#allocation62_spill] sm:$0xff] }
 0x3e3   :  { %v2950_v16 = vsel %vm2938_vm2, %v2907_v5, %v8401_v50  ;;  %4123 = vrot.lane.b32.xlu1 %v8403_v23, %s4758_s25  ;;  %v7148_v0 = vrot.slane %v3238_v28, 7  ;;  %v3007_v63 = vsel %vm2981_vm3, %v2964_v12, %v2702_v49  ;;  %v4739_v5 = vld [vmem:[#allocation2 + $0x70] sm:$0xff]  ;;  %v3256_v50 = vshll.u32 %v8409_v39, 16  ;;  %v8421_v49 = vld [vmem:[#allocation119_spill] sm:$0xff] }
 0x3e4   :  { %v2688_v25 = vpop.permute.xlu0 %2687  ;;  %v3215_v42 = vshrl.u32 %v3007_v63, 16  ;;  %v3218_v58 = vshll.u32 %v3007_v63, 16  ;;  %v8420_v12 = vld [vmem:[#allocation117_spill] sm:$0xff] }
 0x3e5   :  { %v2993_v56 = vsel %vm2981_vm3, %v2950_v16, %v2688_v25  ;;  %v3243_v4 = vor.u32 %v3241_v34, %v7148_v0  ;;  %v8418_v16 = vld [vmem:[#allocation102_spill] sm:$0xff] }
 0x3e6   :  { %v3110_v62 = vshrl.u32 %v2993_v56, 16  ;;  %4125 = vrot.lane.b32.xlu0 %v8405_v20, %s4758_s25  ;;  %v3113_v3 = vshll.u32 %v2993_v56, 16  ;;  %v3217_v60 = vrot.slane %v3215_v42, 7  ;;  %v2563_v14 = vpop.permute.xlu1 %2562  ;;  %v3268_v56 = vshrl.u32 %v8420_v12, 16  ;;  %v8422_v42 = vld [vmem:[#allocation103_spill] sm:$0xff] }
 0x3e7   :  { %4127 = vrot.lane.b32.xlu1 %v8406_v10, %s4758_s25  ;;  %v3244_v52 = vsel %vm3042_vm13, %v7092_v18, %v3243_v4  ;;  %v3258_v20 = vor.u32 %v3256_v50, %v3255_v41  ;;  %v8423_v10 = vld [vmem:[#allocation63_spill] sm:$0xff]  ;;  %v3271_v4 = vshll.u32 %v8420_v12, 16  ;;  %v8432_v12 = vld [vmem:[#allocation72_spill] sm:$0xff] }
 0x3e8   :  { %v3112_v11 = vrot.slane %v3110_v62, 7  ;;  %v2364_v13 = vpop.permute.xlu0 %2363  ;;  %v3220_v27 = vor.u32 %v3218_v58, %v3217_v60 }
 0x3e9   :  { %v2752_v21 = vsel %vm774_vm5, %v4738_v1, %v2364_v13  ;;  %v3259_v39 = vsel %vm3042_vm13, %v7148_v0, %v3258_v20 }
 0x3ea   :  { %v3115_v40 = vor.u32 %v3113_v3, %v3112_v11  ;;  %v2794_v32 = vsel %vm925_vm9, %v2752_v21, %v8407_v17  ;;  %4129 = vrot.lane.b32.xlu0 %v8408_v45, %s4758_s25  ;;  %v2366_v59 = vpop.permute.xlu1 %2365  ;;  %v3221_v29 = vsel %vm3042_vm13, %v7102_v43, %v3220_v27  ;;  %v3131_v34 = vsel %vm3042_vm13, %v3112_v11, %v6872_v24  ;;  %v4740_v21 = vld [vmem:[#allocation2 + $0x78] sm:$0xff]  ;;  %v8425_v24 = vld [vmem:[#allocation65_spill] sm:$0xff] }
 0x3eb   :  { %v2837_v30 = vsel %vm2809_vm15, %v2794_v32, %v8410_v36  ;;  %4131 = vrot.lane.b32.xlu1 %v8411_v9, %s4758_s25  ;;  %3605 = vmatmul.mubr.bf16.gmra.mrb[20].mxu1 %v3221_v29  ;;  %v3270_v45 = vrot.slane %v3268_v56, 7  ;;  %v8426_v9 = vld [vmem:[#allocation66_spill] sm:$0xff]  ;;  %v8433_v56 = vld [vmem:[#allocation73_spill] sm:$0xff] }
 0x3ec   :  { %v2880_v44 = vsel %vm2852_vm0, %v2837_v30, %v2563_v14  ;;  %v2704_v47 = vpop.permute.xlu0 %2703  ;;  %v3116_v19 = vsel %vm3042_vm13, %v7095_v54, %v3115_v40  ;;  %v2754_v54 = vsel %vm774_vm5, %v4739_v5, %v2366_v59  ;;  %4443 = vmatprep.mubr.msk.bf16.mxu1 %vm774_vm5, %v3244_v52  ;;  %v8424_v14 = vld [vmem:[#allocation64_spill] sm:$0xff] }
 0x3ed   :  { %v2923_v6 = vsel %vm2895_vm1, %v2880_v44, %v8412_v2  ;;  %3549 = vmatmul.mubr.bf16.gmra.mrb[56].mxu0 %v3116_v19  ;;  %v2796_v28 = vsel %vm925_vm9, %v2754_v54, %v8416_v61  ;;  %v3273_v0 = vor.u32 %v3271_v4, %v3270_v45 }
 0x3ee   :  { %v2966_v33 = vsel %vm2938_vm2, %v2923_v6, %v8413_v26  ;;  %4133 = vrot.lane.b32.xlu0 %v8414_v53, %s4758_s25  ;;  %4436 = vmatprep.mubr.msk.bf16.mxu0 %vm774_vm5, %v8415_v37  ;;  %v2839_v7 = vsel %vm2809_vm15, %v2796_v28, %v8418_v16  ;;  %v2706_v25 = vpop.permute.xlu1 %2705  ;;  %v3283_v6 = vshrl.u32 %v6787_v46, 16  ;;  %v8429_v37 = vld [vmem:[#allocation69_spill] sm:$0xff] }
 0x3ef   :  { %v3009_v31 = vsel %vm2981_vm3, %v2966_v33, %v2704_v47  ;;  %4135 = vrot.lane.b32.xlu1 %v8417_v51, %s4758_s25  ;;  %v8427_v47 = vld [vmem:[#allocation67_spill] sm:$0xff]  ;;  %v8428_v33 = vld [vmem:[#allocation68_spill] sm:$0xff]  ;;  %v3274_v53 = vsel %vm3042_vm13, %v3255_v41, %v3273_v0  ;;  %v3286_v51 = vshll.u32 %v6787_v46, 16 }
 0x3f0   :  { %v3230_v43 = vshrl.u32 %v3009_v31, 16  ;;  %v2565_v55 = vpop.permute.xlu0 %2564  ;;  %v3233_v23 = vshll.u32 %v3009_v31, 16  ;;  %v3285_v31 = vrot.slane %v3283_v6, 7 }
 0x3f1   :  { %v2882_v18 = vsel %vm2852_vm0, %v2839_v7, %v2565_v55  ;;  %v4741_v55 = vld [vmem:[#allocation2 + $0x80] sm:$0xff] }
 0x3f2   :  { %v3232_v57 = vrot.slane %v3230_v43, 7  ;;  %4137 = vrot.lane.b32.xlu0 %v8419_v35, %s4758_s25  ;;  %v2925_v62 = vsel %vm2895_vm1, %v2882_v18, %v8421_v49  ;;  %v2473_v40 = vpop.permute.xlu1 %2472  ;;  %v8430_v43 = vld [vmem:[#allocation70_spill] sm:$0xff]  ;;  %v8431_v7 = vld [vmem:[#allocation71_spill] sm:$0xff] }
 0x3f3   :  { %v2968_v3 = vsel %vm2938_vm2, %v2925_v62, %v8422_v42  ;;  %4139 = vrot.lane.b32.xlu1 %v8423_v10, %s4758_s25  ;;  %v3298_v10 = vshrl.u32 %v6866_v22, 16 }
 0x3f4   :  { %v3235_v63 = vor.u32 %v3233_v23, %v3232_v57  ;;  %v2368_v13 = vpop.permute.xlu0 %2367  ;;  %v3011_v1 = vsel %vm2981_vm3, %v2968_v3, %v2706_v25  ;;  %v3288_v25 = vor.u32 %v3286_v51, %v3285_v31  ;;  %v8434_v3 = vld [vmem:[#allocation74_spill] sm:$0xff] }
 0x3f5   :  { %v2756_v58 = vsel %vm774_vm5, %v4740_v21, %v2368_v13  ;;  %3557 = vmatmul.mubr.bf16.gmra.mrb[60].mxu0 %v3131_v34  ;;  %v3245_v32 = vshrl.u32 %v3011_v1, 16  ;;  %v3248_v30 = vshll.u32 %v3011_v1, 16  ;;  %v8435_v13 = vld [vmem:[#allocation75_spill] sm:$0xff] }
 0x3f6   :  { %4141 = vrot.lane.b32.xlu0 %v8424_v14, %s4758_s25  ;;  %v3236_v17 = vsel %vm3042_vm13, %v3217_v60, %v3235_v63  ;;  %v2798_v11 = vsel %vm925_vm9, %v2756_v58, %v2473_v40  ;;  %v2567_v27 = vpop.permute.xlu1 %2566  ;;  %v3289_v63 = vsel %vm3042_vm13, %v3270_v45, %v3288_v25  ;;  %v8436_v40 = vld [vmem:[#allocation76_spill] sm:$0xff]  ;;  %v3300_v14 = vrot.slane %v3298_v10, 7  ;;  %v8437_v45 = vld [vmem:[#allocation77_spill] sm:$0xff]  ;;  %v8446_v25 = vld [vmem:[#allocation47_spill] sm:$0xff] }
 0x3f7   :  { %3613 = vmatmul.mubr.bf16.gmra.mrb[24].mxu1 %v3236_v17  ;;  %4143 = vrot.lane.b32.xlu1 %v8425_v24, %s4758_s25  ;;  %v3247_v36 = vrot.slane %v3245_v32, 7  ;;  %v3301_v24 = vshll.u32 %v6866_v22, 16 }
 0x3f8   :  { %4444 = vmatprep.mubr.msk.bf16.mxu1 %vm774_vm5, %v3259_v39  ;;  %v2517_v48 = vpop.permute.xlu0 %2516 }
 0x3f9   :  { %v2841_v60 = vsel %vm2809_vm15, %v2798_v11, %v2517_v48  ;;  %v3250_v44 = vor.u32 %v3248_v30, %v3247_v36  ;;  %v8438_v11 = vld [vmem:[#allocation104_spill] sm:$0xff] }
 0x3fa   :  { %4145 = vrot.lane.b32.xlu0 %v8426_v9, %s4758_s25  ;;  %v2884_v19 = vsel %vm2852_vm0, %v2841_v60, %v2567_v27  ;;  %v2658_v26 = vpop.permute.xlu1 %2657  ;;  %v8439_v60 = vld [vmem:[#allocation78_spill] sm:$0xff]  ;;  %v3303_v27 = vor.u32 %v3301_v24, %v3300_v14  ;;  %v8440_v9 = vld [vmem:[#allocation79_spill] sm:$0xff] }
 0x3fb   :  { %4147 = vrot.lane.b32.xlu1 %v8427_v47, %s4758_s25  ;;  %v3251_v29 = vsel %vm3042_vm13, %v3232_v57, %v3250_v44  ;;  %v4743_v24 = vld [vmem:[#allocation2 + $0x98] sm:$0xff] }
 0x3fc   :  { %v2614_v2 = vpop.permute.xlu0 %2613 }
 0x3fd   :  { %v2927_v59 = vsel %vm2895_vm1, %v2884_v19, %v2614_v2  ;;  %v8441_v2 = vld [vmem:[#allocation80_spill] sm:$0xff] }
 0x3fe   :  { %4149 = vrot.lane.b32.xlu0 %v8428_v33, %s4758_s25  ;;  %v2970_v5 = vsel %vm2938_vm2, %v2927_v59, %v2658_v26  ;;  %v2370_v61 = vpop.permute.xlu1 %2369  ;;  %v3304_v59 = vsel %vm3042_vm13, %v3285_v31, %v3303_v27  ;;  %v8442_v26 = vld [vmem:[#allocation81_spill] sm:$0xff] }
 0x3ff   :  { %3621 = vmatmul.mubr.bf16.gmra.mrb[28].mxu1 %v3251_v29  ;;  %4151 = vrot.lane.b32.xlu1 %v8429_v37, %s4758_s25  ;;  %v2758_v41 = vsel %vm774_vm5, %v4741_v55, %v2370_v61 }
 0x400   :  { %4445 = vmatprep.mubr.msk.bf16.mxu1 %vm774_vm5, %v3274_v53  ;;  %v2708_v54 = vpop.permute.xlu0 %2707  ;;  %v3313_v53 = vshrl.u32 %v6966_v8, 16 }
 0x401   :  { %v3013_v52 = vsel %vm2981_vm3, %v2970_v5, %v2708_v54  ;;  %v8443_v54 = vld [vmem:[#allocation82_spill] sm:$0xff] }
 0x402   :  { %v3260_v28 = vshrl.u32 %v3013_v52, 16  ;;  %4153 = vrot.lane.b32.xlu0 %v8430_v43, %s4758_s25  ;;  %v3263_v16 = vshll.u32 %v3013_v52, 16  ;;  %v2519_v35 = vpop.permute.xlu1 %2518  ;;  %v8444_v52 = vld [vmem:[#allocation83_spill] sm:$0xff] }
 0x403   :  { %4155 = vrot.lane.b32.xlu1 %v8431_v7, %s4758_s25 }
 0x404   :  { %v3262_v50 = vrot.slane %v3260_v28, 7  ;;  %v2475_v57 = vpop.permute.xlu0 %2474  ;;  %v3315_v28 = vrot.slane %v3313_v53, 7 }
 0x405   :  { %v2800_v23 = vsel %vm925_vm9, %v2758_v41, %v2475_v57  ;;  %v8445_v41 = vld [vmem:[#allocation46_spill] sm:$0xff] }
 0x406   :  { %v3265_v18 = vor.u32 %v3263_v16, %v3262_v50  ;;  %4157 = vrot.lane.b32.xlu0 %v8432_v12, %s4758_s25  ;;  %v2843_v46 = vsel %vm2809_vm15, %v2800_v23, %v2519_v35  ;;  %v2616_v42 = vpop.permute.xlu1 %2615  ;;  %v4742_v16 = vld [vmem:[#allocation2 + $0x90] sm:$0xff] }
 0x407   :  { %4159 = vrot.lane.b32.xlu1 %v8433_v56, %s4758_s25 }
 0x408   :  { %v2569_v49 = vpop.permute.xlu0 %2568  ;;  %v3266_v62 = vsel %vm3042_vm13, %v3247_v36, %v3265_v18 }
 0x409   :  { %v2886_v20 = vsel %vm2852_vm0, %v2843_v46, %v2569_v49  ;;  %3629 = vmatmul.mubr.bf16.gmra.mrb[32].mxu1 %v3266_v62  ;;  %v8447_v49 = vld [vmem:[#allocation84_spill] sm:$0xff]  ;;  %v2720_v62 = vrot.slane %v6902_v38, 1 }
 0x40a   :  { %4161 = vrot.lane.b32.xlu0 %v8434_v3, %s4758_s25  ;;  %4446 = vmatprep.mubr.msk.bf16.mxu1 %vm774_vm5, %v3289_v63  ;;  %v2929_v34 = vsel %vm2895_vm1, %v2886_v20, %v2616_v42  ;;  %v2710_v58 = vpop.permute.xlu1 %2709 }
 0x40b   :  { %4163 = vrot.lane.b32.xlu1 %v8435_v13, %s4758_s25  ;;  %v2721_v3 = vsel %vm2400_vm12, %v6933_v15, %v2720_v62 }
 0x40c   :  { %v2660_v1 = vpop.permute.xlu0 %2659  ;;  %v3328_v38 = vshrl.u32 %v2721_v3, 16 }
 0x40d   :  { %v2972_v21 = vsel %vm2938_vm2, %v2929_v34, %v2660_v1 }
 0x40e   :  { %4165 = vrot.lane.b32.xlu0 %v8436_v40, %s4758_s25  ;;  %v3015_v17 = vsel %vm2981_vm3, %v2972_v21, %v2710_v58  ;;  %v2477_v4 = vpop.permute.xlu1 %2476 }
 0x40f   :  { %v3275_v32 = vshrl.u32 %v3015_v17, 16  ;;  %4167 = vrot.lane.b32.xlu1 %v8437_v45, %s4758_s25  ;;  %v3278_v30 = vshll.u32 %v3015_v17, 16  ;;  %v2176_v45 = vld [vmem:[#allocation2 + $0xb8] sm:$0x1] }
 0x410   :  { %v2372_v39 = vpop.permute.xlu0 %2371 }
 0x411   :  { %v2760_v48 = vsel %vm774_vm5, %v8438_v11, %v2372_v39  ;;  %v3277_v36 = vrot.slane %v3275_v32, 7  ;;  %v3330_v32 = vrot.slane %v3328_v38, 7 }
 0x412   :  { %4169 = vrot.lane.b32.xlu0 %v8439_v60, %s4758_s25  ;;  %v2802_v44 = vsel %vm925_vm9, %v2760_v48, %v2477_v4  ;;  %v2571_v22 = vpop.permute.xlu1 %2570  ;;  %v2722_v4 = vrot.slane %v2176_v45, 1 }
 0x413   :  { %4171 = vrot.lane.b32.xlu1 %v8440_v9, %s4758_s25  ;;  %v3280_v47 = vor.u32 %v3278_v30, %v3277_v36 }
 0x414   :  { %v2521_v0 = vpop.permute.xlu0 %2520 }
 0x415   :  { %v2845_v19 = vsel %vm2809_vm15, %v2802_v44, %v2521_v0  ;;  %v3281_v6 = vsel %vm3042_vm13, %v3262_v50, %v3280_v47  ;;  %v3316_v50 = vshll.u32 %v6966_v8, 16  ;;  %v8448_v8 = vld [vmem:[#allocation85_spill] sm:$0xff] }
 0x416   :  { %4173 = vrot.lane.b32.xlu0 %v8441_v2, %s4758_s25  ;;  %3637 = vmatmul.mubr.bf16.gmra.mrb[36].mxu1 %v3281_v6  ;;  %v2888_v33 = vsel %vm2852_vm0, %v2845_v19, %v2571_v22  ;;  %v2662_v5 = vpop.permute.xlu1 %2661  ;;  %v2723_v22 = vsel %vm2400_vm12, %v2720_v62, %v2722_v4 }
 0x417   :  { %4175 = vrot.lane.b32.xlu1 %v8442_v26, %s4758_s25  ;;  %4447 = vmatprep.mubr.msk.bf16.mxu1 %vm774_vm5, %v3304_v59  ;;  %v3318_v35 = vor.u32 %v3316_v50, %v3315_v28 }
 0x418   :  { %v2618_v29 = vpop.permute.xlu0 %2617 }
 0x419   :  { %v2931_v37 = vsel %vm2895_vm1, %v2888_v33, %v2618_v29  ;;  %v3319_v13 = vsel %vm3042_vm13, %v3300_v14, %v3318_v35  ;;  %v3331_v14 = vshll.u32 %v2721_v3, 16  ;;  %v3343_v33 = vshrl.u32 %v2723_v22, 16 }
 0x41a   :  { %4177 = vrot.lane.b32.xlu0 %v8443_v54, %s4758_s25  ;;  %v2974_v31 = vsel %vm2938_vm2, %v2931_v37, %v2662_v5  ;;  %v2374_v51 = vpop.permute.xlu1 %2373 }
 0x41b   :  { %4179 = vrot.lane.b32.xlu1 %v8444_v52, %s4758_s25  ;;  %v2762_v7 = vsel %vm774_vm5, %v4742_v16, %v2374_v51  ;;  %v3333_v60 = vor.u32 %v3331_v14, %v3330_v32  ;;  %v3345_v54 = vrot.slane %v3343_v33, 7  ;;  %v3346_v52 = vshll.u32 %v2723_v22, 16  ;;  %v8450_v14 = vld [vmem:[#allocation3_spill] sm:$0xff]  ;;  %v8451_v22 = vld [vmem:[#allocation6_spill] sm:$0xff] }
 0x41c   :  { %v2712_v61 = vpop.permute.xlu0 %2711 }
 0x41d   :  { %v3017_v43 = vsel %vm2981_vm3, %v2974_v31, %v2712_v61  ;;  %v3334_v2 = vsel %vm3042_vm13, %v3315_v28, %v3333_v60  ;;  %v3348_v16 = vor.u32 %v3346_v52, %v3345_v54 }
 0x41e   :  { %v3290_v55 = vshrl.u32 %v3017_v43, 16  ;;  %4181 = vrot.lane.b32.xlu0 %v8445_v41, %s4758_s25  ;;  %v3293_v23 = vshll.u32 %v3017_v43, 16  ;;  %v2523_v46 = vpop.permute.xlu1 %2522  ;;  %v4744_v43 = vld [vmem:[#allocation2 + $0xa0] sm:$0xff] }
 0x41f   :  { %4183 = vrot.lane.b32.xlu1 %v8446_v25, %s4758_s25 }
 0x420   :  { %v3292_v57 = vrot.slane %v3290_v55, 7  ;;  %v2479_v18 = vpop.permute.xlu0 %2478 }
 0x421   :  { %v2804_v12 = vsel %vm925_vm9, %v2762_v7, %v2479_v18 }
 0x422   :  { %v3295_v56 = vor.u32 %v3293_v23, %v3292_v57  ;;  %4185 = vrot.lane.b32.xlu0 %v8447_v49, %s4758_s25  ;;  %v2847_v20 = vsel %vm2809_vm15, %v2804_v12, %v2523_v46  ;;  %v2620_v34 = vpop.permute.xlu1 %2619  ;;  %v3349_v12 = vsel %vm3042_vm13, %v3330_v32, %v3348_v16 }
 0x423   :  { %4187 = vrot.lane.b32.xlu1 %v8448_v8, %s4758_s25 }
 0x424   :  { %v2573_v63 = vpop.permute.xlu0 %2572  ;;  %v3296_v42 = vsel %vm3042_vm13, %v3277_v36, %v3295_v56 }
 0x425   :  { %v2890_v10 = vsel %vm2852_vm0, %v2847_v20, %v2573_v63  ;;  %3645 = vmatmul.mubr.bf16.gmra.mrb[40].mxu1 %v3296_v42 }
 0x426   :  { %4448 = vmatprep.mubr.msk.bf16.mxu1 %vm774_vm5, %v3319_v13  ;;  %v2933_v1 = vsel %vm2895_vm1, %v2890_v10, %v2620_v34  ;;  %v2714_v40 = vpop.permute.xlu1 %2713 }
 0x428   :  { %v2664_v21 = vpop.permute.xlu0 %2663 }
 0x429   :  { %v2976_v58 = vsel %vm2938_vm2, %v2933_v1, %v2664_v21 }
 0x42a   :  { %v3019_v17 = vsel %vm2981_vm3, %v2976_v58, %v2714_v40  ;;  %v2481_v30 = vpop.permute.xlu1 %2480  ;;  %v8449_v40 = vld [vmem:[#allocation4_spill] sm:$0xff] }
 0x42b   :  { %v3305_v15 = vshrl.u32 %v3019_v17, 16  ;;  %v3308_v36 = vshll.u32 %v3019_v17, 16 }
 0x42c   :  { %v2376_v39 = vpop.permute.xlu0 %2375 }
 0x42d   :  { %v2764_v11 = vsel %vm774_vm5, %v4743_v24, %v2376_v39  ;;  %v3307_v48 = vrot.slane %v3305_v15, 7 }
 0x42e   :  { %v2806_v27 = vsel %vm925_vm9, %v2764_v11, %v2481_v30  ;;  %v2575_v47 = vpop.permute.xlu1 %2574 }
 0x42f   :  { %v3310_v44 = vor.u32 %v3308_v36, %v3307_v48 }
 0x430   :  { %v2525_v9 = vpop.permute.xlu0 %2524 }
 0x431   :  { %v2849_v0 = vsel %vm2809_vm15, %v2806_v27, %v2525_v9  ;;  %v3311_v19 = vsel %vm3042_vm13, %v3292_v57, %v3310_v44 }
 0x432   :  { %3653 = vmatmul.mubr.bf16.gmra.mrb[44].mxu1 %v3311_v19  ;;  %v2892_v6 = vsel %vm2852_vm0, %v2849_v0, %v2575_v47  ;;  %v2666_v29 = vpop.permute.xlu1 %2665 }
 0x433   :  { %4449 = vmatprep.mubr.msk.bf16.mxu1 %vm774_vm5, %v3334_v2 }
 0x434   :  { %v2622_v59 = vpop.permute.xlu0 %2621 }
 0x435   :  { %v2935_v26 = vsel %vm2895_vm1, %v2892_v6, %v2622_v59 }
 0x436   :  { %v2978_v53 = vsel %vm2938_vm2, %v2935_v26, %v2666_v29  ;;  %v2378_v31 = vpop.permute.xlu1 %2377 }
 0x437   :  { %v2766_v28 = vsel %vm774_vm5, %v4744_v43, %v2378_v31 }
 0x438   :  { %v2716_v37 = vpop.permute.xlu0 %2715 }
 0x439   :  { %v3021_v5 = vsel %vm2981_vm3, %v2978_v53, %v2716_v37  ;;  %v8452_v37 = vld [vmem:[#allocation5_spill] sm:$0xff] }
 0x43a   :  { %v3320_v61 = vshrl.u32 %v3021_v5, 16  ;;  %v3323_v55 = vshll.u32 %v3021_v5, 16  ;;  %v2527_v57 = vpop.permute.xlu1 %2526 }
 0x43c   :  { %v3322_v51 = vrot.slane %v3320_v61, 7  ;;  %v2483_v41 = vpop.permute.xlu0 %2482 }
 0x43d   :  { %v2808_v50 = vsel %vm925_vm9, %v2766_v28, %v2483_v41 }
 0x43e   :  { %v3325_v7 = vor.u32 %v3323_v55, %v3322_v51  ;;  %v2851_v23 = vsel %vm2809_vm15, %v2808_v50, %v2527_v57  ;;  %v2624_v56 = vpop.permute.xlu1 %2623  ;;  %v8453_v57 = vld [vmem:[#allocation8_spill] sm:$0xff] }
 0x440   :  { %v2577_v25 = vpop.permute.xlu0 %2576  ;;  %v3326_v18 = vsel %vm3042_vm13, %v3307_v48, %v3325_v7 }
 0x441   :  { %v2894_v35 = vsel %vm2852_vm0, %v2851_v23, %v2577_v25  ;;  %3661 = vmatmul.mubr.bf16.gmra.mrb[48].mxu1 %v3326_v18 }
 0x442   :  { %4450 = vmatprep.mubr.msk.bf16.mxu1 %vm774_vm5, %v3349_v12  ;;  %v2937_v46 = vsel %vm2895_vm1, %v2894_v35, %v2624_v56  ;;  %v2718_v8 = vpop.permute.xlu1 %2717 }
 0x444   :  { %v2668_v49 = vpop.permute.xlu0 %2667 }
 0x445   :  { %v2980_v62 = vsel %vm2938_vm2, %v2937_v46, %v2668_v49  ;;  %v8454_v49 = vld [vmem:[#allocation10_spill] sm:$0xff] }
 0x446   :  { %v3023_v20 = vsel %vm2981_vm3, %v2980_v62, %v2718_v8 }
 0x447   :  { %v3335_v63 = vshrl.u32 %v3023_v20, 16  ;;  %v3338_v3 = vshll.u32 %v3023_v20, 16 }
 0x449   :  { %v3337_v42 = vrot.slane %v3335_v63, 7 }
 0x44b   :  { %v3340_v10 = vor.u32 %v3338_v3, %v3337_v42 }
 0x44d   :  { %v3341_v13 = vsel %vm3042_vm13, %v3322_v51, %v3340_v10 }
 0x44e   :  { %3669 = vmatmul.mubr.bf16.gmra.mrb[52].mxu1 %v3341_v13 }
 0x486   :  { %v7328_v34 = vpop.f32.mrb[0].mxu1 }
 0x487   :  { %v3568_v38 = vpop.f32.mrb[1].mxu1 }
 0x488   :  { %v7330_v1 = vpop.f32.mrb[2].mxu1 }
 0x489   :  { %v3571_v21 = vpop.f32.mrb[3].mxu1 }
 0x48f   :  { %v7336_v32 = vpop.f32.mrb[4].mxu1 }
 0x490   :  { %v7332_v58 = vpop.f32.mrb[40].mxu0  ;;  %v3576_v15 = vpop.f32.mrb[5].mxu1 }
 0x491   :  { %v3679_v17 = vmul.f32 %v8449_v40, %v7332_v58  ;;  %v3520_v45 = vpop.f32.mrb[41].mxu0  ;;  %v7340_v24 = vpop.f32.mrb[6].mxu1  ;;  %v8455_v15 = vld [vmem:[#allocation7_spill] sm:$0xff] }
 0x492   :  { %v7338_v39 = vpop.f32.mrb[42].mxu0  ;;  %v3579_v30 = vpop.f32.mrb[7].mxu1 }
 0x493   :  { %v3804_v11 = vmul.f32 %v3679_v17, %v7332_v58  ;;  %v3680_v48 = vmul.f32 %v8450_v14, %v7338_v39  ;;  %v3523_v36 = vpop.f32.mrb[43].mxu0  ;;  %v3719_v4 = vsel %vm774_vm5, %v3679_v17, 0.0 }
 0x495   :  { %v3720_v60 = vsel %vm774_vm5, %v3680_v48, 0.0  ;;  %v3805_v27 = vmul.f32 %v3680_v48, %v7338_v39  ;;  %v3844_v44 = vsel %vm774_vm5, %v3804_v11, 0.0 }
 0x496   :  { %v3721_v9 = vadd.f32 %v3720_v60, %v3719_v4 }
 0x497   :  { %v3845_v0 = vsel %vm774_vm5, %v3805_v27, 0.0  ;;  %v8456_v27 = vld [vmem:[#allocation9_spill] sm:$0xff] }
 0x498   :  { %v3846_v47 = vadd.f32 %v3845_v0, %v3844_v44 }
 0x49b   :  { %v7354_v59 = vpop.f32.mrb[8].mxu1 }
 0x49c   :  { %v7350_v19 = vpop.f32.mrb[44].mxu0  ;;  %v3584_v53 = vpop.f32.mrb[9].mxu1 }
 0x49d   :  { %v3681_v2 = vmul.f32 %v8451_v22, %v7350_v19  ;;  %v3528_v6 = vpop.f32.mrb[45].mxu0  ;;  %v7362_v31 = vpop.f32.mrb[10].mxu1 }
 0x49e   :  { %v7356_v26 = vpop.f32.mrb[46].mxu0  ;;  %v3587_v28 = vpop.f32.mrb[11].mxu1 }
 0x49f   :  { %v3722_v33 = vsel %vm774_vm5, %v3681_v2, 0.0  ;;  %v3806_v29 = vmul.f32 %v3681_v2, %v7350_v19  ;;  %v3682_v5 = vmul.f32 %v8452_v37, %v7356_v26  ;;  %v3531_v54 = vpop.f32.mrb[47].mxu0 }
 0x4a0   :  { %v3723_v52 = vadd.f32 %v3722_v33, %v3721_v9 }
 0x4a1   :  { %v3847_v61 = vsel %vm774_vm5, %v3806_v29, 0.0  ;;  %v3724_v43 = vsel %vm774_vm5, %v3682_v5, 0.0  ;;  %v3807_v41 = vmul.f32 %v3682_v5, %v7356_v26 }
 0x4a2   :  { %v3848_v51 = vadd.f32 %v3847_v61, %v3846_v47  ;;  %v3725_v55 = vadd.f32 %v3724_v43, %v3723_v52  ;;  %v8457_v52 = vld [vmem:[#allocation12_spill] sm:$0xff] }
 0x4a3   :  { %v3849_v50 = vsel %vm774_vm5, %v3807_v41, 0.0 }
 0x4a4   :  { %v3850_v16 = vadd.f32 %v3849_v50, %v3848_v51 }
 0x4a8   :  { %v7368_v7 = vpop.f32.mrb[48].mxu0  ;;  %v7372_v18 = vpop.f32.mrb[12].mxu1 }
 0x4a9   :  { %v3683_v23 = vmul.f32 %v8453_v57, %v7368_v7  ;;  %v3536_v25 = vpop.f32.mrb[49].mxu0  ;;  %v3592_v46 = vpop.f32.mrb[13].mxu1 }
 0x4aa   :  { %v7374_v35 = vpop.f32.mrb[50].mxu0  ;;  %v7380_v63 = vpop.f32.mrb[14].mxu1 }
 0x4ab   :  { %v3726_v12 = vsel %vm774_vm5, %v3683_v23, 0.0  ;;  %v3808_v56 = vmul.f32 %v3683_v23, %v7368_v7  ;;  %v3684_v62 = vmul.f32 %v8454_v49, %v7374_v35  ;;  %v3539_v8 = vpop.f32.mrb[51].mxu0  ;;  %v3595_v10 = vpop.f32.mrb[15].mxu1 }
 0x4ac   :  { %v3727_v20 = vadd.f32 %v3726_v12, %v3725_v55 }
 0x4ad   :  { %v3851_v42 = vsel %vm774_vm5, %v3808_v56, 0.0  ;;  %v3728_v3 = vsel %vm774_vm5, %v3684_v62, 0.0  ;;  %v3809_v21 = vmul.f32 %v3684_v62, %v7374_v35 }
 0x4ae   :  { %v3852_v13 = vadd.f32 %v3851_v42, %v3850_v16  ;;  %v3729_v38 = vadd.f32 %v3728_v3, %v3727_v20  ;;  %v8458_v16 = vld [vmem:[#allocation14_spill] sm:$0xff]  ;;  %v8459_v42 = vld [vmem:[#allocation16_spill] sm:$0xff] }
 0x4af   :  { %v3853_v40 = vsel %vm774_vm5, %v3809_v21, 0.0  ;;  %v3691_v3 = vmul.f32 %v8459_v42, %v7328_v34  ;;  %v8460_v21 = vld [vmem:[#allocation11_spill] sm:$0xff] }
 0x4b0   :  { %v3854_v17 = vadd.f32 %v3853_v40, %v3852_v13 }
 0x4b2   :  { %v7390_v48 = vpop.f32.mrb[16].mxu1 }
 0x4b3   :  { %v3600_v60 = vpop.f32.mrb[17].mxu1 }
 0x4b4   :  { %v7386_v45 = vpop.f32.mrb[52].mxu0  ;;  %v7398_v47 = vpop.f32.mrb[18].mxu1 }
 0x4b5   :  { %v3685_v11 = vmul.f32 %v8455_v15, %v7386_v45  ;;  %v3544_v14 = vpop.f32.mrb[53].mxu0  ;;  %v3603_v6 = vpop.f32.mrb[19].mxu1 }
 0x4b6   :  { %v7392_v36 = vpop.f32.mrb[54].mxu0  ;;  %v8461_v14 = vld [vmem:[#allocation18_spill] sm:$0xff] }
 0x4b7   :  { %v3730_v30 = vsel %vm774_vm5, %v3685_v11, 0.0  ;;  %v3810_v4 = vmul.f32 %v3685_v11, %v7386_v45  ;;  %v3686_v9 = vmul.f32 %v8456_v27, %v7392_v36  ;;  %v3547_v44 = vpop.f32.mrb[55].mxu0  ;;  %v8462_v27 = vld [vmem:[#allocation13_spill] sm:$0xff] }
 0x4b8   :  { %v3731_v0 = vadd.f32 %v3730_v30, %v3729_v38  ;;  %v3692_v30 = vmul.f32 %v8461_v14, %v7330_v1 }
 0x4b9   :  { %v3855_v22 = vsel %vm774_vm5, %v3810_v4, 0.0  ;;  %v3732_v2 = vsel %vm774_vm5, %v3686_v9, 0.0  ;;  %v3811_v53 = vmul.f32 %v3686_v9, %v7392_v36 }
 0x4ba   :  { %v3856_v33 = vadd.f32 %v3855_v22, %v3854_v17  ;;  %v3733_v29 = vadd.f32 %v3732_v2, %v3731_v0  ;;  %v3816_v22 = vmul.f32 %v3691_v3, %v7328_v34 }
 0x4bb   :  { %v3857_v37 = vsel %vm774_vm5, %v3811_v53, 0.0 }
 0x4bc   :  { %v3858_v5 = vadd.f32 %v3857_v37, %v3856_v33  ;;  %v8463_v33 = vld [vmem:[#allocation15_spill] sm:$0xff] }
 0x4be   :  { %v7408_v28 = vpop.f32.mrb[20].mxu1 }
 0x4bf   :  { %v3608_v50 = vpop.f32.mrb[21].mxu1 }
 0x4c0   :  { %v7404_v54 = vpop.f32.mrb[56].mxu0  ;;  %v7416_v12 = vpop.f32.mrb[22].mxu1  ;;  %v8464_v50 = vld [vmem:[#allocation17_spill] sm:$0xff] }
 0x4c1   :  { %v3687_v61 = vmul.f32 %v8457_v52, %v7404_v54  ;;  %v3552_v43 = vpop.f32.mrb[57].mxu0  ;;  %v3611_v49 = vpop.f32.mrb[23].mxu1 }
 0x4c2   :  { %v7410_v51 = vpop.f32.mrb[58].mxu0 }
 0x4c3   :  { %v3734_v55 = vsel %vm774_vm5, %v3687_v61, 0.0  ;;  %v3812_v41 = vmul.f32 %v3687_v61, %v7404_v54  ;;  %v3688_v57 = vmul.f32 %v8458_v16, %v7410_v51  ;;  %v3555_v23 = vpop.f32.mrb[59].mxu0  ;;  %v3694_v16 = vmul.f32 %v8464_v50, %v7340_v24 }
 0x4c4   :  { %v3735_v25 = vadd.f32 %v3734_v55, %v3733_v29  ;;  %v3693_v29 = vmul.f32 %v8463_v33, %v7336_v32  ;;  %v3742_v55 = vsel %vm774_vm5, %v3691_v3, 0.0 }
 0x4c5   :  { %v3859_v56 = vsel %vm774_vm5, %v3812_v41, 0.0  ;;  %v3736_v46 = vsel %vm774_vm5, %v3688_v57, 0.0  ;;  %v3813_v20 = vmul.f32 %v3688_v57, %v7410_v51  ;;  %v3817_v41 = vmul.f32 %v3692_v30, %v7330_v1 }
 0x4c6   :  { %v3860_v62 = vadd.f32 %v3859_v56, %v3858_v5  ;;  %v3737_v8 = vadd.f32 %v3736_v46, %v3735_v25  ;;  %v3867_v56 = vsel %vm774_vm5, %v3816_v22, 0.0  ;;  %v3744_v46 = vsel %vm774_vm5, %v3692_v30, 0.0 }
 0x4c7   :  { %v3861_v10 = vsel %vm774_vm5, %v3813_v20, 0.0  ;;  %v3818_v49 = vmul.f32 %v3693_v29, %v7336_v32 }
 0x4c8   :  { %v7424_v13 = vpop.f32.mrb[60].mxu0  ;;  %v3862_v38 = vadd.f32 %v3861_v10, %v3860_v62  ;;  %v8465_v62 = vld [vmem:[#allocation20_spill] sm:$0xff]  ;;  %v3869_v10 = vsel %vm774_vm5, %v3817_v41, 0.0 }
 0x4c9   :  { %v3689_v40 = vmul.f32 %v8460_v21, %v7424_v13  ;;  %v3560_v17 = vpop.f32.mrb[61].mxu0  ;;  %v3819_v21 = vmul.f32 %v3694_v16, %v7340_v24 }
 0x4ca   :  { %v7428_v15 = vpop.f32.mrb[62].mxu0  ;;  %v7430_v11 = vpop.f32.mrb[24].mxu1 }
 0x4cb   :  { %v3738_v4 = vsel %vm774_vm5, %v3689_v40, 0.0  ;;  %v3814_v60 = vmul.f32 %v3689_v40, %v7424_v13  ;;  %v3690_v9 = vmul.f32 %v8462_v27, %v7428_v15  ;;  %v3563_v44 = vpop.f32.mrb[63].mxu0  ;;  %v3616_v0 = vpop.f32.mrb[25].mxu1  ;;  %v8466_v40 = vld [vmem:[#allocation22_spill] sm:$0xff]  ;;  %v3871_v27 = vsel %vm774_vm5, %v3818_v49, 0.0 }
 0x4cc   :  { %v3739_v2 = vadd.f32 %v3738_v4, %v3737_v8  ;;  %v7439_v6 = vpop.f32.mrb[26].mxu1  ;;  %v3695_v8 = vmul.f32 %v8465_v62, %v7354_v59  ;;  %v3696_v17 = vmul.f32 %v8466_v40, %v7362_v31  ;;  %v8467_v0 = vld [vmem:[#allocation19_spill] sm:$0xff] }
 0x4cd   :  { %v3863_v53 = vsel %vm774_vm5, %v3814_v60, 0.0  ;;  %v3740_v37 = vsel %vm774_vm5, %v3690_v9, 0.0  ;;  %v3815_v5 = vmul.f32 %v3690_v9, %v7428_v15  ;;  %v3619_v52 = vpop.f32.mrb[27].mxu1  ;;  %v3748_v9 = vsel %vm774_vm5, %v3694_v16, 0.0 }
 0x4ce   :  { %v3864_v61 = vadd.f32 %v3863_v53, %v3862_v38  ;;  %v3741_v43 = vadd.f32 %v3740_v37, %v3739_v2  ;;  %v3746_v38 = vsel %vm774_vm5, %v3693_v29, 0.0  ;;  %v3820_v44 = vmul.f32 %v3695_v8, %v7354_v59  ;;  %v8468_v52 = vld [vmem:[#allocation21_spill] sm:$0xff] }
 0x4cf   :  { %v3865_v57 = vsel %vm774_vm5, %v3815_v5, 0.0  ;;  %v3697_v22 = vmul.f32 %v8467_v0, %v7372_v18  ;;  %v3873_v53 = vsel %vm774_vm5, %v3819_v21, 0.0  ;;  %v3750_v37 = vsel %vm774_vm5, %v3695_v8, 0.0  ;;  %v8470_v8 = vld [vmem:[#allocation26_spill] sm:$0xff] }
 0x4d0   :  { %v3743_v23 = vadd.f32 %v3742_v55, %v3741_v43  ;;  %v3866_v25 = vadd.f32 %v3865_v57, %v3864_v61  ;;  %v3821_v5 = vmul.f32 %v3696_v17, %v7362_v31  ;;  %v3698_v61 = vmul.f32 %v8468_v52, %v7380_v63  ;;  %v8469_v57 = vld [vmem:[#allocation24_spill] sm:$0xff] }
 0x4d1   :  { %v3875_v41 = vsel %vm774_vm5, %v3820_v44, 0.0  ;;  %v3752_v50 = vsel %vm774_vm5, %v3696_v17, 0.0  ;;  %v3822_v16 = vmul.f32 %v3697_v22, %v7372_v18  ;;  %v3754_v49 = vsel %vm774_vm5, %v3697_v22, 0.0 }
 0x4d2   :  { %v3745_v20 = vadd.f32 %v3744_v46, %v3743_v23  ;;  %v3868_v42 = vadd.f32 %v3867_v56, %v3866_v25  ;;  %v7456_v3 = vpop.f32.mrb[28].mxu1  ;;  %v3699_v23 = vmul.f32 %v8469_v57, %v7390_v48  ;;  %v3877_v46 = vsel %vm774_vm5, %v3821_v5, 0.0 }
 0x4d3   :  { %v3624_v14 = vpop.f32.mrb[29].mxu1  ;;  %v3823_v62 = vmul.f32 %v3698_v61, %v7380_v63  ;;  %v3879_v21 = vsel %vm774_vm5, %v3822_v16, 0.0  ;;  %v3756_v40 = vsel %vm774_vm5, %v3698_v61, 0.0 }
 0x4d4   :  { %v3747_v30 = vadd.f32 %v3746_v38, %v3745_v20  ;;  %v3870_v4 = vadd.f32 %v3869_v10, %v3868_v42  ;;  %v7463_v60 = vpop.f32.mrb[30].mxu1  ;;  %v3700_v20 = vmul.f32 %v8470_v8, %v7398_v47  ;;  %v3824_v17 = vmul.f32 %v3699_v23, %v7390_v48  ;;  %v8471_v14 = vld [vmem:[#allocation23_spill] sm:$0xff] }
 0x4d5   :  { %v3627_v2 = vpop.f32.mrb[31].mxu1  ;;  %v3881_v0 = vsel %vm774_vm5, %v3823_v62, 0.0  ;;  %v3758_v22 = vsel %vm774_vm5, %v3699_v23, 0.0 }
 0x4d6   :  { %v3749_v33 = vadd.f32 %v3748_v9, %v3747_v30  ;;  %v3872_v29 = vadd.f32 %v3871_v27, %v3870_v4  ;;  %v3701_v30 = vmul.f32 %v8471_v14, %v7408_v28  ;;  %v3825_v2 = vmul.f32 %v3700_v20, %v7398_v47 }
 0x4d7   :  { %v3883_v52 = vsel %vm774_vm5, %v3824_v17, 0.0  ;;  %v3760_v61 = vsel %vm774_vm5, %v3700_v20, 0.0 }
 0x4d8   :  { %v3751_v43 = vadd.f32 %v3750_v37, %v3749_v33  ;;  %v3874_v55 = vadd.f32 %v3873_v53, %v3872_v29  ;;  %v8472_v33 = vld [vmem:[#allocation25_spill] sm:$0xff]  ;;  %v3885_v57 = vsel %vm774_vm5, %v3825_v2, 0.0  ;;  %v3762_v23 = vsel %vm774_vm5, %v3701_v30, 0.0 }
 0x4d9   :  { %v3702_v29 = vmul.f32 %v8472_v33, %v7416_v12 }
 0x4da   :  { %v3753_v25 = vadd.f32 %v3752_v50, %v3751_v43  ;;  %v3876_v56 = vadd.f32 %v3875_v41, %v3874_v55  ;;  %v3826_v43 = vmul.f32 %v3701_v30, %v7408_v28  ;;  %v8473_v55 = vld [vmem:[#allocation28_spill] sm:$0xff] }
 0x4db   :  { %v3703_v41 = vmul.f32 %v8473_v55, %v7430_v11  ;;  %v3764_v20 = vsel %vm774_vm5, %v3702_v29, 0.0 }
 0x4dc   :  { %v3878_v42 = vadd.f32 %v3877_v46, %v3876_v56  ;;  %v3755_v10 = vadd.f32 %v3754_v49, %v3753_v25  ;;  %v7485_v38 = vpop.f32.mrb[32].mxu1  ;;  %v3827_v25 = vmul.f32 %v3702_v29, %v7416_v12  ;;  %v8474_v56 = vld [vmem:[#allocation30_spill] sm:$0xff]  ;;  %v3887_v8 = vsel %vm774_vm5, %v3826_v43, 0.0 }
 0x4dd   :  { %v3632_v4 = vpop.f32.mrb[33].mxu1  ;;  %v3704_v46 = vmul.f32 %v8474_v56, %v7439_v6  ;;  %v3766_v30 = vsel %vm774_vm5, %v3703_v41, 0.0 }
 0x4de   :  { %v3757_v27 = vadd.f32 %v3756_v40, %v3755_v10  ;;  %v3880_v9 = vadd.f32 %v3879_v21, %v3878_v42  ;;  %v7492_v44 = vpop.f32.mrb[34].mxu1  ;;  %v3828_v42 = vmul.f32 %v3703_v41, %v7430_v11  ;;  %v8475_v10 = vld [vmem:[#allocation27_spill] sm:$0xff]  ;;  %v3889_v14 = vsel %vm774_vm5, %v3827_v25, 0.0 }
 0x4df   :  { %v3635_v53 = vpop.f32.mrb[35].mxu1  ;;  %v3705_v21 = vmul.f32 %v8475_v10, %v7456_v3  ;;  %v3829_v4 = vmul.f32 %v3704_v46, %v7439_v6  ;;  %v3768_v33 = vsel %vm774_vm5, %v3704_v46, 0.0 }
 0x4e0   :  { %v3759_v37 = vadd.f32 %v3758_v22, %v3757_v27  ;;  %v3882_v5 = vadd.f32 %v3881_v0, %v3880_v9  ;;  %v8476_v27 = vld [vmem:[#allocation29_spill] sm:$0xff]  ;;  %v3891_v2 = vsel %vm774_vm5, %v3828_v42, 0.0  ;;  %v8477_v53 = vld [vmem:[#allocation34_spill] sm:$0xff] }
 0x4e1   :  { %v3706_v9 = vmul.f32 %v8476_v27, %v7463_v60  ;;  %v3830_v29 = vmul.f32 %v3705_v21, %v7456_v3  ;;  %v3893_v43 = vsel %vm774_vm5, %v3829_v4, 0.0  ;;  %v3770_v55 = vsel %vm774_vm5, %v3705_v21, 0.0 }
 0x4e2   :  { %v3761_v50 = vadd.f32 %v3760_v61, %v3759_v37  ;;  %v3884_v16 = vadd.f32 %v3883_v52, %v3882_v5  ;;  %v3707_v37 = vmul.f32 %v8477_v53, %v7485_v38 }
 0x4e3   :  { %v3831_v41 = vmul.f32 %v3706_v9, %v7463_v60  ;;  %v3895_v46 = vsel %vm774_vm5, %v3830_v29, 0.0 }
 0x4e4   :  { %v3763_v49 = vadd.f32 %v3762_v23, %v3761_v50  ;;  %v3886_v62 = vadd.f32 %v3885_v57, %v3884_v16  ;;  %v8478_v50 = vld [vmem:[#allocation36_spill] sm:$0xff] }
 0x4e5   :  { %v3708_v16 = vmul.f32 %v8478_v50, %v7492_v44 }
 0x4e6   :  { %v3765_v40 = vadd.f32 %v3764_v20, %v3763_v49  ;;  %v3888_v17 = vadd.f32 %v3887_v8, %v3886_v62  ;;  %v3772_v49 = vsel %vm774_vm5, %v3706_v9, 0.0  ;;  %v3832_v62 = vmul.f32 %v3707_v37, %v7485_v38  ;;  %v8479_v8 = vld [vmem:[#allocation33_spill] sm:$0xff] }
 0x4e8   :  { %v3767_v0 = vadd.f32 %v3766_v30, %v3765_v40  ;;  %v3890_v22 = vadd.f32 %v3889_v14, %v3888_v17  ;;  %v3897_v40 = vsel %vm774_vm5, %v3831_v41, 0.0  ;;  %v3774_v17 = vsel %vm774_vm5, %v3707_v37, 0.0  ;;  %v8480_v30 = vld [vmem:[#allocation35_spill] sm:$0xff] }
 0x4e9   :  { %v7524_v61 = vpop.f32.mrb[36].mxu1  ;;  %v3833_v14 = vmul.f32 %v3708_v16, %v7492_v44  ;;  %v3899_v9 = vsel %vm774_vm5, %v3832_v62, 0.0 }
 0x4ea   :  { %v3892_v5 = vadd.f32 %v3891_v2, %v3890_v22  ;;  %v3769_v52 = vadd.f32 %v3768_v33, %v3767_v0  ;;  %v3640_v57 = vpop.f32.mrb[37].mxu1  ;;  %v3709_v20 = vmul.f32 %v8479_v8, %v7524_v61  ;;  %v3776_v22 = vsel %vm774_vm5, %v3708_v16, 0.0 }
 0x4eb   :  { %v7531_v56 = vpop.f32.mrb[38].mxu1  ;;  %v3901_v53 = vsel %vm774_vm5, %v3833_v14, 0.0  ;;  %v7562_v14 = vpop.permute.xlu0 %4109 }
 0x4ec   :  { %v3894_v23 = vadd.f32 %v3893_v43, %v3892_v5  ;;  %v3771_v25 = vadd.f32 %v3770_v55, %v3769_v52  ;;  %v3643_v42 = vpop.f32.mrb[39].mxu1  ;;  %v3710_v4 = vmul.f32 %v8480_v30, %v7531_v56  ;;  %v3834_v2 = vmul.f32 %v3709_v20, %v7524_v61 }
 0x4ed   :  { %v3778_v5 = vsel %vm774_vm5, %v3709_v20, 0.0 }
 0x4ee   :  { %v3896_v10 = vadd.f32 %v3895_v46, %v3894_v23  ;;  %v3773_v21 = vadd.f32 %v3772_v49, %v3771_v25  ;;  %v3835_v37 = vmul.f32 %v3710_v4, %v7531_v56  ;;  %v3903_v55 = vsel %vm774_vm5, %v3834_v2, 0.0  ;;  %v8481_v46 = vld [vmem:[#allocation38_spill] sm:$0xff] }
 0x4ef   :  { %v3780_v41 = vsel %vm774_vm5, %v3710_v4, 0.0 }
 0x4f0   :  { %v3898_v27 = vadd.f32 %v3897_v40, %v3896_v10  ;;  %v3775_v0 = vadd.f32 %v3774_v17, %v3773_v21  ;;  %v3905_v16 = vsel %vm774_vm5, %v3835_v37, 0.0  ;;  %v8482_v10 = vld [vmem:[#allocation40_spill] sm:$0xff]  ;;  %v8485_v37 = vld [vmem:[#allocation37_spill] sm:$0xff] }
 0x4f2   :  { %v3900_v33 = vadd.f32 %v3899_v9, %v3898_v27  ;;  %v3777_v29 = vadd.f32 %v3776_v22, %v3775_v0  ;;  %v7567_v0 = vpop.permute.xlu1 %4111 }
 0x4f4   :  { %v3902_v52 = vadd.f32 %v3901_v53, %v3900_v33  ;;  %v3779_v43 = vadd.f32 %v3778_v5, %v3777_v29  ;;  %v7570_v29 = vpop.permute.xlu0 %4113 }
 0x4f5   :  { %8483 = vst [vmem:[#allocation31_spill] sm:$0xff] %v7570_v29 }
 0x4f6   :  { %v3904_v50 = vadd.f32 %v3903_v55, %v3902_v52  ;;  %v3781_v57 = vadd.f32 %v3780_v41, %v3779_v43  ;;  %v7572_v53 = vpop.permute.xlu1 %4115 }
 0x4f7   :  { %8484 = vst [vmem:[#allocation91_spill] sm:$0xff] %v7572_v53 }
 0x4f8   :  { %v3906_v23 = vadd.f32 %v3905_v16, %v3904_v50  ;;  %v7552_v25 = vpop.f32.mrb[40].mxu1  ;;  %v7580_v41 = vpop.permute.xlu0 %4117  ;;  %v8487_v16 = vld [vmem:[#allocation39_spill] sm:$0xff] }
 0x4f9   :  { %v3711_v49 = vmul.f32 %v8481_v46, %v7552_v25  ;;  %v3648_v62 = vpop.f32.mrb[41].mxu1  ;;  %8486 = vst [vmem:[#allocation105_spill] sm:$0xff] %v7580_v41 }
 0x4fa   :  { %v7556_v8 = vpop.f32.mrb[42].mxu1 }
 0x4fb   :  { %v3782_v20 = vsel %vm774_vm5, %v3711_v49, 0.0  ;;  %v3836_v42 = vmul.f32 %v3711_v49, %v7552_v25  ;;  %v3712_v21 = vmul.f32 %v8482_v10, %v7556_v8  ;;  %v3651_v40 = vpop.f32.mrb[43].mxu1  ;;  %v7586_v49 = vpop.permute.xlu1 %4119 }
 0x4fc   :  { %v3783_v17 = vadd.f32 %v3782_v20, %v3781_v57  ;;  %8488 = vst [vmem:[#allocation32_spill] sm:$0xff] %v7586_v49 }
 0x4fd   :  { %v3907_v30 = vsel %vm774_vm5, %v3836_v42, 0.0  ;;  %v3784_v4 = vsel %vm774_vm5, %v3712_v21, 0.0  ;;  %v3837_v27 = vmul.f32 %v3712_v21, %v7556_v8 }
 0x4fe   :  { %v3908_v9 = vadd.f32 %v3907_v30, %v3906_v23  ;;  %v3785_v22 = vadd.f32 %v3784_v4, %v3783_v17  ;;  %v7592_v4 = vpop.permute.xlu0 %4121 }
 0x4ff   :  { %v3909_v2 = vsel %vm774_vm5, %v3837_v27, 0.0  ;;  %8489 = vst [vmem:[#allocation106_spill] sm:$0xff] %v7592_v4  ;;  %v7594_v27 = vpop.permute.xlu1 %4123 }
 0x500   :  { %v3910_v33 = vadd.f32 %v3909_v2, %v3908_v9  ;;  %8490 = vst [vmem:[#allocation93_spill] sm:$0xff] %v7594_v27 }
 0x502   :  { %v7598_v2 = vpop.permute.xlu0 %4125 }
 0x503   :  { %8491 = vst [vmem:[#allocation107_spill] sm:$0xff] %v7598_v2 }
 0x505   :  { %v7574_v5 = vpop.f32.mrb[44].mxu1 }
 0x506   :  { %v3713_v52 = vmul.f32 %v8485_v37, %v7574_v5  ;;  %v3656_v43 = vpop.f32.mrb[45].mxu1 }
 0x507   :  { %v7578_v55 = vpop.f32.mrb[46].mxu1  ;;  %v7602_v43 = vpop.permute.xlu1 %4127 }
 0x508   :  { %v3786_v50 = vsel %vm774_vm5, %v3713_v52, 0.0  ;;  %v3838_v57 = vmul.f32 %v3713_v52, %v7574_v5  ;;  %v3714_v23 = vmul.f32 %v8487_v16, %v7578_v55  ;;  %v3659_v46 = vpop.f32.mrb[47].mxu1  ;;  %8493 = vst [vmem:[#allocation92_spill] sm:$0xff] %v7602_v43  ;;  %v8494_v16 = vld [vmem:[#allocation44_spill] sm:$0xff] }
 0x509   :  { %v3787_v62 = vadd.f32 %v3786_v50, %v3785_v22  ;;  %v8492_v22 = vld [vmem:[#allocation42_spill] sm:$0xff] }
 0x50a   :  { %v3911_v20 = vsel %vm774_vm5, %v3838_v57, 0.0  ;;  %v3788_v42 = vsel %vm774_vm5, %v3714_v23, 0.0  ;;  %v3839_v10 = vmul.f32 %v3714_v23, %v7578_v55 }
 0x50b   :  { %v3912_v21 = vadd.f32 %v3911_v20, %v3910_v33  ;;  %v3789_v40 = vadd.f32 %v3788_v42, %v3787_v62  ;;  %v7616_v43 = vpop.permute.xlu1 %4131 }
 0x50c   :  { %v3913_v17 = vsel %vm774_vm5, %v3839_v10, 0.0  ;;  %8496 = vst [vmem:[#allocation48_spill] sm:$0xff] %v7616_v43 }
 0x50d   :  { %v3914_v30 = vadd.f32 %v3913_v17, %v3912_v21 }
 0x514   :  { %v7596_v9 = vpop.f32.mrb[48].mxu1 }
 0x515   :  { %v3715_v37 = vmul.f32 %v8492_v22, %v7596_v9  ;;  %v3664_v52 = vpop.f32.mrb[49].mxu1  ;;  %v7613_v22 = vpop.permute.xlu0 %4129 }
 0x516   :  { %v7604_v50 = vpop.f32.mrb[50].mxu1  ;;  %8495 = vst [vmem:[#allocation108_spill] sm:$0xff] %v7613_v22 }
 0x517   :  { %v3790_v33 = vsel %vm774_vm5, %v3715_v37, 0.0  ;;  %v3840_v57 = vmul.f32 %v3715_v37, %v7596_v9  ;;  %v3716_v23 = vmul.f32 %v8494_v16, %v7604_v50  ;;  %v3667_v46 = vpop.f32.mrb[51].mxu1  ;;  %v7620_v16 = vpop.permute.xlu1 %4135 }
 0x518   :  { %v3791_v62 = vadd.f32 %v3790_v33, %v3789_v40  ;;  %8498 = vst [vmem:[#allocation95_spill] sm:$0xff] %v7620_v16  ;;  %v8499_v33 = vld [vmem:[#allocation41_spill] sm:$0xff] }
 0x519   :  { %v3915_v20 = vsel %vm774_vm5, %v3840_v57, 0.0  ;;  %v3792_v42 = vsel %vm774_vm5, %v3716_v23, 0.0  ;;  %v3841_v10 = vmul.f32 %v3716_v23, %v7604_v50  ;;  %v7618_v2 = vpop.permute.xlu0 %4133 }
 0x51a   :  { %v3916_v21 = vadd.f32 %v3915_v20, %v3914_v30  ;;  %v3793_v17 = vadd.f32 %v3792_v42, %v3791_v62  ;;  %8497 = vst [vmem:[#allocation89_spill] sm:$0xff] %v7618_v2  ;;  %v8500_v20 = vld [vmem:[#allocation43_spill] sm:$0xff] }
 0x51b   :  { %v3917_v52 = vsel %vm774_vm5, %v3841_v10, 0.0  ;;  %v7635_v43 = vpop.permute.xlu1 %4139 }
 0x51c   :  { %v3918_v37 = vadd.f32 %v3917_v52, %v3916_v21  ;;  %8501 = vst [vmem:[#allocation110_spill] sm:$0xff] %v7635_v43 }
 0x521   :  { %v7622_v40 = vpop.f32.mrb[52].mxu1 }
 0x522   :  { %v3717_v57 = vmul.f32 %v8499_v33, %v7622_v40  ;;  %v3672_v46 = vpop.f32.mrb[53].mxu1  ;;  %v7637_v33 = vpop.permute.xlu0 %4137 }
 0x523   :  { %v7626_v23 = vpop.f32.mrb[54].mxu1 }
 0x524   :  { %v3794_v30 = vsel %vm774_vm5, %v3717_v57, 0.0  ;;  %v3842_v62 = vmul.f32 %v3717_v57, %v7622_v40  ;;  %v3718_v42 = vmul.f32 %v8500_v20, %v7626_v23  ;;  %v3675_v10 = vpop.f32.mrb[55].mxu1 }
 0x525   :  { %v3795_v21 = vadd.f32 %v3794_v30, %v3793_v17  ;;  %v7640_v10 = vpop.permute.xlu1 %4143 }
 0x526   :  { %v3919_v52 = vsel %vm774_vm5, %v3842_v62, 0.0  ;;  %v3796_v16 = vsel %vm774_vm5, %v3718_v42, 0.0  ;;  %v3843_v2 = vmul.f32 %v3718_v42, %v7626_v23  ;;  %8502 = vst [vmem:[#allocation49_spill] sm:$0xff] %v7640_v10  ;;  %v7642_v17 = vpop.permute.xlu0 %4141 }
 0x527   :  { %v3920_v46 = vadd.f32 %v3919_v52, %v3918_v37  ;;  %v3797_v22 = vadd.f32 %v3796_v16, %v3795_v21  ;;  %8503 = vst [vmem:[#allocation94_spill] sm:$0xff] %v7642_v17 }
 0x528   :  { %v3921_v27 = vsel %vm774_vm5, %v3843_v2, 0.0 }
 0x529   :  { %v3798_v57 = vrot.slane %v3797_v22, 4  ;;  %v3922_v4 = vadd.f32 %v3921_v27, %v3920_v46  ;;  %v7644_v29 = vpop.permute.xlu1 %4147 }
 0x52a   :  { %8504 = vst [vmem:[#allocation50_spill] sm:$0xff] %v7644_v29  ;;  %v7646_v37 = vpop.permute.xlu0 %4145 }
 0x52b   :  { %v3799_v49 = vadd.f32 %v3798_v57, %v3797_v22  ;;  %v3923_v20 = vrot.slane %v3922_v4, 4  ;;  %8505 = vst [vmem:[#allocation86_spill] sm:$0xff] %v7646_v37 }
 0x52d   :  { %v3800_v30 = vrot.slane %v3799_v49, 2  ;;  %v3924_v62 = vadd.f32 %v3923_v20, %v3922_v4  ;;  %v7664_v57 = vpop.permute.xlu1 %4151 }
 0x52e   :  { %8506 = vst [vmem:[#allocation51_spill] sm:$0xff] %v7664_v57  ;;  %v7666_v20 = vpop.permute.xlu0 %4149 }
 0x52f   :  { %v3801_v41 = vadd.f32 %v3800_v30, %v3799_v49  ;;  %v3925_v42 = vrot.slane %v3924_v62, 2  ;;  %8507 = vst [vmem:[#allocation87_spill] sm:$0xff] %v7666_v20 }
 0x531   :  { %v3802_v53 = vrot.slane %v3801_v41, 1  ;;  %v3926_v43 = vadd.f32 %v3925_v42, %v3924_v62 }
 0x533   :  { %v3803_v16 = vadd.f32 %v3802_v53, %v3801_v41  ;;  %v3927_v2 = vrot.slane %v3926_v43, 1 }
 0x535   :  { %v3928_v21 = vadd.f32 %v3927_v2, %v3926_v43  ;;  %v7648_v27 = vmul.f32 0.0078125, %v3803_v16  ;;  %v7712_v16 = vpop.permute.xlu1 %4155 }
 0x536   :  { %8508 = vst [vmem:[#allocation111_spill] sm:$0xff] %v7712_v16 }
 0x537   :  { %v3930_v22 = vmul.f32 0.0078125, %v3928_v21  ;;  %v3931_v52 = vmul.f32 %v7648_v27, %v7648_v27  ;;  %v3934_v4 = vsub.f32 %v7332_v58, %v7648_v27  ;;  %v3935_v49 = vsub.f32 %v7338_v39, %v7648_v27 }
 0x538   :  { %v3936_v46 = vsub.f32 %v7350_v19, %v7648_v27  ;;  %v3937_v53 = vsub.f32 %v7356_v26, %v7648_v27  ;;  %v3938_v41 = vsub.f32 %v7368_v7, %v7648_v27  ;;  %v3939_v43 = vsub.f32 %v7374_v35, %v7648_v27 }
 0x539   :  { %v3932_v58 = vsub.f32 %v3930_v22, %v3931_v52  ;;  %v3940_v39 = vsub.f32 %v7386_v45, %v7648_v27  ;;  %v3941_v19 = vsub.f32 %v7392_v36, %v7648_v27  ;;  %v3942_v26 = vsub.f32 %v7404_v54, %v7648_v27 }
 0x53a   :  { %v3943_v7 = vsub.f32 %v7410_v51, %v7648_v27  ;;  %v3944_v35 = vsub.f32 %v7424_v13, %v7648_v27  ;;  %v3945_v30 = vsub.f32 %v7428_v15, %v7648_v27  ;;  %v3946_v62 = vsub.f32 %v7328_v34, %v7648_v27 }
 0x53b   :  { %v3933_v42 = vmax.f32 %v3932_v58, 0.0  ;;  %v3947_v45 = vsub.f32 %v7330_v1, %v7648_v27  ;;  %v3948_v36 = vsub.f32 %v7336_v32, %v7648_v27  ;;  %v3949_v54 = vsub.f32 %v7340_v24, %v7648_v27 }
 0x53c   :  { %v3950_v51 = vsub.f32 %v7354_v59, %v7648_v27  ;;  %v3951_v13 = vsub.f32 %v7362_v31, %v7648_v27  ;;  %v3952_v15 = vsub.f32 %v7372_v18, %v7648_v27  ;;  %v3953_v34 = vsub.f32 %v7380_v63, %v7648_v27 }
 0x53d   :  { %v3954_v1 = vsub.f32 %v7390_v48, %v7648_v27  ;;  %v3955_v32 = vsub.f32 %v7398_v47, %v7648_v27  ;;  %v3956_v24 = vsub.f32 %v7408_v28, %v7648_v27  ;;  %v3957_v59 = vsub.f32 %v7416_v12, %v7648_v27  ;;  %v7714_v47 = vpop.permute.xlu0 %4153 }
 0x53e   :  { %v3958_v31 = vsub.f32 %v7430_v11, %v7648_v27  ;;  %v3959_v18 = vsub.f32 %v7439_v6, %v7648_v27  ;;  %v3960_v63 = vsub.f32 %v7456_v3, %v7648_v27  ;;  %v3961_v48 = vsub.f32 %v7463_v60, %v7648_v27  ;;  %8509 = vst [vmem:[#allocation52_spill] sm:$0xff] %v7714_v47 }
 0x53f   :  { %v3962_v28 = vsub.f32 %v7485_v38, %v7648_v27  ;;  %v3963_v12 = vsub.f32 %v7492_v44, %v7648_v27  ;;  %v3964_v11 = vsub.f32 %v7524_v61, %v7648_v27  ;;  %v3965_v6 = vsub.f32 %v7531_v56, %v7648_v27 }
 0x540   :  { %v3966_v3 = vsub.f32 %v7552_v25, %v7648_v27  ;;  %v3967_v60 = vsub.f32 %v7556_v8, %v7648_v27  ;;  %v3968_v2 = vsub.f32 %v7574_v5, %v7648_v27  ;;  %v3969_v38 = vsub.f32 %v7578_v55, %v7648_v27  ;;  %v7740_v8 = vpop.permute.xlu1 %4159 }
 0x541   :  { %v3970_v44 = vsub.f32 %v7596_v9, %v7648_v27  ;;  %v3971_v61 = vsub.f32 %v7604_v50, %v7648_v27  ;;  %v3972_v56 = vsub.f32 %v7622_v40, %v7648_v27  ;;  %v3973_v25 = vsub.f32 %v7626_v23, %v7648_v27  ;;  %8510 = vst [vmem:[#allocation97_spill] sm:$0xff] %v7740_v8  ;;  %v7742_v5 = vpop.permute.xlu0 %4157  ;;  %v3677_v9 = vld [vmem:[%s8063_s5] sm:$0x1]  ;;  %v8516_v23 = vld [vmem:[#allocation45_spill] sm:$0xff] }
 0x542   :  { %v3974_v21 = vadd.f32 1e-05, %v3933_v42  ;;  %8511 = vst [vmem:[#allocation112_spill] sm:$0xff] %v7742_v5  ;;  %v8517_v27 = vsub.s32 0, %v8516_v23 }
 0x544   :  { %4715 = vrsqrt.f32 %v3974_v21  ;;  %v7744_v22 = vpop.permute.xlu1 %4163 }
 0x545   :  { %8512 = vst [vmem:[#allocation53_spill] sm:$0xff] %v7744_v22  ;;  %v7746_v55 = vpop.permute.xlu0 %4161 }
 0x546   :  { %8513 = vst [vmem:[#allocation96_spill] sm:$0xff] %v7746_v55 }
 0x548   :  { %v7751_v40 = vpop.permute.xlu1 %4167 }
 0x549   :  { %8514 = vst [vmem:[#allocation113_spill] sm:$0xff] %v7751_v40  ;;  %v7753_v58 = vpop.permute.xlu0 %4165 }
 0x54a   :  { %8515 = vst [vmem:[#allocation54_spill] sm:$0xff] %v7753_v58 }
 0x54c   :  { %v7757_v58 = vpop.permute.xlu1 %4171 }
 0x54d   :  { %8518 = vst [vmem:[#allocation90_spill] sm:$0xff] %v7757_v58  ;;  %v7759_v23 = vpop.permute.xlu0 %4169 }
 0x54e   :  { %v4716_v50 = vpop.eup %4715  ;;  %8519 = vst [vmem:[#allocation99_spill] sm:$0xff] %v7759_v23 }
 0x54f   :  { %v3976_v52 = vmul.f32 %v4716_v50, %v3677_v9 }
 0x551   :  { %v3981_v42 = vrot.slane %v3976_v52, %v8517_v27 }
 0x553   :  { %v3983_v21 = vmul.f32 %v3981_v42, %v3934_v4  ;;  %v3984_v8 = vmul.f32 %v3981_v42, %v3935_v49  ;;  %v3985_v5 = vmul.f32 %v3981_v42, %v3936_v46  ;;  %v3986_v16 = vmul.f32 %v3981_v42, %v3937_v53 }
 0x554   :  { %v3987_v22 = vmul.f32 %v3981_v42, %v3938_v41  ;;  %v3988_v47 = vmul.f32 %v3981_v42, %v3939_v43  ;;  %v3989_v55 = vmul.f32 %v3981_v42, %v3940_v39  ;;  %v3990_v57 = vmul.f32 %v3981_v42, %v3941_v19 }
 0x555   :  { %v3991_v20 = vmul.f32 %v3981_v42, %v3942_v26  ;;  %v3992_v29 = vmul.f32 %v3981_v42, %v3943_v7  ;;  %v3993_v37 = vmul.f32 %v3981_v42, %v3944_v35  ;;  %v3994_v10 = vmul.f32 %v3981_v42, %v3945_v30 }
 0x556   :  { %v3995_v9 = vmul.f32 %v3981_v42, %v3946_v62  ;;  %v3996_v50 = vmul.f32 %v3981_v42, %v3947_v45  ;;  %v3997_v40 = vmul.f32 %v3981_v42, %v3948_v36  ;;  %v3998_v17 = vmul.f32 %v3981_v42, %v3949_v54  ;;  %v4451_v62 = vld [vmem:[%s8064_s6] ss:$0 sm:$0xff] }
 0x557   :  { %v3999_v4 = vmul.f32 %v3981_v42, %v3950_v51  ;;  %v4000_v49 = vmul.f32 %v3981_v42, %v3951_v13  ;;  %v4001_v46 = vmul.f32 %v3981_v42, %v3952_v15  ;;  %v4002_v53 = vmul.f32 %v3981_v42, %v3953_v34 }
 0x558   :  { %v4003_v41 = vmul.f32 %v3981_v42, %v3954_v1  ;;  %v4004_v43 = vmul.f32 %v3981_v42, %v3955_v32  ;;  %v4005_v39 = vmul.f32 %v3981_v42, %v3956_v24  ;;  %v4006_v19 = vmul.f32 %v3981_v42, %v3957_v59 }
 0x559   :  { %v4007_v26 = vmul.f32 %v3981_v42, %v3958_v31  ;;  %v4008_v7 = vmul.f32 %v3981_v42, %v3959_v18  ;;  %v4009_v35 = vmul.f32 %v3981_v42, %v3960_v63  ;;  %v4010_v30 = vmul.f32 %v3981_v42, %v3961_v48  ;;  %v7764_v31 = vpop.permute.xlu1 %4175  ;;  %v7766_v18 = vpop.permute.xlu0 %4173 }
 0x55a   :  { %v4011_v45 = vmul.f32 %v3981_v42, %v3962_v28  ;;  %v4012_v36 = vmul.f32 %v3981_v42, %v3963_v12  ;;  %v4013_v54 = vmul.f32 %v3981_v42, %v3964_v11  ;;  %v4014_v52 = vmul.f32 %v3981_v42, %v3965_v6  ;;  %8520 = vst [vmem:[#allocation114_spill] sm:$0xff] %v7764_v31 }
 0x55b   :  { %v4015_v51 = vmul.f32 %v3981_v42, %v3966_v3  ;;  %v4016_v13 = vmul.f32 %v3981_v42, %v3967_v60  ;;  %v4017_v15 = vmul.f32 %v3981_v42, %v3968_v2  ;;  %v4018_v34 = vmul.f32 %v3981_v42, %v3969_v38  ;;  %8521 = vst [vmem:[#allocation55_spill] sm:$0xff] %v7766_v18 }
 0x55c   :  { %v4019_v1 = vmul.f32 %v3981_v42, %v3970_v44  ;;  %v4020_v32 = vmul.f32 %v3981_v42, %v3971_v61  ;;  %v4021_v24 = vmul.f32 %v3981_v42, %v3972_v56  ;;  %v4022_v59 = vmul.f32 %v3981_v42, %v3973_v25 }
 0x55d   :  { %v4029_v63 = vadd.f32 %v4451_v62, %v3983_v21  ;;  %v4030_v48 = vadd.f32 %v4451_v62, %v3984_v8  ;;  %v4031_v27 = vadd.f32 %v4451_v62, %v3985_v5  ;;  %v4032_v58 = vadd.f32 %v4451_v62, %v3986_v16 }
 0x55e   :  { %v4033_v28 = vadd.f32 %v4451_v62, %v3987_v22  ;;  %v4034_v12 = vadd.f32 %v4451_v62, %v3988_v47  ;;  %v4035_v11 = vadd.f32 %v4451_v62, %v3989_v55  ;;  %v4036_v6 = vadd.f32 %v4451_v62, %v3990_v57  ;;  %v4180_v22 = vpop.permute.xlu1 %4179  ;;  %v4178_v47 = vpop.permute.xlu0 %4177 }
 0x55f   :  { %v4037_v3 = vadd.f32 %v4451_v62, %v3991_v20  ;;  %v4038_v60 = vadd.f32 %v4451_v62, %v3992_v29  ;;  %v4039_v2 = vadd.f32 %v4451_v62, %v3993_v37  ;;  %v4040_v38 = vadd.f32 %v4451_v62, %v3994_v10 }
 0x560   :  { %v4041_v44 = vadd.f32 %v4451_v62, %v3995_v9  ;;  %v4042_v61 = vadd.f32 %v4451_v62, %v3996_v50  ;;  %v4043_v56 = vadd.f32 %v4451_v62, %v3997_v40  ;;  %v4044_v25 = vadd.f32 %v4451_v62, %v3998_v17 }
 0x561   :  { %v4045_v42 = vadd.f32 %v4451_v62, %v3999_v4  ;;  %v4046_v31 = vadd.f32 %v4451_v62, %v4000_v49  ;;  %v4047_v23 = vadd.f32 %v4451_v62, %v4001_v46  ;;  %v4048_v18 = vadd.f32 %v4451_v62, %v4002_v53 }
 0x562   :  { %v4049_v21 = vadd.f32 %v4451_v62, %v4003_v41  ;;  %v4050_v8 = vadd.f32 %v4451_v62, %v4004_v43  ;;  %v4051_v5 = vadd.f32 %v4451_v62, %v4005_v39  ;;  %v4052_v16 = vadd.f32 %v4451_v62, %v4006_v19 }
 0x563   :  { %v4053_v55 = vadd.f32 %v4451_v62, %v4007_v26  ;;  %v4054_v57 = vadd.f32 %v4451_v62, %v4008_v7  ;;  %v4055_v20 = vadd.f32 %v4451_v62, %v4009_v35  ;;  %v4056_v29 = vadd.f32 %v4451_v62, %v4010_v30  ;;  %v8522_v26 = vld [vmem:[#allocation31_spill] sm:$0xff] }
 0x564   :  { %v4057_v37 = vadd.f32 %v4451_v62, %v4011_v45  ;;  %v4058_v10 = vadd.f32 %v4451_v62, %v4012_v36  ;;  %v4059_v9 = vadd.f32 %v4451_v62, %v4013_v54  ;;  %v4060_v50 = vadd.f32 %v4451_v62, %v4014_v52  ;;  %v8523_v35 = vld [vmem:[#allocation91_spill] sm:$0xff]  ;;  %v8524_v45 = vld [vmem:[#allocation105_spill] sm:$0xff]  ;;  %v8525_v54 = vld [vmem:[#allocation32_spill] sm:$0xff] }
 0x565   :  { %v4061_v40 = vadd.f32 %v4451_v62, %v4015_v51  ;;  %v4062_v17 = vadd.f32 %v4451_v62, %v4016_v13  ;;  %v4063_v4 = vadd.f32 %v4451_v62, %v4017_v15  ;;  %v4064_v49 = vadd.f32 %v4451_v62, %v4018_v34  ;;  %v8526_v51 = vld [vmem:[#allocation106_spill] sm:$0xff]  ;;  %v8527_v15 = vld [vmem:[#allocation93_spill] sm:$0xff] }
 0x566   :  { %v4065_v46 = vadd.f32 %v4451_v62, %v4019_v1  ;;  %v4066_v53 = vadd.f32 %v4451_v62, %v4020_v32  ;;  %v4067_v41 = vadd.f32 %v4451_v62, %v4021_v24  ;;  %v4068_v43 = vadd.f32 %v4451_v62, %v4022_v59  ;;  %v4184_v1 = vpop.permute.xlu1 %4183  ;;  %v4182_v32 = vpop.permute.xlu0 %4181  ;;  %v8528_v24 = vld [vmem:[#allocation107_spill] sm:$0xff] }
 0x567   :  { %v4229_v39 = vadd.f32 %v7562_v14, %v4029_v63  ;;  %v4230_v19 = vadd.f32 %v7567_v0, %v4030_v48  ;;  %v4231_v7 = vadd.f32 %v8522_v26, %v4031_v27  ;;  %v4232_v30 = vadd.f32 %v8523_v35, %v4032_v58  ;;  %v8529_v14 = vld [vmem:[#allocation92_spill] sm:$0xff]  ;;  %v8532_v27 = vld [vmem:[#allocation89_spill] sm:$0xff] }
 0x568   :  { %v4233_v36 = vadd.f32 %v8524_v45, %v4033_v28  ;;  %v4234_v52 = vadd.f32 %v8525_v54, %v4034_v12  ;;  %v4235_v13 = vadd.f32 %v8526_v51, %v4035_v11  ;;  %v4236_v34 = vadd.f32 %v8527_v15, %v4036_v6  ;;  %v8530_v0 = vld [vmem:[#allocation108_spill] sm:$0xff]  ;;  %v8533_v12 = vld [vmem:[#allocation95_spill] sm:$0xff] }
 0x569   :  { %v7777_v62 = vadd.f32 %v8528_v24, %v4037_v3  ;;  %v7780_v59 = vadd.f32 %v8529_v14, %v4038_v60  ;;  %v7783_v63 = vadd.f32 %v8530_v0, %v4039_v2  ;;  %v8531_v58 = vld [vmem:[#allocation48_spill] sm:$0xff]  ;;  %v7789_v28 = vadd.f32 %v8532_v27, %v4041_v44  ;;  %v8534_v3 = vld [vmem:[#allocation110_spill] sm:$0xff]  ;;  %v8536_v2 = vld [vmem:[#allocation49_spill] sm:$0xff] }
 0x56a   :  { %v7786_v48 = vadd.f32 %v8531_v58, %v4040_v38  ;;  %v7792_v11 = vadd.f32 %v8533_v12, %v4042_v61  ;;  %v7795_v6 = vadd.f32 %v7637_v33, %v4043_v56  ;;  %v7798_v26 = vadd.f32 %v8534_v3, %v4044_v25  ;;  %v8535_v60 = vld [vmem:[#allocation94_spill] sm:$0xff]  ;;  %v8539_v61 = vld [vmem:[#allocation87_spill] sm:$0xff]  ;;  %v8541_v25 = vld [vmem:[#allocation52_spill] sm:$0xff] }
 0x56b   :  { %v7801_v35 = vadd.f32 %v8535_v60, %v4045_v42  ;;  %v7804_v45 = vadd.f32 %v8536_v2, %v4046_v31  ;;  %v8537_v38 = vld [vmem:[#allocation86_spill] sm:$0xff]  ;;  %v7813_v15 = vadd.f32 %v8539_v61, %v4049_v21  ;;  %v8540_v33 = vld [vmem:[#allocation51_spill] sm:$0xff]  ;;  %v7819_v24 = vadd.f32 %v8541_v25, %v4051_v5  ;;  %v8543_v31 = vld [vmem:[#allocation112_spill] sm:$0xff] }
 0x56c   :  { %v7807_v54 = vadd.f32 %v8537_v38, %v4047_v23  ;;  %v8538_v44 = vld [vmem:[#allocation50_spill] sm:$0xff]  ;;  %v7816_v56 = vadd.f32 %v8540_v33, %v4050_v8  ;;  %v8542_v42 = vld [vmem:[#allocation111_spill] sm:$0xff]  ;;  %v7825_v0 = vadd.f32 %v8543_v31, %v4053_v55  ;;  %v8544_v23 = vld [vmem:[#allocation97_spill] sm:$0xff]  ;;  %v7854_v25 = vadd.f32 %v4178_v47, %v4063_v4 }
 0x56d   :  { %v7810_v51 = vadd.f32 %v8538_v44, %v4048_v18  ;;  %v7822_v14 = vadd.f32 %v8542_v42, %v4052_v16  ;;  %v7828_v58 = vadd.f32 %v8544_v23, %v4054_v57  ;;  %v8545_v18 = vld [vmem:[#allocation96_spill] sm:$0xff]  ;;  %v8546_v21 = vld [vmem:[#allocation53_spill] sm:$0xff]  ;;  %v8547_v8 = vld [vmem:[#allocation54_spill] sm:$0xff]  ;;  %v4188_v57 = vpop.permute.xlu1 %4187  ;;  %v4186_v44 = vpop.permute.xlu0 %4185  ;;  %v7860_v42 = vadd.f32 %v4184_v1, %v4066_v53 }
 0x56e   :  { %v7831_v27 = vadd.f32 %v8545_v18, %v4055_v20  ;;  %v7834_v12 = vadd.f32 %v8546_v21, %v4056_v29  ;;  %v7837_v3 = vadd.f32 %v8547_v8, %v4057_v37  ;;  %v8548_v5 = vld [vmem:[#allocation113_spill] sm:$0xff]  ;;  %v8549_v16 = vld [vmem:[#allocation99_spill] sm:$0xff]  ;;  %v8550_v55 = vld [vmem:[#allocation90_spill] sm:$0xff]  ;;  %v7856_v37 = vadd.f32 %v4180_v22, %v4064_v49 }
 0x56f   :  { %v7840_v60 = vadd.f32 %v8548_v5, %v4058_v10  ;;  %v7843_v2 = vadd.f32 %v8549_v16, %v4059_v9  ;;  %v7846_v38 = vadd.f32 %v8550_v55, %v4060_v50  ;;  %v8551_v61 = vld [vmem:[#allocation55_spill] sm:$0xff]  ;;  %v8552_v33 = vld [vmem:[#allocation114_spill] sm:$0xff]  ;;  %v7858_v10 = vadd.f32 %v4182_v32, %v4065_v46 }
 0x570   :  { %v7849_v20 = vadd.f32 %v8551_v61, %v4061_v40  ;;  %v7852_v29 = vadd.f32 %v8552_v33, %v4062_v17  ;;  %v7862_v9 = vadd.f32 %v4186_v44, %v4067_v41  ;;  %v7864_v50 = vadd.f32 %v4188_v57, %v4068_v43 }
 0x571   :  { %v4269_v31 = vmax.f32 %v4229_v39, 0.0  ;;  %v4270_v23 = vmax.f32 %v4230_v19, 0.0  ;;  %v4271_v18 = vmax.f32 %v4231_v7, 0.0  ;;  %v4272_v40 = vmax.f32 %v4232_v30, 0.0 }
 0x572   :  { %v4273_v21 = vmax.f32 %v4233_v36, 0.0  ;;  %v4274_v8 = vmax.f32 %v4234_v52, 0.0  ;;  %v4275_v17 = vmax.f32 %v4235_v13, 0.0  ;;  %v4276_v5 = vmax.f32 %v4236_v34, 0.0 }
 0x573   :  { %v4277_v47 = vmax.f32 %v7777_v62, 0.0  ;;  %v4278_v22 = vmax.f32 %v7780_v59, 0.0  ;;  %v4279_v4 = vmax.f32 %v7783_v63, 0.0  ;;  %v4280_v49 = vmax.f32 %v7786_v48, 0.0  ;;  %4309 = vst.msk [vmem:[%s8065_s7] sm:$0xff] %vm774_vm5, %v4269_v31  ;;  %4310 = vst.msk [vmem:[%s8065_s7 + $0x8] sm:$0xff] %vm774_vm5, %v4270_v23 }
 0x574   :  { %4311 = vst.msk [vmem:[%s8065_s7 + $0x10] sm:$0xff] %vm774_vm5, %v4271_v18  ;;  %4312 = vst.msk [vmem:[%s8065_s7 + $0x18] sm:$0xff] %vm774_vm5, %v4272_v40  ;;  %v4281_v46 = vmax.f32 %v7789_v28, 0.0  ;;  %v4282_v53 = vmax.f32 %v7792_v11, 0.0  ;;  %v4283_v41 = vmax.f32 %v7795_v6, 0.0  ;;  %v4284_v43 = vmax.f32 %v7798_v26, 0.0 }
 0x575   :  { %4313 = vst.msk [vmem:[%s8065_s7 + $0x20] sm:$0xff] %vm774_vm5, %v4273_v21  ;;  %4314 = vst.msk [vmem:[%s8065_s7 + $0x28] sm:$0xff] %vm774_vm5, %v4274_v8  ;;  %v4285_v39 = vmax.f32 %v7801_v35, 0.0  ;;  %v4286_v19 = vmax.f32 %v7804_v45, 0.0  ;;  %v4287_v7 = vmax.f32 %v7807_v54, 0.0  ;;  %v4288_v30 = vmax.f32 %v7810_v51, 0.0 }
 0x576   :  { %4315 = vst.msk [vmem:[%s8065_s7 + $0x30] sm:$0xff] %vm774_vm5, %v4275_v17  ;;  %4316 = vst.msk [vmem:[%s8065_s7 + $0x38] sm:$0xff] %vm774_vm5, %v4276_v5  ;;  %v4289_v36 = vmax.f32 %v7813_v15, 0.0  ;;  %v4290_v52 = vmax.f32 %v7816_v56, 0.0  ;;  %v4291_v13 = vmax.f32 %v7819_v24, 0.0  ;;  %v4292_v34 = vmax.f32 %v7822_v14, 0.0 }
 0x577   :  { %4317 = vst.msk [vmem:[%s8065_s7 + $0x40] sm:$0xff] %vm774_vm5, %v4277_v47  ;;  %4318 = vst.msk [vmem:[%s8065_s7 + $0x48] sm:$0xff] %vm774_vm5, %v4278_v22  ;;  %v4293_v1 = vmax.f32 %v7825_v0, 0.0  ;;  %v4294_v32 = vmax.f32 %v7828_v58, 0.0  ;;  %v4295_v62 = vmax.f32 %v7831_v27, 0.0  ;;  %v4296_v59 = vmax.f32 %v7834_v12, 0.0 }
 0x578   :  { %4319 = vst.msk [vmem:[%s8065_s7 + $0x50] sm:$0xff] %vm774_vm5, %v4279_v4  ;;  %4320 = vst.msk [vmem:[%s8065_s7 + $0x58] sm:$0xff] %vm774_vm5, %v4280_v49  ;;  %v4297_v63 = vmax.f32 %v7837_v3, 0.0  ;;  %v4298_v48 = vmax.f32 %v7840_v60, 0.0  ;;  %v4299_v28 = vmax.f32 %v7843_v2, 0.0  ;;  %v4300_v11 = vmax.f32 %v7846_v38, 0.0 }
 0x579   :  { %4321 = vst.msk [vmem:[%s8065_s7 + $0x60] sm:$0xff] %vm774_vm5, %v4281_v46  ;;  %4322 = vst.msk [vmem:[%s8065_s7 + $0x68] sm:$0xff] %vm774_vm5, %v4282_v53  ;;  %v4301_v6 = vmax.f32 %v7849_v20, 0.0  ;;  %v4302_v26 = vmax.f32 %v7852_v29, 0.0  ;;  %v4303_v35 = vmax.f32 %v7854_v25, 0.0  ;;  %v4304_v45 = vmax.f32 %v7856_v37, 0.0 }
 0x57a   :  { %4323 = vst.msk [vmem:[%s8065_s7 + $0x70] sm:$0xff] %vm774_vm5, %v4283_v41  ;;  %4324 = vst.msk [vmem:[%s8065_s7 + $0x78] sm:$0xff] %vm774_vm5, %v4284_v43  ;;  %v4305_v54 = vmax.f32 %v7858_v10, 0.0  ;;  %v4306_v51 = vmax.f32 %v7860_v42, 0.0  ;;  %v4307_v15 = vmax.f32 %v7862_v9, 0.0  ;;  %v4308_v56 = vmax.f32 %v7864_v50, 0.0 }
 0x57b   :  { %4325 = vst.msk [vmem:[%s8065_s7 + $0x80] sm:$0xff] %vm774_vm5, %v4285_v39  ;;  %4326 = vst.msk [vmem:[%s8065_s7 + $0x88] sm:$0xff] %vm774_vm5, %v4286_v19 }
 0x57c   :  { %4327 = vst.msk [vmem:[%s8065_s7 + $0x90] sm:$0xff] %vm774_vm5, %v4287_v7  ;;  %4328 = vst.msk [vmem:[%s8065_s7 + $0x98] sm:$0xff] %vm774_vm5, %v4288_v30 }
 0x57d   :  { %4329 = vst.msk [vmem:[%s8065_s7 + $0xa0] sm:$0xff] %vm774_vm5, %v4289_v36  ;;  %4330 = vst.msk [vmem:[%s8065_s7 + $0xa8] sm:$0xff] %vm774_vm5, %v4290_v52 }
 0x57e   :  { %4331 = vst.msk [vmem:[%s8065_s7 + $0xb0] sm:$0xff] %vm774_vm5, %v4291_v13  ;;  %4332 = vst.msk [vmem:[%s8065_s7 + $0xb8] sm:$0xff] %vm774_vm5, %v4292_v34 }
 0x57f   :  { %4333 = vst.msk [vmem:[%s8065_s7 + $0xc0] sm:$0xff] %vm774_vm5, %v4293_v1  ;;  %4334 = vst.msk [vmem:[%s8065_s7 + $0xc8] sm:$0xff] %vm774_vm5, %v4294_v32 }
 0x580   :  { %4335 = vst.msk [vmem:[%s8065_s7 + $0xd0] sm:$0xff] %vm774_vm5, %v4295_v62  ;;  %4336 = vst.msk [vmem:[%s8065_s7 + $0xd8] sm:$0xff] %vm774_vm5, %v4296_v59 }
 0x581   :  { %4337 = vst.msk [vmem:[%s8065_s7 + $0xe0] sm:$0xff] %vm774_vm5, %v4297_v63  ;;  %4338 = vst.msk [vmem:[%s8065_s7 + $0xe8] sm:$0xff] %vm774_vm5, %v4298_v48 }
 0x582   :  { %4339 = vst.msk [vmem:[%s8065_s7 + $0xf0] sm:$0xff] %vm774_vm5, %v4299_v28  ;;  %4340 = vst.msk [vmem:[%s8065_s7 + $0xf8] sm:$0xff] %vm774_vm5, %v4300_v11 }
 0x583   :  { %4341 = vst.msk [vmem:[%s8065_s7 + $0x100] sm:$0xff] %vm774_vm5, %v4301_v6  ;;  %4342 = vst.msk [vmem:[%s8065_s7 + $0x108] sm:$0xff] %vm774_vm5, %v4302_v26 }
 0x584   :  { %4343 = vst.msk [vmem:[%s8065_s7 + $0x110] sm:$0xff] %vm774_vm5, %v4303_v35  ;;  %4344 = vst.msk [vmem:[%s8065_s7 + $0x118] sm:$0xff] %vm774_vm5, %v4304_v45 }
 0x585   :  { %4345 = vst.msk [vmem:[%s8065_s7 + $0x120] sm:$0xff] %vm774_vm5, %v4305_v54  ;;  %4346 = vst.msk [vmem:[%s8065_s7 + $0x128] sm:$0xff] %vm774_vm5, %v4306_v51 }
 0x586   :  { %4347 = vst.msk [vmem:[%s8065_s7 + $0x130] sm:$0xff] %vm774_vm5, %v4307_v15  ;;  %4348 = vst.msk [vmem:[%s8065_s7 + $0x138] sm:$0xff] %vm774_vm5, %v4308_v56 }

</bundles_post_ra>
